<compile_context>
chip_gen: v6e
topology: v6e:2x2x1
jax: 0.10.0
libtpu: 0.0.40
codegen_flags: <defaults>
</compile_context>

<pallas_src>
import functools
import math

import jax
import jax.numpy as jnp
from jax.experimental import pallas as pl
from jax.experimental.pallas import tpu as pltpu

LANE = 128
EDGE_TILE = 128   # rows per edge tile   (use 256 on v6e/v7x for large graphs)
NODE_TILE = 128   # rows per dst-node tile
VMEM_LIMIT = 32 * 1024 * 1024


def _round_up(x, m):
    return ((x + m - 1) // m) * m


def _pad2(a, rows, cols):
    return jnp.pad(a, ((0, rows - a.shape[0]), (0, cols - a.shape[1])))


def _uniform(key, shape, scale):
    return jax.random.uniform(key, shape, jnp.float32, -scale, scale)


# --------------------------------------------------------------------------- #
# Kernel A: edge phase (gather -> message MLP -> GRU candidate update).
# Grid: 1-D over edge tiles, fully parallel.
# --------------------------------------------------------------------------- #
def _edge_kernel(src_ref, dst_ref, mem_ref, eattr_ref,
                 wm1_ref, bm1_ref, wm2_ref, bm2_ref,
                 wih_ref, bih_ref, whh_ref, bhh_ref,
                 upd_ref, *, n_pad, d_pad):
    f32, bf16 = jnp.float32, jnp.bfloat16
    tile_e = src_ref.shape[0]

    # One-hot gather selectors built in-kernel from int32 indices (padded edges
    # carry index -1 -> all-zero rows). bf16 selectors, f32 accumulation on MXU.
    cols = jax.lax.broadcasted_iota(jnp.int32, (tile_e, n_pad), 1)
    src_oh = (cols == src_ref[...]).astype(bf16)
    dst_oh = (cols == dst_ref[...]).astype(bf16)

    mem = mem_ref[...]                                           # bf16 [n_pad, d_pad]
    src_mem = jnp.dot(src_oh, mem, preferred_element_type=f32)   # [tile_e, d_pad]
    dst_mem = jnp.dot(dst_oh, mem, preferred_element_type=f32)

    # Message MLP: fused concat -> one K=3*128 bf16 matmul, bias+ReLU fused.
    msg_in = jnp.concatenate(
        [src_mem.astype(bf16), dst_mem.astype(bf16), eattr_ref[...]], axis=-1)
    h1 = jnp.dot(msg_in, wm1_ref[...], preferred_element_type=f32) + bm1_ref[...]
    h1 = jnp.maximum(h1, 0.0)
    msg = jnp.dot(h1.astype(bf16), wm2_ref[...], preferred_element_type=f32) + bm2_ref[...]

    # GRUCell(messages, dst_mem); gate order (r, z, n), per-gate 128-lane blocks.
    gi = jnp.dot(msg.astype(bf16), wih_ref[...], preferred_element_type=f32) + bih_ref[...]
    gh = jnp.dot(dst_mem.astype(bf16), whh_ref[...], preferred_element_type=f32) + bhh_ref[...]
    r = jax.nn.sigmoid(gi[:, 0:d_pad] + gh[:, 0:d_pad])
    z = jax.nn.sigmoid(gi[:, d_pad:2 * d_pad] + gh[:, d_pad:2 * d_pad])
    n = jnp.tanh(gi[:, 2 * d_pad:3 * d_pad] + r * gh[:, 2 * d_pad:3 * d_pad])
    upd_ref[...] = (1.0 - z) * n + z * dst_mem


# --------------------------------------------------------------------------- #
# Kernel B: node phase (adjacency counts -> multi-head attention -> classifier).
# Grid: 1-D over dst-node tiles, fully parallel.
# --------------------------------------------------------------------------- #
def _node_kernel(memall_ref, memtile_ref, src_ref, dst_ref,
                 wq_ref, bq_ref, wk_ref, bk_ref, wv_ref, bv_ref,
                 wskip_ref, bskip_ref, wc_ref, bc_ref,
                 logits_ref, *, heads, head_pad, attn_scale, tile_n):
    f32, bf16 = jnp.float32, jnp.bfloat16
    n_pad = memall_ref.shape[0]
    e_pad = src_ref.shape[0]
    tile_off = pl.program_id(0) * tile_n

    mem_all = memall_ref[...]                                    # bf16 [n_pad, d_pad]
    mem_tile = memtile_ref[...]                                  # bf16 [tile_n, d_pad]

    # Edge-multiplicity counts for this dst tile, built from raw indices:
    # cnt[i, j] = #edges with dst == tile_off+i and src == j (padded edges = -1).
    row_ids = jax.lax.broadcasted_iota(jnp.int32, (tile_n, e_pad), 0) + tile_off
    dsel = (row_ids == dst_ref[...]).astype(bf16)                # [tile_n, e_pad]
    col_ids = jax.lax.broadcasted_iota(jnp.int32, (e_pad, n_pad), 1)
    ssel = (col_ids == src_ref[...]).astype(bf16)                # [e_pad, n_pad]
    cnt = jnp.dot(dsel, ssel, preferred_element_type=f32)        # exact counts, f32
    has_edge = cnt > 0.0

    # Projections (bf16 MXU, f32 accumulation); per-head 128-lane blocks.
    q = jnp.dot(mem_tile, wq_ref[...], preferred_element_type=f32) + bq_ref[...]
    k = jnp.dot(mem_all, wk_ref[...], preferred_element_type=f32) + bk_ref[...]
    v = jnp.dot(mem_all, wv_ref[...], preferred_element_type=f32) + bv_ref[...]

    q_bf = q.astype(bf16)
    v_bf = v.astype(bf16)
    k_t = jnp.swapaxes(k, 0, 1).astype(bf16)   # one transpose shared by all heads

    heads_out = []
    for h in range(heads):
        lo, hi = h * head_pad, (h + 1) * head_pad
        s = jnp.dot(q_bf[:, lo:hi], k_t[lo:hi, :],
                    preferred_element_type=f32) * attn_scale     # [tile_n, n_pad]
        s = jnp.where(has_edge, s, -1e30)
        m = jnp.max(s, axis=-1, keepdims=True)
        p = cnt * jnp.exp(s - m)                                 # duplicate edges counted
        zsum = jnp.sum(p, axis=-1, keepdims=True)
        inv = jnp.where(zsum > 0.0,
                        pl.reciprocal(jnp.maximum(zsum, 1e-30), approx=True),
                        0.0)
        alpha = (p * inv).astype(bf16)
        # TODO(synk): training-mode attention dropout (p=0.1) not applied (eval mode).
        heads_out.append(jnp.dot(alpha, v_bf[:, lo:hi], preferred_element_type=f32))

    attn = jnp.concatenate(heads_out, axis=-1)                   # [tile_n, heads*128]
    zfeat = (attn
             + jnp.dot(mem_tile, wskip_ref[...], preferred_element_type=f32)
             + bskip_ref[...])

    logits_ref[...] = (jnp.dot(zfeat.astype(bf16), wc_ref[...],
                               preferred_element_type=f32) + bc_ref[...])


# --------------------------------------------------------------------------- #
# Parameter init (pre-padded lane-dense layouts; weights bf16, biases f32).
# --------------------------------------------------------------------------- #
def init_tgn_params(key, memory_dim, edge_feat_dim, out_channels, heads=2):
    d, de = memory_dim, edge_feat_dim
    dp, dep = _round_up(d, LANE), _round_up(de, LANE)
    hp, outp = _round_up(d, LANE), _round_up(out_channels, LANE)
    ks = iter(jax.random.split(key, 32))

    # MessageModule MLP: Linear(2d+de, d) -> ReLU -> Linear(d, d)
    s1 = 1.0 / math.sqrt(2 * d + de)
    wm1 = jnp.concatenate([_pad2(_uniform(next(ks), (d, d), s1), dp, dp),
                           _pad2(_uniform(next(ks), (d, d), s1), dp, dp),
                           _pad2(_uniform(next(ks), (de, d), s1), dep, dp)], axis=0)
    bm1 = _pad2(_uniform(next(ks), (1, d), s1), 1, dp)
    s2 = 1.0 / math.sqrt(d)
    wm2 = _pad2(_uniform(next(ks), (d, d), s2), dp, dp)
    bm2 = _pad2(_uniform(next(ks), (1, d), s2), 1, dp)

    # GRUCell(d, d): right-multiply layout, gate blocks (r, z, n) padded to 128.
    sg = 1.0 / math.sqrt(d)

    def gate_stack(kw, kb, in_dim, in_pad):
        w_blocks = [_pad2(_uniform(kk, (in_dim, d), sg), in_pad, dp)
                    for kk in jax.random.split(kw, 3)]
        b_blocks = [_pad2(_uniform(kk, (1, d), sg), 1, dp)
                    for kk in jax.random.split(kb, 3)]
        return jnp.concatenate(w_blocks, axis=1), jnp.concatenate(b_blocks, axis=1)

    wih, bih = gate_stack(next(ks), next(ks), d, dp)
    whh, bhh = gate_stack(next(ks), next(ks), d, dp)

    # TransformerConv(d, d, heads): per-head column blocks padded to 128.
    sa = 1.0 / math.sqrt(d)

    def head_lin(kw, kb):
        w_blocks = [_pad2(_uniform(kk, (d, d), sa), dp, hp)
                    for kk in jax.random.split(kw, heads)]
        b_blocks = [_pad2(_uniform(kk, (1, d), sa), 1, hp)
                    for kk in jax.random.split(kb, heads)]
        return jnp.concatenate(w_blocks, axis=1), jnp.concatenate(b_blocks, axis=1)

    wq, bq = head_lin(next(ks), next(ks))
    wk, bk = head_lin(next(ks), next(ks))
    wv, bv = head_lin(next(ks), next(ks))
    wskip, bskip = head_lin(next(ks), next(ks))

    # classifier Linear(heads*d, out_channels): per-head row blocks padded to 128.
    sc = 1.0 / math.sqrt(heads * d)
    wc = jnp.concatenate([_pad2(_uniform(kk, (d, out_channels), sc), hp, outp)
                          for kk in jax.random.split(next(ks), heads)], axis=0)
    bc = _pad2(_uniform(next(ks), (1, out_channels), sc), 1, outp)

    w = lambda x: x.astype(jnp.bfloat16)   # weights bf16 (MXU), biases stay f32
    return dict(wm1=w(wm1), bm1=bm1, wm2=w(wm2), bm2=bm2,
                wih=w(wih), bih=bih, whh=w(whh), bhh=bhh,
                wq=w(wq), bq=bq, wk=w(wk), bk=bk, wv=w(wv), bv=bv,
                wskip=w(wskip), bskip=bskip, wc=w(wc), bc=bc)


# --------------------------------------------------------------------------- #
# Jitted functional forward (memory / last_update returned as new state).
# --------------------------------------------------------------------------- #
@functools.partial(jax.jit,
                   static_argnames=("memory_dim", "edge_feat_dim", "out_channels", "heads"))
def tgn_forward(params, memory, last_update, edge_index, edge_attr, edge_time, *,
                memory_dim, edge_feat_dim, out_channels, heads):
    n = memory.shape[0]
    e = edge_index.shape[1]
    d, de = memory_dim, edge_feat_dim
    dp, dep = _round_up(d, LANE), _round_up(de, LANE)
    hp, outp = _round_up(d, LANE), _round_up(out_channels, LANE)
    n_pad, e_pad = _round_up(n, LANE), _round_up(e, LANE)
    tile_e, tile_n = min(EDGE_TILE, e_pad), min(NODE_TILE, n_pad)

    # Only O(E) int32 indices cross HBM as graph structure (padded rows get -1).
    src = edge_index[0].astype(jnp.int32)
    dst = edge_index[1].astype(jnp.int32)
    src_p = jnp.pad(src, (0, e_pad - e), constant_values=-1)
    dst_p = jnp.pad(dst, (0, e_pad - e), constant_values=-1)
    src_col = src_p[:, None]          # [e_pad, 1]
    dst_col = dst_p[:, None]          # [e_pad, 1]
    dst_row = dst_p[None, :]          # [1, e_pad]

    mem_f32 = _pad2(memory.astype(jnp.float32), n_pad, dp)
    mem_bf = mem_f32.astype(jnp.bfloat16)
    eattr_bf = _pad2(edge_attr.astype(jnp.float32), e_pad, dep).astype(jnp.bfloat16)

    rep = lambda shape: pl.BlockSpec(shape, lambda i: (0, 0))
    cparams = pltpu.CompilerParams(dimension_semantics=("parallel",),
                                   vmem_limit_bytes=VMEM_LIMIT)

    # ---- Kernel A: per-edge message MLP + GRU candidate memory rows ---------
    edge_kernel = functools.partial(_edge_kernel, n_pad=n_pad, d_pad=dp)
    upd = pl.pallas_call(
        edge_kernel,
        out_shape=jax.ShapeDtypeStruct((e_pad, dp), jnp.float32),
        grid=(e_pad // tile_e,),
        in_specs=[pl.BlockSpec((tile_e, 1), lambda i: (i, 0)),
                  pl.BlockSpec((tile_e, 1), lambda i: (i, 0)),
                  rep((n_pad, dp)),
                  pl.BlockSpec((tile_e, dep), lambda i: (i, 0)),
                  rep(params["wm1"].shape), rep(params["bm1"].shape),
                  rep(params["wm2"].shape), rep(params["bm2"].shape),
                  rep(params["wih"].shape), rep(params["bih"].shape),
                  rep(params["whh"].shape), rep(params["bhh"].shape)],
        out_specs=pl.BlockSpec((tile_e, dp), lambda i: (i, 0)),
        compiler_params=cparams,
    )(src_col, dst_col, mem_bf, eattr_bf,
      params["wm1"], params["bm1"], params["wm2"], params["bm2"],
      params["wih"], params["bih"], params["whh"], params["bhh"])

    # ---- last-write-wins memory scatter (O(N*d) index glue, XLA) ------------
    eids = jnp.arange(e, dtype=jnp.int32)
    last_edge = jnp.full((n,), -1, jnp.int32).at[dst].max(eids)
    has_upd = last_edge >= 0
    upd_rows = upd[jnp.clip(last_edge, 0)]                       # [n, dp]
    new_rows = jnp.where(has_upd[:, None], upd_rows, mem_f32[:n])
    new_mem_f32 = mem_f32.at[:n].set(new_rows)
    new_mem_bf = new_mem_f32.astype(jnp.bfloat16)

    # ---- Kernel B: TransformerConv attention + classifier -------------------
    node_kernel = functools.partial(_node_kernel, heads=heads, head_pad=hp,
                                    attn_scale=1.0 / math.sqrt(d), tile_n=tile_n)
    logits_p = pl.pallas_call(
        node_kernel,
        out_shape=jax.ShapeDtypeStruct((n_pad, outp), jnp.float32),
        grid=(n_pad // tile_n,),
        in_specs=[rep((n_pad, dp)),
                  pl.BlockSpec((tile_n, dp), lambda i: (i, 0)),
                  rep((e_pad, 1)),
                  rep((1, e_pad)),
                  rep(params["wq"].shape), rep(params["bq"].shape),
                  rep(params["wk"].shape), rep(params["bk"].shape),
                  rep(params["wv"].shape), rep(params["bv"].shape),
                  rep(params["wskip"].shape), rep(params["bskip"].shape),
                  rep(params["wc"].shape), rep(params["bc"].shape)],
        out_specs=pl.BlockSpec((tile_n, outp), lambda i: (i, 0)),
        compiler_params=cparams,
    )(new_mem_bf, new_mem_bf, src_col, dst_row,
      params["wq"], params["bq"], params["wk"], params["bk"],
      params["wv"], params["bv"], params["wskip"], params["bskip"],
      params["wc"], params["bc"])

    logits = logits_p[:n, :out_channels]
    new_memory = new_mem_f32[:n, :d]
    new_last_update = jnp.where(has_upd,
                                edge_time[jnp.clip(last_edge, 0)].astype(jnp.float32),
                                last_update)
    return logits, new_memory, new_last_update


if __name__ == "__main__":
    key = jax.random.PRNGKey(0)
    num_nodes = 16
    memory_dim = 32
    edge_feat_dim = 8
    out_channels = 16
    heads = 2
    num_edges = 40

    key, k_mem, k_e, k_attr, k_t, k_p = jax.random.split(key, 6)
    # memory is a learnable parameter (zeros at init in PyTorch); use a small
    # random state so the attention softmax is exercised non-degenerately.
    memory = 0.1 * jax.random.normal(k_mem, (num_nodes, memory_dim), jnp.float32)
    last_update = jnp.zeros((num_nodes,), jnp.float32)
    edge_index = jax.random.randint(k_e, (2, num_edges), 0, num_nodes, dtype=jnp.int32)
    edge_attr = jax.random.normal(k_attr, (num_edges, edge_feat_dim), jnp.float32)
    edge_time = jax.random.uniform(k_t, (num_edges,), jnp.float32, 0.0, 100.0)

    params = init_tgn_params(k_p, memory_dim, edge_feat_dim, out_channels, heads)

    logits, new_memory, new_last_update = tgn_forward(
        params, memory, last_update, edge_index, edge_attr, edge_time,
        memory_dim=memory_dim, edge_feat_dim=edge_feat_dim,
        out_channels=out_channels, heads=heads)
    logits = jax.block_until_ready(logits)
    new_memory = jax.block_until_ready(new_memory)

    assert logits.shape == (num_nodes, out_channels)
    assert new_memory.shape == (num_nodes, memory_dim)
    assert new_last_update.shape == (num_nodes,)
    assert jnp.all(jnp.isfinite(logits))
    assert jnp.all(jnp.isfinite(new_memory))
    assert jnp.all(jnp.isfinite(new_last_update))
    print("KERNEL_OK")
</pallas_src>

<mosaic_0001>
module attributes {stable_mosaic.version = 11 : i64} {
  func.func private @main(%arg0: i32) attributes {dimension_semantics = [#tpu.dimension_semantics<core_parallel>], iteration_bounds = array<i64: 2>, tpu.core_type = #tpu.core_type<sc_scalar_subcore>, window_params = []} {
    return
  }
}

module attributes {stable_mosaic.version = 11 : i64} {
  func.func private @main(%arg0: i32) attributes {dimension_semantics = [#tpu.dimension_semantics<core_parallel>], iteration_bounds = array<i64: 2>, tpu.core_type = #tpu.core_type<sc_scalar_subcore>, window_params = []} {
    return
  }
}

module attributes {stable_mosaic.version = 11 : i64} {
  func.func @_edge_kernel(%arg0: i32, %arg1: memref<128x1xi32, #tpu.memory_space<vmem>>, %arg2: memref<128x1xi32, #tpu.memory_space<vmem>>, %arg3: memref<128x128xbf16, #tpu.memory_space<vmem>>, %arg4: memref<128x128xbf16, #tpu.memory_space<vmem>>, %arg5: memref<384x128xbf16, #tpu.memory_space<vmem>>, %arg6: memref<1x128xf32, #tpu.memory_space<vmem>>, %arg7: memref<128x128xbf16, #tpu.memory_space<vmem>>, %arg8: memref<1x128xf32, #tpu.memory_space<vmem>>, %arg9: memref<128x384xbf16, #tpu.memory_space<vmem>>, %arg10: memref<1x384xf32, #tpu.memory_space<vmem>>, %arg11: memref<128x384xbf16, #tpu.memory_space<vmem>>, %arg12: memref<1x384xf32, #tpu.memory_space<vmem>>, %arg13: memref<128x128xf32, #tpu.memory_space<vmem>>) attributes {dimension_semantics = [#tpu.dimension_semantics<parallel>], iteration_bounds = array<i64: 1>, scalar_prefetch = 0 : i64, scratch_operands = 0 : i64, tpu.core_type = #tpu.core_type<tc>, window_params = [{transform_indices = @transform_0, window_bounds = array<i64: 128, 1>}, {transform_indices = @transform_1, window_bounds = array<i64: 128, 1>}, {pipeline_mode = #tpu.pipeline_mode<synchronous>, transform_indices = @transform_2, window_bounds = array<i64: 128, 128>}, {transform_indices = @transform_3, window_bounds = array<i64: 128, 128>}, {pipeline_mode = #tpu.pipeline_mode<synchronous>, transform_indices = @transform_4, window_bounds = array<i64: 384, 128>}, {pipeline_mode = #tpu.pipeline_mode<synchronous>, transform_indices = @transform_5, window_bounds = array<i64: 1, 128>}, {pipeline_mode = #tpu.pipeline_mode<synchronous>, transform_indices = @transform_6, window_bounds = array<i64: 128, 128>}, {pipeline_mode = #tpu.pipeline_mode<synchronous>, transform_indices = @transform_7, window_bounds = array<i64: 1, 128>}, {pipeline_mode = #tpu.pipeline_mode<synchronous>, transform_indices = @transform_8, window_bounds = array<i64: 128, 384>}, {pipeline_mode = #tpu.pipeline_mode<synchronous>, transform_indices = @transform_9, window_bounds = array<i64: 1, 384>}, {pipeline_mode = #tpu.pipeline_mode<synchronous>, transform_indices = @transform_10, window_bounds = array<i64: 128, 384>}, {pipeline_mode = #tpu.pipeline_mode<synchronous>, transform_indices = @transform_11, window_bounds = array<i64: 1, 384>}, {transform_indices = @transform_12, window_bounds = array<i64: 128, 128>}]} {
    %0 = tpu.iota {dimensions = array<i32: 1>} : vector<128x128xi32>
    %c0 = arith.constant 0 : index
    %c0_0 = arith.constant 0 : index
    %1 = vector.load %arg1[%c0, %c0_0] : memref<128x1xi32, #tpu.memory_space<vmem>>, vector<128x1xi32>
    %2 = vector.broadcast %1 : vector<128x1xi32> to vector<128x128xi32>
    %3 = arith.cmpi eq, %0, %2 : vector<128x128xi32>
    %4 = arith.extui %3 : vector<128x128xi1> to vector<128x128xi32>
    %5 = arith.sitofp %4 : vector<128x128xi32> to vector<128x128xf32>
    %6 = arith.truncf %5 : vector<128x128xf32> to vector<128x128xbf16>
    %c0_1 = arith.constant 0 : index
    %c0_2 = arith.constant 0 : index
    %7 = vector.load %arg2[%c0_1, %c0_2] : memref<128x1xi32, #tpu.memory_space<vmem>>, vector<128x1xi32>
    %8 = vector.broadcast %7 : vector<128x1xi32> to vector<128x128xi32>
    %9 = arith.cmpi eq, %0, %8 : vector<128x128xi32>
    %10 = arith.extui %9 : vector<128x128xi1> to vector<128x128xi32>
    %11 = arith.sitofp %10 : vector<128x128xi32> to vector<128x128xf32>
    %12 = arith.truncf %11 : vector<128x128xf32> to vector<128x128xbf16>
    %c0_3 = arith.constant 0 : index
    %c0_4 = arith.constant 0 : index
    %13 = vector.load %arg3[%c0_3, %c0_4] : memref<128x128xbf16, #tpu.memory_space<vmem>>, vector<128x128xbf16>
    %cst = arith.constant dense<0.000000e+00> : vector<128x128xf32>
    %14 = tpu.matmul %6, %13, %cst {dimension_numbers = #tpu.dot_dimension_numbers<[1], [0], [0], [1], [0, 0, 1, 1], [], []>} : vector<128x128xbf16>, vector<128x128xbf16>, vector<128x128xf32> -> vector<128x128xf32>
    %cst_5 = arith.constant dense<0.000000e+00> : vector<128x128xf32>
    %15 = tpu.matmul %12, %13, %cst_5 {dimension_numbers = #tpu.dot_dimension_numbers<[1], [0], [0], [1], [0, 0, 1, 1], [], []>} : vector<128x128xbf16>, vector<128x128xbf16>, vector<128x128xf32> -> vector<128x128xf32>
    %16 = arith.truncf %14 : vector<128x128xf32> to vector<128x128xbf16>
    %17 = arith.truncf %15 : vector<128x128xf32> to vector<128x128xbf16>
    %c0_6 = arith.constant 0 : index
    %c0_7 = arith.constant 0 : index
    %18 = vector.load %arg4[%c0_6, %c0_7] : memref<128x128xbf16, #tpu.memory_space<vmem>>, vector<128x128xbf16>
    %19 = tpu.concatenate %16, %17, %18 in 1 : vector<128x128xbf16>, vector<128x128xbf16>, vector<128x128xbf16> -> vector<128x384xbf16>
    %c0_8 = arith.constant 0 : index
    %c0_9 = arith.constant 0 : index
    %20 = vector.load %arg5[%c0_8, %c0_9] : memref<384x128xbf16, #tpu.memory_space<vmem>>, vector<384x128xbf16>
    %cst_10 = arith.constant dense<0.000000e+00> : vector<128x128xf32>
    %21 = tpu.matmul %19, %20, %cst_10 {dimension_numbers = #tpu.dot_dimension_numbers<[1], [0], [0], [1], [0, 0, 1, 1], [], []>} : vector<128x384xbf16>, vector<384x128xbf16>, vector<128x128xf32> -> vector<128x128xf32>
    %c0_11 = arith.constant 0 : index
    %c0_12 = arith.constant 0 : index
    %22 = vector.load %arg6[%c0_11, %c0_12] : memref<1x128xf32, #tpu.memory_space<vmem>>, vector<1x128xf32>
    %23 = vector.broadcast %22 : vector<1x128xf32> to vector<128x128xf32>
    %24 = arith.addf %21, %23 : vector<128x128xf32>
    %cst_13 = arith.constant 0.000000e+00 : f32
    %25 = vector.broadcast %cst_13 : f32 to vector<128x128xf32>
    %26 = arith.maximumf %24, %25 : vector<128x128xf32>
    %27 = arith.truncf %26 : vector<128x128xf32> to vector<128x128xbf16>
    %c0_14 = arith.constant 0 : index
    %c0_15 = arith.constant 0 : index
    %28 = vector.load %arg7[%c0_14, %c0_15] : memref<128x128xbf16, #tpu.memory_space<vmem>>, vector<128x128xbf16>
    %cst_16 = arith.constant dense<0.000000e+00> : vector<128x128xf32>
    %29 = tpu.matmul %27, %28, %cst_16 {dimension_numbers = #tpu.dot_dimension_numbers<[1], [0], [0], [1], [0, 0, 1, 1], [], []>} : vector<128x128xbf16>, vector<128x128xbf16>, vector<128x128xf32> -> vector<128x128xf32>
    %c0_17 = arith.constant 0 : index
    %c0_18 = arith.constant 0 : index
    %30 = vector.load %arg8[%c0_17, %c0_18] : memref<1x128xf32, #tpu.memory_space<vmem>>, vector<1x128xf32>
    %31 = vector.broadcast %30 : vector<1x128xf32> to vector<128x128xf32>
    %32 = arith.addf %29, %31 : vector<128x128xf32>
    %33 = arith.truncf %32 : vector<128x128xf32> to vector<128x128xbf16>
    %c0_19 = arith.constant 0 : index
    %c0_20 = arith.constant 0 : index
    %34 = vector.load %arg9[%c0_19, %c0_20] : memref<128x384xbf16, #tpu.memory_space<vmem>>, vector<128x384xbf16>
    %cst_21 = arith.constant dense<0.000000e+00> : vector<128x384xf32>
    %35 = tpu.matmul %33, %34, %cst_21 {dimension_numbers = #tpu.dot_dimension_numbers<[1], [0], [0], [1], [0, 0, 1, 1], [], []>} : vector<128x128xbf16>, vector<128x384xbf16>, vector<128x384xf32> -> vector<128x384xf32>
    %c0_22 = arith.constant 0 : index
    %c0_23 = arith.constant 0 : index
    %36 = vector.load %arg10[%c0_22, %c0_23] : memref<1x384xf32, #tpu.memory_space<vmem>>, vector<1x384xf32>
    %37 = vector.broadcast %36 : vector<1x384xf32> to vector<128x384xf32>
    %38 = arith.addf %35, %37 : vector<128x384xf32>
    %39 = arith.truncf %15 : vector<128x128xf32> to vector<128x128xbf16>
    %c0_24 = arith.constant 0 : index
    %c0_25 = arith.constant 0 : index
    %40 = vector.load %arg11[%c0_24, %c0_25] : memref<128x384xbf16, #tpu.memory_space<vmem>>, vector<128x384xbf16>
    %cst_26 = arith.constant dense<0.000000e+00> : vector<128x384xf32>
    %41 = tpu.matmul %39, %40, %cst_26 {dimension_numbers = #tpu.dot_dimension_numbers<[1], [0], [0], [1], [0, 0, 1, 1], [], []>} : vector<128x128xbf16>, vector<128x384xbf16>, vector<128x384xf32> -> vector<128x384xf32>
    %c0_27 = arith.constant 0 : index
    %c0_28 = arith.constant 0 : index
    %42 = vector.load %arg12[%c0_27, %c0_28] : memref<1x384xf32, #tpu.memory_space<vmem>>, vector<1x384xf32>
    %43 = vector.broadcast %42 : vector<1x384xf32> to vector<128x384xf32>
    %44 = arith.addf %41, %43 : vector<128x384xf32>
    %45 = vector.extract_strided_slice %38 {offsets = [0, 0], sizes = [128, 128], strides = [1, 1]} : vector<128x384xf32> to vector<128x128xf32>
    %46 = vector.extract_strided_slice %44 {offsets = [0, 0], sizes = [128, 128], strides = [1, 1]} : vector<128x384xf32> to vector<128x128xf32>
    %47 = arith.addf %45, %46 : vector<128x128xf32>
    %48 = arith.negf %47 : vector<128x128xf32>
    %49 = math.exp %48 : vector<128x128xf32>
    %cst_29 = arith.constant 1.000000e+00 : f32
    %50 = vector.broadcast %cst_29 : f32 to vector<128x128xf32>
    %51 = arith.addf %50, %49 : vector<128x128xf32>
    %52 = arith.divf %50, %51 : vector<128x128xf32>
    %53 = vector.extract_strided_slice %38 {offsets = [0, 128], sizes = [128, 128], strides = [1, 1]} : vector<128x384xf32> to vector<128x128xf32>
    %54 = vector.extract_strided_slice %44 {offsets = [0, 128], sizes = [128, 128], strides = [1, 1]} : vector<128x384xf32> to vector<128x128xf32>
    %55 = arith.addf %53, %54 : vector<128x128xf32>
    %56 = arith.negf %55 : vector<128x128xf32>
    %57 = math.exp %56 : vector<128x128xf32>
    %cst_30 = arith.constant 1.000000e+00 : f32
    %58 = vector.broadcast %cst_30 : f32 to vector<128x128xf32>
    %59 = arith.addf %58, %57 : vector<128x128xf32>
    %60 = arith.divf %58, %59 : vector<128x128xf32>
    %61 = vector.extract_strided_slice %38 {offsets = [0, 256], sizes = [128, 128], strides = [1, 1]} : vector<128x384xf32> to vector<128x128xf32>
    %62 = vector.extract_strided_slice %44 {offsets = [0, 256], sizes = [128, 128], strides = [1, 1]} : vector<128x384xf32> to vector<128x128xf32>
    %63 = arith.mulf %52, %62 : vector<128x128xf32>
    %64 = arith.addf %61, %63 : vector<128x128xf32>
    %65 = math.tanh %64 : vector<128x128xf32>
    %cst_31 = arith.constant 1.000000e+00 : f32
    %66 = vector.broadcast %cst_31 : f32 to vector<128x128xf32>
    %67 = arith.subf %66, %60 : vector<128x128xf32>
    %68 = arith.mulf %67, %65 : vector<128x128xf32>
    %69 = arith.mulf %60, %15 : vector<128x128xf32>
    %70 = arith.addf %68, %69 : vector<128x128xf32>
    %c0_32 = arith.constant 0 : index
    %c0_33 = arith.constant 0 : index
    %71 = vector.load %arg13[%c0_32, %c0_33] : memref<128x128xf32, #tpu.memory_space<vmem>>, vector<128x128xf32>
    tpu.vector_store %arg13[%c0_32, %c0_33], %70 {strides = array<i32>} : memref<128x128xf32, #tpu.memory_space<vmem>>, vector<128x128xf32>,
    return
  }
  func.func @transform_0(%arg0: i32) -> (i32, i32) {
    %c0_i32 = arith.constant 0 : i32
    %c0_i32_0 = arith.constant 0 : i32
    return %arg0, %c0_i32 : i32, i32
  }
  func.func @transform_1(%arg0: i32) -> (i32, i32) {
    %c0_i32 = arith.constant 0 : i32
    %c0_i32_0 = arith.constant 0 : i32
    return %arg0, %c0_i32 : i32, i32
  }
  func.func @transform_2(%arg0: i32) -> (i32, i32) {
    %c0_i32 = arith.constant 0 : i32
    %c0_i32_0 = arith.constant 0 : i32
    %c0_i32_1 = arith.constant 0 : i32
    return %c0_i32, %c0_i32_0 : i32, i32
  }
  func.func @transform_3(%arg0: i32) -> (i32, i32) {
    %c0_i32 = arith.constant 0 : i32
    %c0_i32_0 = arith.constant 0 : i32
    return %arg0, %c0_i32 : i32, i32
  }
  func.func @transform_4(%arg0: i32) -> (i32, i32) {
    %c0_i32 = arith.constant 0 : i32
    %c0_i32_0 = arith.constant 0 : i32
    %c0_i32_1 = arith.constant 0 : i32
    return %c0_i32, %c0_i32_0 : i32, i32
  }
  func.func @transform_5(%arg0: i32) -> (i32, i32) {
    %c0_i32 = arith.constant 0 : i32
    %c0_i32_0 = arith.constant 0 : i32
    %c0_i32_1 = arith.constant 0 : i32
    return %c0_i32, %c0_i32_0 : i32, i32
  }
  func.func @transform_6(%arg0: i32) -> (i32, i32) {
    %c0_i32 = arith.constant 0 : i32
    %c0_i32_0 = arith.constant 0 : i32
    %c0_i32_1 = arith.constant 0 : i32
    return %c0_i32, %c0_i32_0 : i32, i32
  }
  func.func @transform_7(%arg0: i32) -> (i32, i32) {
    %c0_i32 = arith.constant 0 : i32
    %c0_i32_0 = arith.constant 0 : i32
    %c0_i32_1 = arith.constant 0 : i32
    return %c0_i32, %c0_i32_0 : i32, i32
  }
  func.func @transform_8(%arg0: i32) -> (i32, i32) {
    %c0_i32 = arith.constant 0 : i32
    %c0_i32_0 = arith.constant 0 : i32
    %c0_i32_1 = arith.constant 0 : i32
    return %c0_i32, %c0_i32_0 : i32, i32
  }
  func.func @transform_9(%arg0: i32) -> (i32, i32) {
    %c0_i32 = arith.constant 0 : i32
    %c0_i32_0 = arith.constant 0 : i32
    %c0_i32_1 = arith.constant 0 : i32
    return %c0_i32, %c0_i32_0 : i32, i32
  }
  func.func @transform_10(%arg0: i32) -> (i32, i32) {
    %c0_i32 = arith.constant 0 : i32
    %c0_i32_0 = arith.constant 0 : i32
    %c0_i32_1 = arith.constant 0 : i32
    return %c0_i32, %c0_i32_0 : i32, i32
  }
  func.func @transform_11(%arg0: i32) -> (i32, i32) {
    %c0_i32 = arith.constant 0 : i32
    %c0_i32_0 = arith.constant 0 : i32
    %c0_i32_1 = arith.constant 0 : i32
    return %c0_i32, %c0_i32_0 : i32, i32
  }
  func.func @transform_12(%arg0: i32) -> (i32, i32) {
    %c0_i32 = arith.constant 0 : i32
    %c0_i32_0 = arith.constant 0 : i32
    return %arg0, %c0_i32 : i32, i32
  }
}

module attributes {stable_mosaic.version = 11 : i64} {
  func.func @_node_kernel(%arg0: i32, %arg1: memref<128x128xbf16, #tpu.memory_space<vmem>>, %arg2: memref<128x128xbf16, #tpu.memory_space<vmem>>, %arg3: memref<128x1xi32, #tpu.memory_space<vmem>>, %arg4: memref<1x128xi32, #tpu.memory_space<vmem>>, %arg5: memref<128x256xbf16, #tpu.memory_space<vmem>>, %arg6: memref<1x256xf32, #tpu.memory_space<vmem>>, %arg7: memref<128x256xbf16, #tpu.memory_space<vmem>>, %arg8: memref<1x256xf32, #tpu.memory_space<vmem>>, %arg9: memref<128x256xbf16, #tpu.memory_space<vmem>>, %arg10: memref<1x256xf32, #tpu.memory_space<vmem>>, %arg11: memref<128x256xbf16, #tpu.memory_space<vmem>>, %arg12: memref<1x256xf32, #tpu.memory_space<vmem>>, %arg13: memref<256x128xbf16, #tpu.memory_space<vmem>>, %arg14: memref<1x128xf32, #tpu.memory_space<vmem>>, %arg15: memref<128x128xf32, #tpu.memory_space<vmem>>) attributes {dimension_semantics = [#tpu.dimension_semantics<parallel>], iteration_bounds = array<i64: 1>, scalar_prefetch = 0 : i64, scratch_operands = 0 : i64, tpu.core_type = #tpu.core_type<tc>, window_params = [{pipeline_mode = #tpu.pipeline_mode<synchronous>, transform_indices = @transform_0, window_bounds = array<i64: 128, 128>}, {transform_indices = @transform_1, window_bounds = array<i64: 128, 128>}, {pipeline_mode = #tpu.pipeline_mode<synchronous>, transform_indices = @transform_2, window_bounds = array<i64: 128, 1>}, {pipeline_mode = #tpu.pipeline_mode<synchronous>, transform_indices = @transform_3, window_bounds = array<i64: 1, 128>}, {pipeline_mode = #tpu.pipeline_mode<synchronous>, transform_indices = @transform_4, window_bounds = array<i64: 128, 256>}, {pipeline_mode = #tpu.pipeline_mode<synchronous>, transform_indices = @transform_5, window_bounds = array<i64: 1, 256>}, {pipeline_mode = #tpu.pipeline_mode<synchronous>, transform_indices = @transform_6, window_bounds = array<i64: 128, 256>}, {pipeline_mode = #tpu.pipeline_mode<synchronous>, transform_indices = @transform_7, window_bounds = array<i64: 1, 256>}, {pipeline_mode = #tpu.pipeline_mode<synchronous>, transform_indices = @transform_8, window_bounds = array<i64: 128, 256>}, {pipeline_mode = #tpu.pipeline_mode<synchronous>, transform_indices = @transform_9, window_bounds = array<i64: 1, 256>}, {pipeline_mode = #tpu.pipeline_mode<synchronous>, transform_indices = @transform_10, window_bounds = array<i64: 128, 256>}, {pipeline_mode = #tpu.pipeline_mode<synchronous>, transform_indices = @transform_11, window_bounds = array<i64: 1, 256>}, {pipeline_mode = #tpu.pipeline_mode<synchronous>, transform_indices = @transform_12, window_bounds = array<i64: 256, 128>}, {pipeline_mode = #tpu.pipeline_mode<synchronous>, transform_indices = @transform_13, window_bounds = array<i64: 1, 128>}, {transform_indices = @transform_14, window_bounds = array<i64: 128, 128>}]} {
    %c128_i32 = arith.constant 128 : i32
    %0 = arith.muli %arg0, %c128_i32 : i32
    %c0 = arith.constant 0 : index
    %c0_0 = arith.constant 0 : index
    %1 = vector.load %arg1[%c0, %c0_0] : memref<128x128xbf16, #tpu.memory_space<vmem>>, vector<128x128xbf16>
    %c0_1 = arith.constant 0 : index
    %c0_2 = arith.constant 0 : index
    %2 = vector.load %arg2[%c0_1, %c0_2] : memref<128x128xbf16, #tpu.memory_space<vmem>>, vector<128x128xbf16>
    %3 = tpu.iota {dimensions = array<i32: 0>} : vector<128x128xi32>
    %4 = vector.broadcast %0 : i32 to vector<128x128xi32>
    %5 = arith.addi %3, %4 : vector<128x128xi32>
    %c0_3 = arith.constant 0 : index
    %c0_4 = arith.constant 0 : index
    %6 = vector.load %arg4[%c0_3, %c0_4] : memref<1x128xi32, #tpu.memory_space<vmem>>, vector<1x128xi32>
    %7 = vector.broadcast %6 : vector<1x128xi32> to vector<128x128xi32>
    %8 = arith.cmpi eq, %5, %7 : vector<128x128xi32>
    %9 = arith.extui %8 : vector<128x128xi1> to vector<128x128xi32>
    %10 = arith.sitofp %9 : vector<128x128xi32> to vector<128x128xf32>
    %11 = arith.truncf %10 : vector<128x128xf32> to vector<128x128xbf16>
    %12 = tpu.iota {dimensions = array<i32: 1>} : vector<128x128xi32>
    %c0_5 = arith.constant 0 : index
    %c0_6 = arith.constant 0 : index
    %13 = vector.load %arg3[%c0_5, %c0_6] : memref<128x1xi32, #tpu.memory_space<vmem>>, vector<128x1xi32>
    %14 = vector.broadcast %13 : vector<128x1xi32> to vector<128x128xi32>
    %15 = arith.cmpi eq, %12, %14 : vector<128x128xi32>
    %16 = arith.extui %15 : vector<128x128xi1> to vector<128x128xi32>
    %17 = arith.sitofp %16 : vector<128x128xi32> to vector<128x128xf32>
    %18 = arith.truncf %17 : vector<128x128xf32> to vector<128x128xbf16>
    %cst = arith.constant dense<0.000000e+00> : vector<128x128xf32>
    %19 = tpu.matmul %11, %18, %cst {dimension_numbers = #tpu.dot_dimension_numbers<[1], [0], [0], [1], [0, 0, 1, 1], [], []>} : vector<128x128xbf16>, vector<128x128xbf16>, vector<128x128xf32> -> vector<128x128xf32>
    %cst_7 = arith.constant 0.000000e+00 : f32
    %20 = vector.broadcast %cst_7 : f32 to vector<128x128xf32>
    %21 = arith.cmpf ogt, %19, %20 : vector<128x128xf32>
    %c0_8 = arith.constant 0 : index
    %c0_9 = arith.constant 0 : index
    %22 = vector.load %arg5[%c0_8, %c0_9] : memref<128x256xbf16, #tpu.memory_space<vmem>>, vector<128x256xbf16>
    %cst_10 = arith.constant dense<0.000000e+00> : vector<128x256xf32>
    %23 = tpu.matmul %2, %22, %cst_10 {dimension_numbers = #tpu.dot_dimension_numbers<[1], [0], [0], [1], [0, 0, 1, 1], [], []>} : vector<128x128xbf16>, vector<128x256xbf16>, vector<128x256xf32> -> vector<128x256xf32>
    %c0_11 = arith.constant 0 : index
    %c0_12 = arith.constant 0 : index
    %24 = vector.load %arg6[%c0_11, %c0_12] : memref<1x256xf32, #tpu.memory_space<vmem>>, vector<1x256xf32>
    %25 = vector.broadcast %24 : vector<1x256xf32> to vector<128x256xf32>
    %26 = arith.addf %23, %25 : vector<128x256xf32>
    %c0_13 = arith.constant 0 : index
    %c0_14 = arith.constant 0 : index
    %27 = vector.load %arg7[%c0_13, %c0_14] : memref<128x256xbf16, #tpu.memory_space<vmem>>, vector<128x256xbf16>
    %cst_15 = arith.constant dense<0.000000e+00> : vector<128x256xf32>
    %28 = tpu.matmul %1, %27, %cst_15 {dimension_numbers = #tpu.dot_dimension_numbers<[1], [0], [0], [1], [0, 0, 1, 1], [], []>} : vector<128x128xbf16>, vector<128x256xbf16>, vector<128x256xf32> -> vector<128x256xf32>
    %c0_16 = arith.constant 0 : index
    %c0_17 = arith.constant 0 : index
    %29 = vector.load %arg8[%c0_16, %c0_17] : memref<1x256xf32, #tpu.memory_space<vmem>>, vector<1x256xf32>
    %30 = vector.broadcast %29 : vector<1x256xf32> to vector<128x256xf32>
    %31 = arith.addf %28, %30 : vector<128x256xf32>
    %c0_18 = arith.constant 0 : index
    %c0_19 = arith.constant 0 : index
    %32 = vector.load %arg9[%c0_18, %c0_19] : memref<128x256xbf16, #tpu.memory_space<vmem>>, vector<128x256xbf16>
    %cst_20 = arith.constant dense<0.000000e+00> : vector<128x256xf32>
    %33 = tpu.matmul %1, %32, %cst_20 {dimension_numbers = #tpu.dot_dimension_numbers<[1], [0], [0], [1], [0, 0, 1, 1], [], []>} : vector<128x128xbf16>, vector<128x256xbf16>, vector<128x256xf32> -> vector<128x256xf32>
    %c0_21 = arith.constant 0 : index
    %c0_22 = arith.constant 0 : index
    %34 = vector.load %arg10[%c0_21, %c0_22] : memref<1x256xf32, #tpu.memory_space<vmem>>, vector<1x256xf32>
    %35 = vector.broadcast %34 : vector<1x256xf32> to vector<128x256xf32>
    %36 = arith.addf %33, %35 : vector<128x256xf32>
    %37 = arith.truncf %26 : vector<128x256xf32> to vector<128x256xbf16>
    %38 = arith.truncf %36 : vector<128x256xf32> to vector<128x256xbf16>
    %39 = tpu.transpose %31, [1, 0] : vector<128x256xf32> -> vector<256x128xf32>
    %40 = arith.truncf %39 : vector<256x128xf32> to vector<256x128xbf16>
    %41 = vector.extract_strided_slice %37 {offsets = [0, 0], sizes = [128, 128], strides = [1, 1]} : vector<128x256xbf16> to vector<128x128xbf16>
    %42 = vector.extract_strided_slice %40 {offsets = [0, 0], sizes = [128, 128], strides = [1, 1]} : vector<256x128xbf16> to vector<128x128xbf16>
    %cst_23 = arith.constant dense<0.000000e+00> : vector<128x128xf32>
    %43 = tpu.matmul %41, %42, %cst_23 {dimension_numbers = #tpu.dot_dimension_numbers<[1], [0], [0], [1], [0, 0, 1, 1], [], []>} : vector<128x128xbf16>, vector<128x128xbf16>, vector<128x128xf32> -> vector<128x128xf32>
    %cst_24 = arith.constant 0.176776692 : f32
    %44 = vector.broadcast %cst_24 : f32 to vector<128x128xf32>
    %45 = arith.mulf %43, %44 : vector<128x128xf32>
    %cst_25 = arith.constant -1.000000e+30 : f32
    %46 = vector.broadcast %cst_25 : f32 to vector<128x128xf32>
    %47 = arith.select %21, %45, %46 : vector<128x128xi1>, vector<128x128xf32>
    %cst_26 = arith.constant dense<0xFF800000> : vector<128xf32>
    %48 = vector.multi_reduction <maximumf>, %47, %cst_26 [1] : vector<128x128xf32> to vector<128xf32>
    %49 = vector.shape_cast %48 : vector<128xf32> to vector<128x1xf32>
    %50 = vector.broadcast %49 : vector<128x1xf32> to vector<128x128xf32>
    %51 = arith.subf %47, %50 : vector<128x128xf32>
    %52 = math.exp %51 : vector<128x128xf32>
    %53 = arith.mulf %19, %52 : vector<128x128xf32>
    %cst_27 = arith.constant dense<0.000000e+00> : vector<128xf32>
    %54 = vector.multi_reduction <add>, %53, %cst_27 [1] : vector<128x128xf32> to vector<128xf32>
    %55 = vector.shape_cast %54 : vector<128xf32> to vector<128x1xf32>
    %cst_28 = arith.constant 0.000000e+00 : f32
    %56 = vector.broadcast %cst_28 : f32 to vector<128x1xf32>
    %57 = arith.cmpf ogt, %55, %56 : vector<128x1xf32>
    %cst_29 = arith.constant 1.000000e-30 : f32
    %58 = vector.broadcast %cst_29 : f32 to vector<128x1xf32>
    %59 = arith.maximumf %55, %58 : vector<128x1xf32>
    %60 = tpu.reciprocal %59 {approx = true} : vector<128x1xf32> -> vector<128x1xf32>
    %cst_30 = arith.constant 0.000000e+00 : f32
    %61 = vector.broadcast %cst_30 : f32 to vector<128x1xf32>
    %62 = arith.select %57, %60, %61 : vector<128x1xi1>, vector<128x1xf32>
    %63 = vector.broadcast %62 : vector<128x1xf32> to vector<128x128xf32>
    %64 = arith.mulf %53, %63 : vector<128x128xf32>
    %65 = arith.truncf %64 : vector<128x128xf32> to vector<128x128xbf16>
    %66 = vector.extract_strided_slice %38 {offsets = [0, 0], sizes = [128, 128], strides = [1, 1]} : vector<128x256xbf16> to vector<128x128xbf16>
    %cst_31 = arith.constant dense<0.000000e+00> : vector<128x128xf32>
    %67 = tpu.matmul %65, %66, %cst_31 {dimension_numbers = #tpu.dot_dimension_numbers<[1], [0], [0], [1], [0, 0, 1, 1], [], []>} : vector<128x128xbf16>, vector<128x128xbf16>, vector<128x128xf32> -> vector<128x128xf32>
    %68 = vector.extract_strided_slice %37 {offsets = [0, 128], sizes = [128, 128], strides = [1, 1]} : vector<128x256xbf16> to vector<128x128xbf16>
    %69 = vector.extract_strided_slice %40 {offsets = [128, 0], sizes = [128, 128], strides = [1, 1]} : vector<256x128xbf16> to vector<128x128xbf16>
    %cst_32 = arith.constant dense<0.000000e+00> : vector<128x128xf32>
    %70 = tpu.matmul %68, %69, %cst_32 {dimension_numbers = #tpu.dot_dimension_numbers<[1], [0], [0], [1], [0, 0, 1, 1], [], []>} : vector<128x128xbf16>, vector<128x128xbf16>, vector<128x128xf32> -> vector<128x128xf32>
    %cst_33 = arith.constant 0.176776692 : f32
    %71 = vector.broadcast %cst_33 : f32 to vector<128x128xf32>
    %72 = arith.mulf %70, %71 : vector<128x128xf32>
    %cst_34 = arith.constant -1.000000e+30 : f32
    %73 = vector.broadcast %cst_34 : f32 to vector<128x128xf32>
    %74 = arith.select %21, %72, %73 : vector<128x128xi1>, vector<128x128xf32>
    %cst_35 = arith.constant dense<0xFF800000> : vector<128xf32>
    %75 = vector.multi_reduction <maximumf>, %74, %cst_35 [1] : vector<128x128xf32> to vector<128xf32>
    %76 = vector.shape_cast %75 : vector<128xf32> to vector<128x1xf32>
    %77 = vector.broadcast %76 : vector<128x1xf32> to vector<128x128xf32>
    %78 = arith.subf %74, %77 : vector<128x128xf32>
    %79 = math.exp %78 : vector<128x128xf32>
    %80 = arith.mulf %19, %79 : vector<128x128xf32>
    %cst_36 = arith.constant dense<0.000000e+00> : vector<128xf32>
    %81 = vector.multi_reduction <add>, %80, %cst_36 [1] : vector<128x128xf32> to vector<128xf32>
    %82 = vector.shape_cast %81 : vector<128xf32> to vector<128x1xf32>
    %cst_37 = arith.constant 0.000000e+00 : f32
    %83 = vector.broadcast %cst_37 : f32 to vector<128x1xf32>
    %84 = arith.cmpf ogt, %82, %83 : vector<128x1xf32>
    %cst_38 = arith.constant 1.000000e-30 : f32
    %85 = vector.broadcast %cst_38 : f32 to vector<128x1xf32>
    %86 = arith.maximumf %82, %85 : vector<128x1xf32>
    %87 = tpu.reciprocal %86 {approx = true} : vector<128x1xf32> -> vector<128x1xf32>
    %cst_39 = arith.constant 0.000000e+00 : f32
    %88 = vector.broadcast %cst_39 : f32 to vector<128x1xf32>
    %89 = arith.select %84, %87, %88 : vector<128x1xi1>, vector<128x1xf32>
    %90 = vector.broadcast %89 : vector<128x1xf32> to vector<128x128xf32>
    %91 = arith.mulf %80, %90 : vector<128x128xf32>
    %92 = arith.truncf %91 : vector<128x128xf32> to vector<128x128xbf16>
    %93 = vector.extract_strided_slice %38 {offsets = [0, 128], sizes = [128, 128], strides = [1, 1]} : vector<128x256xbf16> to vector<128x128xbf16>
    %cst_40 = arith.constant dense<0.000000e+00> : vector<128x128xf32>
    %94 = tpu.matmul %92, %93, %cst_40 {dimension_numbers = #tpu.dot_dimension_numbers<[1], [0], [0], [1], [0, 0, 1, 1], [], []>} : vector<128x128xbf16>, vector<128x128xbf16>, vector<128x128xf32> -> vector<128x128xf32>
    %95 = tpu.concatenate %67, %94 in 1 : vector<128x128xf32>, vector<128x128xf32> -> vector<128x256xf32>
    %c0_41 = arith.constant 0 : index
    %c0_42 = arith.constant 0 : index
    %96 = vector.load %arg11[%c0_41, %c0_42] : memref<128x256xbf16, #tpu.memory_space<vmem>>, vector<128x256xbf16>
    %cst_43 = arith.constant dense<0.000000e+00> : vector<128x256xf32>
    %97 = tpu.matmul %2, %96, %cst_43 {dimension_numbers = #tpu.dot_dimension_numbers<[1], [0], [0], [1], [0, 0, 1, 1], [], []>} : vector<128x128xbf16>, vector<128x256xbf16>, vector<128x256xf32> -> vector<128x256xf32>
    %98 = arith.addf %95, %97 : vector<128x256xf32>
    %c0_44 = arith.constant 0 : index
    %c0_45 = arith.constant 0 : index
    %99 = vector.load %arg12[%c0_44, %c0_45] : memref<1x256xf32, #tpu.memory_space<vmem>>, vector<1x256xf32>
    %100 = vector.broadcast %99 : vector<1x256xf32> to vector<128x256xf32>
    %101 = arith.addf %98, %100 : vector<128x256xf32>
    %102 = arith.truncf %101 : vector<128x256xf32> to vector<128x256xbf16>
    %c0_46 = arith.constant 0 : index
    %c0_47 = arith.constant 0 : index
    %103 = vector.load %arg13[%c0_46, %c0_47] : memref<256x128xbf16, #tpu.memory_space<vmem>>, vector<256x128xbf16>
    %cst_48 = arith.constant dense<0.000000e+00> : vector<128x128xf32>
    %104 = tpu.matmul %102, %103, %cst_48 {dimension_numbers = #tpu.dot_dimension_numbers<[1], [0], [0], [1], [0, 0, 1, 1], [], []>} : vector<128x256xbf16>, vector<256x128xbf16>, vector<128x128xf32> -> vector<128x128xf32>
    %c0_49 = arith.constant 0 : index
    %c0_50 = arith.constant 0 : index
    %105 = vector.load %arg14[%c0_49, %c0_50] : memref<1x128xf32, #tpu.memory_space<vmem>>, vector<1x128xf32>
    %106 = vector.broadcast %105 : vector<1x128xf32> to vector<128x128xf32>
    %107 = arith.addf %104, %106 : vector<128x128xf32>
    %c0_51 = arith.constant 0 : index
    %c0_52 = arith.constant 0 : index
    %108 = vector.load %arg15[%c0_51, %c0_52] : memref<128x128xf32, #tpu.memory_space<vmem>>, vector<128x128xf32>
    tpu.vector_store %arg15[%c0_51, %c0_52], %107 {strides = array<i32>} : memref<128x128xf32, #tpu.memory_space<vmem>>, vector<128x128xf32>,
    return
  }
  func.func @transform_0(%arg0: i32) -> (i32, i32) {
    %c0_i32 = arith.constant 0 : i32
    %c0_i32_0 = arith.constant 0 : i32
    %c0_i32_1 = arith.constant 0 : i32
    return %c0_i32, %c0_i32_0 : i32, i32
  }
  func.func @transform_1(%arg0: i32) -> (i32, i32) {
    %c0_i32 = arith.constant 0 : i32
    %c0_i32_0 = arith.constant 0 : i32
    return %arg0, %c0_i32 : i32, i32
  }
  func.func @transform_2(%arg0: i32) -> (i32, i32) {
    %c0_i32 = arith.constant 0 : i32
    %c0_i32_0 = arith.constant 0 : i32
    %c0_i32_1 = arith.constant 0 : i32
    return %c0_i32, %c0_i32_0 : i32, i32
  }
  func.func @transform_3(%arg0: i32) -> (i32, i32) {
    %c0_i32 = arith.constant 0 : i32
    %c0_i32_0 = arith.constant 0 : i32
    %c0_i32_1 = arith.constant 0 : i32
    return %c0_i32, %c0_i32_0 : i32, i32
  }
  func.func @transform_4(%arg0: i32) -> (i32, i32) {
    %c0_i32 = arith.constant 0 : i32
    %c0_i32_0 = arith.constant 0 : i32
    %c0_i32_1 = arith.constant 0 : i32
    return %c0_i32, %c0_i32_0 : i32, i32
  }
  func.func @transform_5(%arg0: i32) -> (i32, i32) {
    %c0_i32 = arith.constant 0 : i32
    %c0_i32_0 = arith.constant 0 : i32
    %c0_i32_1 = arith.constant 0 : i32
    return %c0_i32, %c0_i32_0 : i32, i32
  }
  func.func @transform_6(%arg0: i32) -> (i32, i32) {
    %c0_i32 = arith.constant 0 : i32
    %c0_i32_0 = arith.constant 0 : i32
    %c0_i32_1 = arith.constant 0 : i32
    return %c0_i32, %c0_i32_0 : i32, i32
  }
  func.func @transform_7(%arg0: i32) -> (i32, i32) {
    %c0_i32 = arith.constant 0 : i32
    %c0_i32_0 = arith.constant 0 : i32
    %c0_i32_1 = arith.constant 0 : i32
    return %c0_i32, %c0_i32_0 : i32, i32
  }
  func.func @transform_8(%arg0: i32) -> (i32, i32) {
    %c0_i32 = arith.constant 0 : i32
    %c0_i32_0 = arith.constant 0 : i32
    %c0_i32_1 = arith.constant 0 : i32
    return %c0_i32, %c0_i32_0 : i32, i32
  }
  func.func @transform_9(%arg0: i32) -> (i32, i32) {
    %c0_i32 = arith.constant 0 : i32
    %c0_i32_0 = arith.constant 0 : i32
    %c0_i32_1 = arith.constant 0 : i32
    return %c0_i32, %c0_i32_0 : i32, i32
  }
  func.func @transform_10(%arg0: i32) -> (i32, i32) {
    %c0_i32 = arith.constant 0 : i32
    %c0_i32_0 = arith.constant 0 : i32
    %c0_i32_1 = arith.constant 0 : i32
    return %c0_i32, %c0_i32_0 : i32, i32
  }
  func.func @transform_11(%arg0: i32) -> (i32, i32) {
    %c0_i32 = arith.constant 0 : i32
    %c0_i32_0 = arith.constant 0 : i32
    %c0_i32_1 = arith.constant 0 : i32
    return %c0_i32, %c0_i32_0 : i32, i32
  }
  func.func @transform_12(%arg0: i32) -> (i32, i32) {
    %c0_i32 = arith.constant 0 : i32
    %c0_i32_0 = arith.constant 0 : i32
    %c0_i32_1 = arith.constant 0 : i32
    return %c0_i32, %c0_i32_0 : i32, i32
  }
  func.func @transform_13(%arg0: i32) -> (i32, i32) {
    %c0_i32 = arith.constant 0 : i32
    %c0_i32_0 = arith.constant 0 : i32
    %c0_i32_1 = arith.constant 0 : i32
    return %c0_i32, %c0_i32_0 : i32, i32
  }
  func.func @transform_14(%arg0: i32) -> (i32, i32) {
    %c0_i32 = arith.constant 0 : i32
    %c0_i32_0 = arith.constant 0 : i32
    return %arg0, %c0_i32 : i32, i32
  }
}

</mosaic_0001>

<bundles_post_ra>
// kernel: tgn_forward.2
= control target key start
LH: loop header
LB: loop body
LE: loop exit
PB: predicated region body
PF: predicated region fallthrough
CT: control target
= control target key end

     0   :  { %v3167_v0 = vmov 0   ;;  %v42_v43 = vlaneseq  ;;  %v3168_v49 = vmov 1.0|1.0   ;;  %s4271_s1 = inlined_call_operand.vmem [shape: s32[128,1], index: 1, kind: input, shape index: {}]   ;;  %s4272_s0 = inlined_call_operand.vmem [shape: s32[128,1], index: 0, kind: input, shape index: {}]   ;;  %s4273_s2 = inlined_call_operand.vmem [shape: bf16[128,128], index: 2, kind: input, shape index: {}]   ;;  %s4274_s4 = inlined_call_operand.vmem [shape: bf16[384,128], index: 4, kind: input, shape index: {}]   ;;  %s4275_s3 = inlined_call_operand.vmem [shape: bf16[128,128], index: 3, kind: input, shape index: {}]   ;;  %s4276_s6 = inlined_call_operand.vmem [shape: bf16[128,128], index: 6, kind: input, shape index: {}]   ;;  %s4277_s8 = inlined_call_operand.vmem [shape: bf16[128,384], index: 8, kind: input, shape index: {}]   ;;  %s4278_s5 = inlined_call_operand.vmem [shape: f32[1,128], index: 5, kind: input, shape index: {}]   ;;  %s4279_s10 = inlined_call_operand.vmem [shape: bf16[128,384], index: 10, kind: input, shape index: {}]   ;;  %s4280_s7 = inlined_call_operand.vmem [shape: f32[1,128], index: 7, kind: input, shape index: {}]   ;;  %s4281_s9 = inlined_call_operand.vmem [shape: f32[1,384], index: 9, kind: input, shape index: {}]   ;;  %s4282_s11 = inlined_call_operand.vmem [shape: f32[1,384], index: 11, kind: input, shape index: {}]   ;;  %s4283_s12 = inlined_call_operand.vmem [shape: f32[128,128], index: 12, kind: output, shape index: {}]  }
   0x1   :  { %2894 = vset.pattern.permute.xlu1 %v3167_v0  ;;  %2893 = vset.pattern.permute.xlu0 %v3167_v0  ;;  %v164_v1 = vld [vmem:[%s4271_s1] sm:$0xff]  ;;  %v165_v3 = vld [vmem:[%s4271_s1 + $0x8] sm:$0xff]  ;;  %v166_v5 = vld [vmem:[%s4271_s1 + $0x10] sm:$0xff] }
   0x2   :  { %v44_v2 = vld [vmem:[%s4272_s0] sm:$0xff]  ;;  %181 = vperm.xlu0 %2893, %v164_v1   ;;  %v45_v4 = vld [vmem:[%s4272_s0 + $0x8] sm:$0xff]  ;;  %v167_v6 = vld [vmem:[%s4271_s1 + $0x18] sm:$0xff]  ;;  %v3363_v46 = vand.u32 127, %v42_v43 }
   0x3   :  { %61 = vperm.xlu1 %2894, %v44_v2   ;;  %v46_v7 = vld [vmem:[%s4272_s0 + $0x10] sm:$0xff]  ;;  %v47_v8 = vld [vmem:[%s4272_s0 + $0x18] sm:$0xff]  ;;  %v168_v11 = vld [vmem:[%s4271_s1 + $0x20] sm:$0xff] }
   0x4   :  { %v2895_v9 = vld [vmem:[%s4273_s2 + $0x38] sm:$0xff]   ;;  %v2896_v10 = vld [vmem:[%s4273_s2 + $0x30] sm:$0xff]   ;;  %v169_v12 = vld [vmem:[%s4271_s1 + $0x28] sm:$0xff] }
   0x5   :  { %2731 = vmatprep.subr.bf16.mxu1 %v2895_v9  ;;  %2699 = vmatprep.subr.bf16.mxu0 %v2895_v9  ;;  %v2897_v13 = vld [vmem:[%s4273_s2 + $0x28] sm:$0xff]   ;;  %v48_v14 = vld [vmem:[%s4272_s0 + $0x20] sm:$0xff]  ;;  %v170_v17 = vld [vmem:[%s4271_s1 + $0x30] sm:$0xff] }
   0x6   :  { %184 = vperm.xlu0 %2893, %v165_v3   ;;  %2732 = vmatpush3.bf16.msra.mxu1 %v2895_v9  ;;  %v49_v15 = vld [vmem:[%s4272_s0 + $0x28] sm:$0xff]  ;;  %v2898_v16 = vld [vmem:[%s4273_s2 + $0x20] sm:$0xff]   ;;  %v171_v18 = vld [vmem:[%s4271_s1 + $0x38] sm:$0xff] }
   0x7   :  { %64 = vperm.xlu1 %2894, %v45_v4   ;;  %2700 = vmatpush3.bf16.msra.mxu0 %v2895_v9  ;;  %v2899_v19 = vld [vmem:[%s4273_s2 + $0x18] sm:$0xff]   ;;  %v50_v20 = vld [vmem:[%s4272_s0 + $0x30] sm:$0xff]  ;;  %v172_v23 = vld [vmem:[%s4271_s1 + $0x40] sm:$0xff] }
   0x8   :  { %2733 = vmatprep.subr.bf16.mxu1 %v2896_v10  ;;  %2701 = vmatprep.subr.bf16.mxu0 %v2896_v10  ;;  %v51_v21 = vld [vmem:[%s4272_s0 + $0x38] sm:$0xff]  ;;  %v2900_v22 = vld [vmem:[%s4273_s2 + $0x10] sm:$0xff]   ;;  %v173_v24 = vld [vmem:[%s4271_s1 + $0x48] sm:$0xff] }
   0x9   :  { %v2901_v25 = vld [vmem:[%s4273_s2 + $0x8] sm:$0xff]   ;;  %v52_v26 = vld [vmem:[%s4272_s0 + $0x40] sm:$0xff]  ;;  %v174_v29 = vld [vmem:[%s4271_s1 + $0x50] sm:$0xff] }
   0xa   :  { %187 = vperm.xlu0 %2893, %v166_v5   ;;  %2734 = vmatpush3.bf16.msra.mxu1 %v2896_v10  ;;  %v53_v27 = vld [vmem:[%s4272_s0 + $0x48] sm:$0xff]  ;;  %v2902_v28 = vld [vmem:[%s4273_s2] sm:$0xff]   ;;  %v175_v30 = vld [vmem:[%s4271_s1 + $0x58] sm:$0xff] }
   0xb   :  { %190 = vperm.xlu1 %2894, %v167_v6   ;;  %2702 = vmatpush3.bf16.msra.mxu0 %v2896_v10  ;;  %v54_v31 = vld [vmem:[%s4272_s0 + $0x50] sm:$0xff]  ;;  %v55_v32 = vld [vmem:[%s4272_s0 + $0x58] sm:$0xff]  ;;  %v176_v33 = vld [vmem:[%s4271_s1 + $0x60] sm:$0xff] }
   0xc   :  { %2735 = vmatprep.subr.bf16.mxu1 %v2897_v13  ;;  %2703 = vmatprep.subr.bf16.mxu0 %v2897_v13  ;;  %v177_v34 = vld [vmem:[%s4271_s1 + $0x68] sm:$0xff]  ;;  %v56_v35 = vld [vmem:[%s4272_s0 + $0x60] sm:$0xff]  ;;  %v178_v37 = vld [vmem:[%s4271_s1 + $0x70] sm:$0xff] }
   0xd   :  { %v57_v36 = vld [vmem:[%s4272_s0 + $0x68] sm:$0xff]  ;;  %v179_v38 = vld [vmem:[%s4271_s1 + $0x78] sm:$0xff]  ;;  %v58_v39 = vld [vmem:[%s4272_s0 + $0x70] sm:$0xff] }
   0xe   :  { %67 = vperm.xlu0 %2893, %v46_v7   ;;  %2736 = vmatpush3.bf16.msra.mxu1 %v2897_v13  ;;  %v59_v40 = vld [vmem:[%s4272_s0 + $0x78] sm:$0xff]  ;;  %v2910_v52 = vld [vmem:[%s4274_s4 + $0xb0] sm:$0xff]   ;;  %v2913_v57 = vld [vmem:[%s4274_s4 + $0xa8] sm:$0xff]  }
   0xf   :  { %70 = vperm.xlu1 %2894, %v47_v8   ;;  %2704 = vmatpush3.bf16.msra.mxu0 %v2897_v13  ;;  %v2903_v41 = vld [vmem:[%s4274_s4 + $0x78] sm:$0xff]   ;;  %v2905_v56 = vld [vmem:[%s4274_s4 + $0x70] sm:$0xff]   ;;  %v2908_v61 = vld [vmem:[%s4274_s4 + $0x68] sm:$0xff]  }
  0x10   :  { %2737 = vmatprep.subr.bf16.mxu1 %v2898_v16  ;;  %2705 = vmatprep.subr.bf16.mxu0 %v2898_v16  ;;  %v2907_v42 = vld [vmem:[%s4274_s4 + $0xb8] sm:$0xff]   ;;  %v2906_v60 = vld [vmem:[%s4274_s4 + $0x30] sm:$0xff]   ;;  %v2916_v62 = vld [vmem:[%s4274_s4 + $0xa0] sm:$0xff]  }
  0x11   :  { %v2904_v55 = vld [vmem:[%s4274_s4 + $0x38] sm:$0xff]   ;;  %v2909_v2 = vld [vmem:[%s4274_s4 + $0x28] sm:$0xff]   ;;  %v2911_v3 = vld [vmem:[%s4274_s4 + $0x60] sm:$0xff]  }
  0x12   :  { %193 = vperm.xlu0 %2893, %v168_v11   ;;  %2738 = vmatpush3.bf16.msra.mxu1 %v2898_v16  ;;  %v2912_v6 = vld [vmem:[%s4274_s4 + $0x20] sm:$0xff]   ;;  %v2914_v7 = vld [vmem:[%s4274_s4 + $0x58] sm:$0xff]  }
  0x13   :  { %196 = vperm.xlu1 %2894, %v169_v12   ;;  %2706 = vmatpush3.bf16.msra.mxu0 %v2898_v16  ;;  %v2915_v10 = vld [vmem:[%s4274_s4 + $0x18] sm:$0xff]  }
  0x14   :  { %2739 = vmatprep.subr.bf16.mxu1 %v2899_v19  ;;  %2707 = vmatprep.subr.bf16.mxu0 %v2899_v19 }
  0x16   :  { %73 = vperm.xlu0 %2893, %v48_v14   ;;  %2740 = vmatpush3.bf16.msra.mxu1 %v2899_v19 }
  0x17   :  { %76 = vperm.xlu1 %2894, %v49_v15   ;;  %2708 = vmatpush3.bf16.msra.mxu0 %v2899_v19 }
  0x18   :  { %2741 = vmatprep.subr.bf16.mxu1 %v2900_v22  ;;  %2709 = vmatprep.subr.bf16.mxu0 %v2900_v22 }
  0x1a   :  { %199 = vperm.xlu0 %2893, %v170_v17   ;;  %2742 = vmatpush3.bf16.msra.mxu1 %v2900_v22 }
  0x1b   :  { %202 = vperm.xlu1 %2894, %v171_v18   ;;  %2710 = vmatpush3.bf16.msra.mxu0 %v2900_v22 }
  0x1c   :  { %2743 = vmatprep.subr.bf16.mxu1 %v2901_v25  ;;  %2711 = vmatprep.subr.bf16.mxu0 %v2901_v25 }
  0x1e   :  { %79 = vperm.xlu0 %2893, %v50_v20   ;;  %2744 = vmatpush3.bf16.msra.mxu1 %v2901_v25 }
  0x1f   :  { %82 = vperm.xlu1 %2894, %v51_v21   ;;  %2712 = vmatpush3.bf16.msra.mxu0 %v2901_v25 }
  0x20   :  { %2745 = vmatprep.subr.bf16.mxu1 %v2902_v28  ;;  %2713 = vmatprep.subr.bf16.mxu0 %v2902_v28 }
  0x22   :  { %205 = vperm.xlu0 %2893, %v172_v23   ;;  %2746 = vmatpush3.bf16.msra.mxu1 %v2902_v28 }
  0x23   :  { %208 = vperm.xlu1 %2894, %v173_v24   ;;  %2714 = vmatpush3.bf16.msra.mxu0 %v2902_v28  ;;  %v2918_v28 = vld [vmem:[%s4274_s4 + $0x10] sm:$0xff]  }
  0x24   :  { %2571 = vmatprep.subr.bf16.mxu0 %v2903_v41  ;;  %2763 = vmatprep.subr.bf16.mxu1 %v2907_v42  ;;  %v2931_v41 = vld [vmem:[%s4275_s3 + $0x20] sm:$0xff]  }
  0x26   :  { %85 = vperm.xlu0 %2893, %v52_v26  }
  0x27   :  { %88 = vperm.xlu1 %2894, %v53_v27   ;;  %v2917_v27 = vld [vmem:[%s4274_s4 + $0x50] sm:$0xff]  }
  0x2a   :  { %211 = vperm.xlu0 %2893, %v174_v29   ;;  %v2919_v29 = vld [vmem:[%s4274_s4 + $0x98] sm:$0xff]  }
  0x2b   :  { %214 = vperm.xlu1 %2894, %v175_v30   ;;  %v2920_v30 = vld [vmem:[%s4274_s4 + $0x48] sm:$0xff]  }
  0x2e   :  { %91 = vperm.xlu0 %2893, %v54_v31   ;;  %v2922_v31 = vld [vmem:[%s4274_s4 + $0x90] sm:$0xff]  }
  0x2f   :  { %94 = vperm.xlu1 %2894, %v55_v32   ;;  %v2921_v32 = vld [vmem:[%s4274_s4 + $0x8] sm:$0xff]  }
  0x32   :  { %217 = vperm.xlu0 %2893, %v176_v33   ;;  %v2923_v33 = vld [vmem:[%s4274_s4 + $0x40] sm:$0xff]  }
  0x33   :  { %220 = vperm.xlu1 %2894, %v177_v34   ;;  %v2925_v34 = vld [vmem:[%s4274_s4 + $0x88] sm:$0xff]  }
  0x36   :  { %97 = vperm.xlu0 %2893, %v56_v35   ;;  %v2924_v35 = vld [vmem:[%s4274_s4] sm:$0xff]  }
  0x37   :  { %100 = vperm.xlu1 %2894, %v57_v36   ;;  %v2926_v36 = vld [vmem:[%s4274_s4 + $0x80] sm:$0xff]  }
  0x3a   :  { %223 = vperm.xlu0 %2893, %v178_v37   ;;  %v2927_v37 = vld [vmem:[%s4275_s3] sm:$0xff]  }
  0x3b   :  { %226 = vperm.xlu1 %2894, %v179_v38   ;;  %v2928_v38 = vld [vmem:[%s4275_s3 + $0x8] sm:$0xff]  }
  0x3e   :  { %103 = vperm.xlu0 %2893, %v58_v39   ;;  %v2929_v39 = vld [vmem:[%s4275_s3 + $0x10] sm:$0xff]  }
  0x3f   :  { %106 = vperm.xlu1 %2894, %v59_v40   ;;  %v2930_v40 = vld [vmem:[%s4275_s3 + $0x18] sm:$0xff]  }
  0x7d   :  { %v182_v44 = vpop.permute.xlu0 %181 }
  0x7e   :  { %v62_v45 = vpop.permute.xlu1 %61  ;;  %vm228_vm3 = vcmp.eq.s32.totalorder %v3363_v46, %v182_v44  ;;  %v2933_v44 = vld [vmem:[%s4275_s3 + $0x30] sm:$0xff]  }
  0x7f   :  { %vm108_vm0 = vcmp.eq.s32.totalorder %v3363_v46, %v62_v45  ;;  %v2934_v45 = vld [vmem:[%s4275_s3 + $0x38] sm:$0xff]  }
  0x81   :  { %v185_v47 = vpop.permute.xlu0 %184 }
  0x82   :  { %v65_v48 = vpop.permute.xlu1 %64  ;;  %vm229_vm1 = vcmp.eq.s32.totalorder %v3363_v46, %v185_v47  ;;  %v2936_v47 = vld [vmem:[%s4276_s6 + $0x30] sm:$0xff]  }
  0x83   :  { %vm109_vm2 = vcmp.eq.s32.totalorder %v3363_v46, %v65_v48  ;;  %vm2401_vm5 = vmpackc.low %vm229_vm1, %vm228_vm3 }
  0x84   :  { %vm2385_vm4 = vmpackc.low %vm109_vm2, %vm108_vm0  ;;  %2747 = vmatprep.mubr.msk.bf16.mxu1 %vm2401_vm5, %v3168_v49 }
  0x85   :  { %2715 = vmatprep.mubr.msk.bf16.mxu0 %vm2385_vm4, %v3168_v49  ;;  %v188_v50 = vpop.permute.xlu0 %187 }
  0x86   :  { %v191_v51 = vpop.permute.xlu1 %190  ;;  %vm230_vm6 = vcmp.eq.s32.totalorder %v3363_v46, %v188_v50 }
  0x87   :  { %vm231_vm7 = vcmp.eq.s32.totalorder %v3363_v46, %v191_v51 }
  0x88   :  { %vm2403_vm8 = vmpackc.low %vm231_vm7, %vm230_vm6 }
  0x89   :  { %2748 = vmatmul.mubr.msk.bf16.vlgmr.msra.gmra.mxu1 %vm2403_vm8, %v3168_v49  ;;  %v68_v53 = vpop.permute.xlu0 %67 }
  0x8a   :  { %v71_v54 = vpop.permute.xlu1 %70  ;;  %2764 = vmatpush3.bf16.msra.mxu1 %v2907_v42  ;;  %vm110_vm9 = vcmp.eq.s32.totalorder %v3363_v46, %v68_v53  ;;  %v2932_v42 = vld [vmem:[%s4275_s3 + $0x28] sm:$0xff]  }
  0x8b   :  { %vm111_vm10 = vcmp.eq.s32.totalorder %v3363_v46, %v71_v54  ;;  %2765 = vmatprep.subr.bf16.mxu1 %v2910_v52 }
  0x8c   :  { %vm2387_vm11 = vmpackc.low %vm111_vm10, %vm110_vm9 }
  0x8d   :  { %2716 = vmatmul.mubr.msk.bf16.vlgmr.msra.gmra.mxu0 %vm2387_vm11, %v3168_v49  ;;  %v194_v58 = vpop.permute.xlu0 %193 }
  0x8e   :  { %v197_v59 = vpop.permute.xlu1 %196  ;;  %2572 = vmatpush3.bf16.msra.mxu0 %v2904_v55  ;;  %2766 = vmatpush3.bf16.msra.mxu1 %v2910_v52  ;;  %vm232_vm12 = vcmp.eq.s32.totalorder %v3363_v46, %v194_v58 }
  0x8f   :  { %vm233_vm13 = vcmp.eq.s32.totalorder %v3363_v46, %v197_v59  ;;  %2573 = vmatprep.subr.bf16.mxu0 %v2905_v56  ;;  %2767 = vmatprep.subr.bf16.mxu1 %v2913_v57 }
  0x90   :  { %vm2405_vm14 = vmpackc.low %vm233_vm13, %vm232_vm12 }
  0x91   :  { %2751 = vmatprep.mubr.msk.bf16.mxu1 %vm2405_vm14, %v3168_v49  ;;  %v74_v63 = vpop.permute.xlu0 %73 }
  0x92   :  { %v77_v1 = vpop.permute.xlu1 %76  ;;  %2574 = vmatpush3.bf16.msra.mxu0 %v2906_v60  ;;  %2768 = vmatpush3.bf16.msra.mxu1 %v2913_v57  ;;  %vm112_vm15 = vcmp.eq.s32.totalorder %v3363_v46, %v74_v63 }
  0x93   :  { %vm113_vm0 = vcmp.eq.s32.totalorder %v3363_v46, %v77_v1  ;;  %2575 = vmatprep.subr.bf16.mxu0 %v2908_v61  ;;  %2769 = vmatprep.subr.bf16.mxu1 %v2916_v62 }
  0x94   :  { %vm2389_vm1 = vmpackc.low %vm113_vm0, %vm112_vm15 }
  0x95   :  { %2719 = vmatprep.mubr.msk.bf16.mxu0 %vm2389_vm1, %v3168_v49  ;;  %v200_v4 = vpop.permute.xlu0 %199 }
  0x96   :  { %v203_v5 = vpop.permute.xlu1 %202  ;;  %2576 = vmatpush3.bf16.msra.mxu0 %v2909_v2  ;;  %2770 = vmatpush3.bf16.msra.mxu1 %v2916_v62  ;;  %vm234_vm2 = vcmp.eq.s32.totalorder %v3363_v46, %v200_v4 }
  0x97   :  { %vm235_vm3 = vcmp.eq.s32.totalorder %v3363_v46, %v203_v5  ;;  %2577 = vmatprep.subr.bf16.mxu0 %v2911_v3  ;;  %2771 = vmatprep.subr.bf16.mxu1 %v2919_v29 }
  0x98   :  { %vm2407_vm4 = vmpackc.low %vm235_vm3, %vm234_vm2 }
  0x99   :  { %2752 = vmatmul.mubr.msk.bf16.gmra.mxu1 %vm2407_vm4, %v3168_v49  ;;  %v80_v8 = vpop.permute.xlu0 %79 }
  0x9a   :  { %v83_v9 = vpop.permute.xlu1 %82  ;;  %2578 = vmatpush3.bf16.msra.mxu0 %v2912_v6  ;;  %vm114_vm5 = vcmp.eq.s32.totalorder %v3363_v46, %v80_v8  ;;  %2772 = vmatpush3.bf16.msra.mxu1 %v2919_v29 }
  0x9b   :  { %vm115_vm6 = vcmp.eq.s32.totalorder %v3363_v46, %v83_v9  ;;  %2579 = vmatprep.subr.bf16.mxu0 %v2914_v7  ;;  %2773 = vmatprep.subr.bf16.mxu1 %v2922_v31 }
  0x9c   :  { %vm2391_vm7 = vmpackc.low %vm115_vm6, %vm114_vm5 }
  0x9d   :  { %2720 = vmatmul.mubr.msk.bf16.gmra.mxu0 %vm2391_vm7, %v3168_v49  ;;  %v206_v11 = vpop.permute.xlu0 %205 }
  0x9e   :  { %v209_v12 = vpop.permute.xlu1 %208  ;;  %2580 = vmatpush3.bf16.msra.mxu0 %v2915_v10  ;;  %vm236_vm8 = vcmp.eq.s32.totalorder %v3363_v46, %v206_v11  ;;  %2774 = vmatpush3.bf16.msra.mxu1 %v2922_v31 }
  0x9f   :  { %vm237_vm9 = vcmp.eq.s32.totalorder %v3363_v46, %v209_v12  ;;  %2581 = vmatprep.subr.bf16.mxu0 %v2917_v27  ;;  %2775 = vmatprep.subr.bf16.mxu1 %v2925_v34 }
  0xa0   :  { %vm2409_vm10 = vmpackc.low %vm237_vm9, %vm236_vm8 }
  0xa1   :  { %2755 = vmatprep.mubr.msk.bf16.mxu1 %vm2409_vm10, %v3168_v49  ;;  %v86_v13 = vpop.permute.xlu0 %85 }
  0xa2   :  { %v89_v14 = vpop.permute.xlu1 %88  ;;  %vm116_vm11 = vcmp.eq.s32.totalorder %v3363_v46, %v86_v13  ;;  %2582 = vmatpush3.bf16.msra.mxu0 %v2918_v28  ;;  %2776 = vmatpush3.bf16.msra.mxu1 %v2925_v34  ;;  %v2938_v34 = vld [vmem:[%s4276_s6 + $0x20] sm:$0xff]  }
  0xa3   :  { %vm117_vm12 = vcmp.eq.s32.totalorder %v3363_v46, %v89_v14  ;;  %2583 = vmatprep.subr.bf16.mxu0 %v2920_v30  ;;  %2777 = vmatprep.subr.bf16.mxu1 %v2926_v36 }
  0xa4   :  { %vm2393_vm13 = vmpackc.low %vm117_vm12, %vm116_vm11 }
  0xa5   :  { %2723 = vmatprep.mubr.msk.bf16.mxu0 %vm2393_vm13, %v3168_v49  ;;  %v212_v15 = vpop.permute.xlu0 %211 }
  0xa6   :  { %v215_v16 = vpop.permute.xlu1 %214  ;;  %vm238_vm14 = vcmp.eq.s32.totalorder %v3363_v46, %v212_v15  ;;  %2584 = vmatpush3.bf16.msra.mxu0 %v2921_v32  ;;  %2778 = vmatpush3.bf16.msra.mxu1 %v2926_v36  ;;  %v2940_v36 = vld [vmem:[%s4276_s6 + $0x10] sm:$0xff]  }
  0xa7   :  { %vm239_vm15 = vcmp.eq.s32.totalorder %v3363_v46, %v215_v16  ;;  %2585 = vmatprep.subr.bf16.mxu0 %v2923_v33  ;;  %v2937_v33 = vld [vmem:[%s4276_s6 + $0x28] sm:$0xff]  }
  0xa8   :  { %vm2411_vm0 = vmpackc.low %vm239_vm15, %vm238_vm14 }
  0xa9   :  { %2756 = vmatmul.mubr.msk.bf16.gmra.mxu1 %vm2411_vm0, %v3168_v49  ;;  %v92_v17 = vpop.permute.xlu0 %91 }
  0xaa   :  { %v95_v18 = vpop.permute.xlu1 %94  ;;  %vm118_vm1 = vcmp.eq.s32.totalorder %v3363_v46, %v92_v17  ;;  %2586 = vmatpush3.bf16.msra.mxu0 %v2924_v35  ;;  %v2939_v35 = vld [vmem:[%s4276_s6 + $0x18] sm:$0xff]  }
  0xab   :  { %vm119_vm2 = vcmp.eq.s32.totalorder %v3363_v46, %v95_v18 }
  0xac   :  { %vm2395_vm3 = vmpackc.low %vm119_vm2, %vm118_vm1 }
  0xad   :  { %2724 = vmatmul.mubr.msk.bf16.gmra.mxu0 %vm2395_vm3, %v3168_v49  ;;  %v218_v19 = vpop.permute.xlu0 %217 }
  0xae   :  { %v221_v20 = vpop.permute.xlu1 %220  ;;  %vm240_vm4 = vcmp.eq.s32.totalorder %v3363_v46, %v218_v19 }
  0xaf   :  { %vm241_vm5 = vcmp.eq.s32.totalorder %v3363_v46, %v221_v20 }
  0xb0   :  { %vm2413_vm6 = vmpackc.low %vm241_vm5, %vm240_vm4 }
  0xb1   :  { %2759 = vmatprep.mubr.msk.bf16.mxu1 %vm2413_vm6, %v3168_v49  ;;  %v98_v21 = vpop.permute.xlu0 %97 }
  0xb2   :  { %v101_v22 = vpop.permute.xlu1 %100  ;;  %vm120_vm7 = vcmp.eq.s32.totalorder %v3363_v46, %v98_v21 }
  0xb3   :  { %vm121_vm8 = vcmp.eq.s32.totalorder %v3363_v46, %v101_v22 }
  0xb4   :  { %vm2397_vm9 = vmpackc.low %vm121_vm8, %vm120_vm7 }
  0xb5   :  { %2727 = vmatprep.mubr.msk.bf16.mxu0 %vm2397_vm9, %v3168_v49  ;;  %v224_v23 = vpop.permute.xlu0 %223 }
  0xb6   :  { %v227_v24 = vpop.permute.xlu1 %226  ;;  %vm242_vm10 = vcmp.eq.s32.totalorder %v3363_v46, %v224_v23 }
  0xb7   :  { %vm243_vm11 = vcmp.eq.s32.totalorder %v3363_v46, %v227_v24 }
  0xb8   :  { %vm2415_vm12 = vmpackc.low %vm243_vm11, %vm242_vm10 }
  0xb9   :  { %2760 = vmatmul.mubr.msk.bf16.gmra.mxu1 %vm2415_vm12, %v3168_v49  ;;  %v104_v25 = vpop.permute.xlu0 %103 }
  0xba   :  { %v107_v26 = vpop.permute.xlu1 %106  ;;  %vm122_vm13 = vcmp.eq.s32.totalorder %v3363_v46, %v104_v25  ;;  %2779 = vmatprep.mubr.bf16.mxu1 %v2927_v37  ;;  %v2941_v37 = vld [vmem:[%s4276_s6 + $0x8] sm:$0xff]  }
  0xbb   :  { %vm123_vm14 = vcmp.eq.s32.totalorder %v3363_v46, %v107_v26  ;;  %v2935_v46 = vld [vmem:[%s4276_s6 + $0x38] sm:$0xff]  }
  0xbc   :  { %vm2399_vm15 = vmpackc.low %vm123_vm14, %vm122_vm13  ;;  %2795 = vmatprep.subr.bf16.mxu1 %v2935_v46 }
  0xbd   :  { %2728 = vmatmul.mubr.msk.bf16.gmra.mxu0 %vm2399_vm15, %v3168_v49 }
  0xc1   :  { %2780 = vmatmul.mubr.bf16.vlgmr.msra.gmra.mxu1 %v2928_v38  ;;  %v2942_v38 = vld [vmem:[%s4276_s6] sm:$0xff]  }
  0xc2   :  { %2783 = vmatprep.mubr.bf16.mxu1 %v2929_v39  ;;  %2796 = vmatpush3.bf16.msra.mxu1 %v2935_v46  ;;  %v2943_v39 = vld [vmem:[%s4277_s8 + $0xa8] ss:$12 sps:$4 sm:$0xff]   ;;  %v2951_v46 = vld [vmem:[%s4277_s8 + $0x78] ss:$12 sps:$4 sm:$0xff]  }
  0xc3   :  { %2797 = vmatprep.subr.bf16.mxu1 %v2936_v47 }
  0xc6   :  { %2798 = vmatpush3.bf16.msra.mxu1 %v2936_v47  ;;  %v2957_v47 = vld [vmem:[%s4277_s8 + $0x64] ss:$12 sps:$4 sm:$0xff]  }
  0xc7   :  { %2799 = vmatprep.subr.bf16.mxu1 %v2937_v33 }
  0xc9   :  { %2784 = vmatmul.mubr.bf16.gmra.mxu1 %v2930_v40  ;;  %v2945_v40 = vld [vmem:[%s4277_s8 + $0xac] ss:$12 sps:$4 sm:$0xff]  }
  0xca   :  { %2787 = vmatprep.mubr.bf16.mxu1 %v2931_v41  ;;  %2800 = vmatpush3.bf16.msra.mxu1 %v2937_v33  ;;  %v3609_v41 = vld [vmem:[%s4277_s8 + $0xb0] ss:$12 sps:$4 sm:$0xff]  }
  0xcb   :  { %2801 = vmatprep.subr.bf16.mxu1 %v2938_v34  ;;  %1392 = vmatprep.subr.bf16.mxu0 %v2945_v40 }
  0xce   :  { %2802 = vmatpush3.bf16.msra.mxu1 %v2938_v34 }
  0xcf   :  { %2803 = vmatprep.subr.bf16.mxu1 %v2939_v35 }
  0xd1   :  { %2788 = vmatmul.mubr.bf16.gmra.mxu1 %v2932_v42  ;;  %v2949_v42 = vld [vmem:[%s4277_s8 + $0x94] ss:$12 sps:$4 sm:$0xff]  }
  0xd2   :  { %2791 = vmatprep.mubr.bf16.mxu1 %v2933_v44  ;;  %2804 = vmatpush3.bf16.msra.mxu1 %v2939_v35  ;;  %v2947_v44 = vld [vmem:[%s4277_s8 + $0x90] ss:$12 sps:$4 sm:$0xff]  }
  0xd3   :  { %2805 = vmatprep.subr.bf16.mxu1 %v2940_v36 }
  0xd6   :  { %2806 = vmatpush3.bf16.msra.mxu1 %v2940_v36 }
  0xd7   :  { %2807 = vmatprep.subr.bf16.mxu1 %v2941_v37 }
  0xd9   :  { %2792 = vmatmul.mubr.bf16.gmra.mxu1 %v2934_v45  ;;  %v2953_v45 = vld [vmem:[%s4277_s8 + $0x7c] ss:$12 sps:$4 sm:$0xff]  }
  0xda   :  { %2808 = vmatpush3.bf16.msra.mxu1 %v2941_v37 }
  0xdb   :  { %2809 = vmatprep.subr.bf16.mxu1 %v2942_v38 }
  0xde   :  { %2810 = vmatpush3.bf16.msra.mxu1 %v2942_v38 }
  0xdf   :  { %2827 = vmatprep.subr.bf16.mxu1 %v3609_v41 }
 0x149   :  { %v3509_v48 = vpop.f32.mrf.mxu1 }
 0x14b   :  { %v3511_v49 = vpop.f32.mrf.mxu1 }
 0x14d   :  { %v2717_v50 = vpop.f32.mrf.mxu0  ;;  %v3513_v51 = vpop.f32.mrf.mxu1 }
 0x14e   :  { %v3524_v58 = vpack.c.bf16 %v3513_v51, %v3509_v48 }
 0x14f   :  { %v382_v52 = vpop.f32.mrf.mxu0  ;;  %v3515_v53 = vpop.f32.mrf.mxu1 }
 0x150   :  { %v3519_v54 = vpack.c.bf16 %v3515_v53, %v3511_v49 }
 0x151   :  { %v2718_v55 = vpop.f32.mrf.mxu0 }
 0x152   :  { %853 = vmatprep.mubr.bf16.mxu0 %v3519_v54  ;;  %v543_v61 = vpack.c.bf16 %v2718_v55, %v2717_v50  ;;  %v2955_v50 = vld [vmem:[%s4277_s8 + $0x60] ss:$12 sps:$4 sm:$0xff]   ;;  %v2959_v55 = vld [vmem:[%s4277_s8 + $0x48] ss:$12 sps:$4 sm:$0xff]  }
 0x153   :  { %v385_v56 = vpop.f32.mrf.mxu0 }
 0x154   :  { %v542_v57 = vpack.c.bf16 %v385_v56, %v382_v52  ;;  %v2961_v52 = vld [vmem:[%s4277_s8 + $0x4c] ss:$12 sps:$4 sm:$0xff]   ;;  %v2965_v56 = vld [vmem:[%s4277_s8 + $0x34] ss:$12 sps:$4 sm:$0xff]  }
 0x156   :  { %854 = vmatmul.mubr.bf16.vlgmr.msra.gmra.mxu0 %v542_v57  ;;  %v2963_v57 = vld [vmem:[%s4277_s8 + $0x30] ss:$12 sps:$4 sm:$0xff]  }
 0x157   :  { %861 = vmatprep.mubr.bf16.mxu0 %v3524_v58  ;;  %1393 = vmatpush1.bf16.msra.mxu0 %v2943_v39 }
 0x158   :  { %1394 = vmatprep.subr.bf16.mxu0 %v2949_v42 }
 0x159   :  { %v3527_v59 = vpop.f32.mrf.mxu1 }
 0x15a   :  { %4296 = vst [vmem:[#allocation2_spill] sm:$0xff] %v3527_v59 }
 0x15b   :  { %v3529_v60 = vpop.f32.mrf.mxu1  ;;  %1395 = vmatpush1.bf16.msra.mxu0 %v2947_v44 }
 0x15c   :  { %1396 = vmatprep.subr.bf16.mxu0 %v2953_v45 }
 0x15d   :  { %v2721_v62 = vpop.f32.mrf.mxu0  ;;  %v3531_v63 = vpop.f32.mrf.mxu1 }
 0x15e   :  { %4297 = vst [vmem:[#allocation3_spill] sm:$0xff] %v3531_v63  ;;  %862 = vmatmul.mubr.bf16.gmra.mxu0 %v543_v61  ;;  %v3542_v7 = vpack.c.bf16 %v3531_v63, %v3527_v59 }
 0x15f   :  { %v398_v1 = vpop.f32.mrf.mxu0  ;;  %v3533_v2 = vpop.f32.mrf.mxu1  ;;  %1397 = vmatpush1.bf16.msra.mxu0 %v2951_v46 }
 0x160   :  { %4298 = vst [vmem:[#allocation4_spill] sm:$0xff] %v3533_v2  ;;  %v3537_v3 = vpack.c.bf16 %v3533_v2, %v3529_v60  ;;  %1398 = vmatprep.subr.bf16.mxu0 %v2957_v47 }
 0x161   :  { %v2722_v4 = vpop.f32.mrf.mxu0 }
 0x162   :  { %869 = vmatprep.mubr.bf16.mxu0 %v3537_v3  ;;  %v545_v10 = vpack.c.bf16 %v2722_v4, %v2721_v62 }
 0x163   :  { %v401_v5 = vpop.f32.mrf.mxu0  ;;  %1399 = vmatpush1.bf16.msra.mxu0 %v2955_v50 }
 0x164   :  { %v544_v6 = vpack.c.bf16 %v401_v5, %v398_v1  ;;  %1400 = vmatprep.subr.bf16.mxu0 %v2961_v52  ;;  %v3645_v5 = vld [vmem:[%s4278_s5] ss:$0 sm:$0xff] }
 0x166   :  { %870 = vmatmul.mubr.bf16.gmra.mxu0 %v544_v6 }
 0x167   :  { %877 = vmatprep.mubr.bf16.mxu0 %v3542_v7  ;;  %1401 = vmatpush1.bf16.msra.mxu0 %v2959_v55 }
 0x168   :  { %1402 = vmatprep.subr.bf16.mxu0 %v2965_v56 }
 0x169   :  { %v3545_v8 = vpop.f32.mrf.mxu1 }
 0x16a   :  { %4299 = vst [vmem:[#allocation5_spill] sm:$0xff] %v3545_v8 }
 0x16b   :  { %v3547_v9 = vpop.f32.mrf.mxu1  ;;  %1403 = vmatpush1.bf16.msra.mxu0 %v2963_v57 }
 0x16c   :  { %4300 = vst [vmem:[#allocation6_spill] sm:$0xff] %v3547_v9 }
 0x16d   :  { %v2725_v11 = vpop.f32.mrf.mxu0  ;;  %v3549_v12 = vpop.f32.mrf.mxu1 }
 0x16e   :  { %4301 = vst [vmem:[#allocation7_spill] sm:$0xff] %v3549_v12  ;;  %878 = vmatmul.mubr.bf16.gmra.mxu0 %v545_v10  ;;  %v3560_v19 = vpack.c.bf16 %v3549_v12, %v3545_v8 }
 0x16f   :  { %v414_v13 = vpop.f32.mrf.mxu0  ;;  %v3551_v14 = vpop.f32.mrf.mxu1 }
 0x170   :  { %4302 = vst [vmem:[#allocation8_spill] sm:$0xff] %v3551_v14  ;;  %v3555_v15 = vpack.c.bf16 %v3551_v14, %v3547_v9 }
 0x171   :  { %v2726_v16 = vpop.f32.mrf.mxu0 }
 0x172   :  { %885 = vmatprep.mubr.bf16.mxu0 %v3555_v15  ;;  %v547_v22 = vpack.c.bf16 %v2726_v16, %v2725_v11 }
 0x173   :  { %v417_v17 = vpop.f32.mrf.mxu0 }
 0x174   :  { %v546_v18 = vpack.c.bf16 %v417_v17, %v414_v13 }
 0x176   :  { %886 = vmatmul.mubr.bf16.gmra.mxu0 %v546_v18 }
 0x177   :  { %893 = vmatprep.mubr.bf16.mxu0 %v3560_v19 }
 0x179   :  { %v3563_v20 = vpop.f32.mrf.mxu1 }
 0x17a   :  { %4303 = vst [vmem:[#allocation9_spill] sm:$0xff] %v3563_v20 }
 0x17b   :  { %v3565_v21 = vpop.f32.mrf.mxu1 }
 0x17c   :  { %4304 = vst [vmem:[#allocation10_spill] sm:$0xff] %v3565_v21 }
 0x17d   :  { %v2729_v23 = vpop.f32.mrf.mxu0  ;;  %v3567_v24 = vpop.f32.mrf.mxu1 }
 0x17e   :  { %4305 = vst [vmem:[#allocation11_spill] sm:$0xff] %v3567_v24  ;;  %894 = vmatmul.mubr.bf16.gmra.mxu0 %v547_v22  ;;  %v3578_v31 = vpack.c.bf16 %v3567_v24, %v3563_v20 }
 0x17f   :  { %v430_v25 = vpop.f32.mrf.mxu0  ;;  %v3569_v26 = vpop.f32.mrf.mxu1 }
 0x180   :  { %4306 = vst [vmem:[#allocation12_spill] sm:$0xff] %v3569_v26  ;;  %v3573_v27 = vpack.c.bf16 %v3569_v26, %v3565_v21 }
 0x181   :  { %v2730_v28 = vpop.f32.mrf.mxu0  ;;  %v2781_v61 = vpop.f32.mrf.mxu1 }
 0x182   :  { %901 = vmatprep.mubr.bf16.mxu0 %v3573_v27  ;;  %v549_v32 = vpack.c.bf16 %v2730_v28, %v2729_v23 }
 0x183   :  { %v433_v29 = vpop.f32.mrf.mxu0  ;;  %v952_v1 = vpop.f32.mrf.mxu1 }
 0x184   :  { %v548_v30 = vpack.c.bf16 %v433_v29, %v430_v25 }
 0x185   :  { %v2782_v11 = vpop.f32.mrf.mxu1 }
 0x186   :  { %902 = vmatmul.mubr.bf16.gmra.mxu0 %v548_v30 }
 0x187   :  { %909 = vmatprep.mubr.bf16.mxu0 %v3578_v31  ;;  %v955_v22 = vpop.f32.mrf.mxu1 }
 0x189   :  { %v2785_v33 = vpop.f32.mrf.mxu1 }
 0x18b   :  { %v968_v42 = vpop.f32.mrf.mxu1 }
 0x18d   :  { %v2786_v55 = vpop.f32.mrf.mxu1 }
 0x18e   :  { %910 = vmatmul.mubr.bf16.gmra.mxu0 %v549_v32 }
 0x18f   :  { %1424 = vmatprep.mubr.bf16.mxu0 %v3167_v0 }
 0x216   :  { %v2587_v62 = vpop.f32.mrf.mxu0 }
 0x218   :  { %v2588_v4 = vpop.f32.mrf.mxu0 }
 0x219   :  { %v2589_v6 = vadd.f32 %v2588_v4, %v2587_v62 }
 0x21a   :  { %v2590_v10 = vpop.f32.mrf.mxu0 }
 0x21b   :  { %v856_v13 = vadd.f32 %v2589_v6, %v3645_v5 }
 0x21c   :  { %v2591_v16 = vpop.f32.mrf.mxu0 }
 0x21d   :  { %v2592_v17 = vadd.f32 %v2591_v16, %v2590_v10  ;;  %v953_v23 = vadd.f32 %v952_v1, %v856_v13  ;;  %v2950_v10 = vld [vmem:[%s4277_s8 + $0x98] ss:$12 sps:$4 sm:$0xff]   ;;  %v971_v13 = vpop.f32.mrf.mxu1 }
 0x21e   :  { %v2593_v18 = vpop.f32.mrf.mxu0 }
 0x21f   :  { %v859_v25 = vadd.f32 %v2592_v17, %v3645_v5  ;;  %v1015_v34 = vmax.f32 %v953_v23, 0.0  ;;  %v2954_v23 = vld [vmem:[%s4277_s8 + $0x80] ss:$12 sps:$4 sm:$0xff]  }
 0x220   :  { %v2594_v28 = vpop.f32.mrf.mxu0 }
 0x221   :  { %v2595_v29 = vadd.f32 %v2594_v28, %v2593_v18  ;;  %v956_v30 = vadd.f32 %v955_v22, %v859_v25  ;;  %v2789_v28 = vpop.f32.mrf.mxu1 }
 0x222   :  { %v2596_v32 = vpop.f32.mrf.mxu0 }
 0x223   :  { %v864_v35 = vadd.f32 %v2595_v29, %v3645_v5  ;;  %v1016_v36 = vmax.f32 %v956_v30, 0.0 }
 0x224   :  { %v2597_v37 = vpop.f32.mrf.mxu0 }
 0x225   :  { %v1031_v38 = vpack.c.bf16 %v1016_v36, %v1015_v34  ;;  %v2598_v39 = vadd.f32 %v2597_v37, %v2596_v32  ;;  %v961_v44 = vadd.f32 %v2781_v61, %v864_v35 }
 0x226   :  { %v2599_v40 = vpop.f32.mrf.mxu0 }
 0x227   :  { %v867_v45 = vadd.f32 %v2598_v39, %v3645_v5  ;;  %2811 = vmatprep.mubr.bf16.mxu1 %v1031_v38  ;;  %v1017_v56 = vmax.f32 %v961_v44, 0.0  ;;  %v984_v38 = vpop.f32.mrf.mxu1 }
 0x228   :  { %v2600_v46 = vpop.f32.mrf.mxu0 }
 0x229   :  { %v964_v47 = vadd.f32 %v2782_v11, %v867_v45  ;;  %v2601_v50 = vadd.f32 %v2600_v46, %v2599_v40  ;;  %v2962_v46 = vld [vmem:[%s4277_s8 + $0x50] ss:$12 sps:$4 sm:$0xff]  }
 0x22a   :  { %v2602_v52 = vpop.f32.mrf.mxu0 }
 0x22b   :  { %v1018_v57 = vmax.f32 %v964_v47, 0.0  ;;  %v872_v62 = vadd.f32 %v2601_v50, %v3645_v5  ;;  %v2790_v50 = vpop.f32.mrf.mxu1 }
 0x22c   :  { %v2603_v1 = vpop.f32.mrf.mxu0 }
 0x22d   :  { %v1032_v4 = vpack.c.bf16 %v1018_v57, %v1017_v56  ;;  %v2604_v6 = vadd.f32 %v2603_v1, %v2602_v52  ;;  %v969_v16 = vadd.f32 %v968_v42, %v872_v62 }
 0x22e   :  { %v2605_v61 = vpop.f32.mrf.mxu0 }
 0x22f   :  { %2812 = vmatmul.mubr.bf16.vlgmr.msra.gmra.mxu1 %v1032_v4  ;;  %v875_v11 = vadd.f32 %v2604_v6, %v3645_v5  ;;  %v1019_v29 = vmax.f32 %v969_v16, 0.0  ;;  %v987_v6 = vpop.f32.mrf.mxu1 }
 0x230   :  { %v2606_v17 = vpop.f32.mrf.mxu0  ;;  %2828 = vmatpush3.bf16.msra.mxu1 %v3609_v41  ;;  %v2958_v41 = vld [vmem:[%s4277_s8 + $0x68] ss:$12 sps:$4 sm:$0xff]  }
 0x231   :  { %v2607_v18 = vadd.f32 %v2606_v17, %v2605_v61  ;;  %v972_v22 = vadd.f32 %v971_v13, %v875_v11  ;;  %2829 = vmatprep.subr.bf16.mxu1 %v2950_v10  ;;  %v2793_v17 = vpop.f32.mrf.mxu1 }
 0x232   :  { %v2608_v25 = vpop.f32.mrf.mxu0 }
 0x233   :  { %v880_v30 = vadd.f32 %v2607_v18, %v3645_v5  ;;  %v1020_v32 = vmax.f32 %v972_v22, 0.0 }
 0x234   :  { %v2609_v34 = vpop.f32.mrf.mxu0  ;;  %2830 = vmatpush3.bf16.msra.mxu1 %v2950_v10 }
 0x235   :  { %v1033_v35 = vpack.c.bf16 %v1020_v32, %v1019_v29  ;;  %v2610_v36 = vadd.f32 %v2609_v34, %v2608_v25  ;;  %2831 = vmatprep.subr.bf16.mxu1 %v2954_v23  ;;  %v977_v39 = vadd.f32 %v2785_v33, %v880_v30  ;;  %v1000_v34 = vpop.f32.mrf.mxu1 }
 0x236   :  { %v2611_v37 = vpop.f32.mrf.mxu0 }
 0x237   :  { %v883_v40 = vadd.f32 %v2610_v36, %v3645_v5  ;;  %2815 = vmatprep.mubr.bf16.mxu1 %v1033_v35  ;;  %v1021_v52 = vmax.f32 %v977_v39, 0.0 }
 0x238   :  { %v2612_v42 = vpop.f32.mrf.mxu0  ;;  %2832 = vmatpush3.bf16.msra.mxu1 %v2954_v23 }
 0x239   :  { %v980_v44 = vadd.f32 %v2786_v55, %v883_v40  ;;  %v2613_v45 = vadd.f32 %v2612_v42, %v2611_v37  ;;  %2833 = vmatprep.subr.bf16.mxu1 %v2958_v41  ;;  %v2794_v40 = vpop.f32.mrf.mxu1 }
 0x23a   :  { %v2614_v47 = vpop.f32.mrf.mxu0 }
 0x23b   :  { %v1022_v56 = vmax.f32 %v980_v44, 0.0  ;;  %v888_v57 = vadd.f32 %v2613_v45, %v3645_v5 }
 0x23c   :  { %v2615_v62 = vpop.f32.mrf.mxu0  ;;  %2834 = vmatpush3.bf16.msra.mxu1 %v2958_v41 }
 0x23d   :  { %v2616_v33 = vadd.f32 %v2615_v62, %v2614_v47  ;;  %v1034_v1 = vpack.c.bf16 %v1022_v56, %v1021_v52  ;;  %2835 = vmatprep.subr.bf16.mxu1 %v2962_v46  ;;  %v985_v55 = vadd.f32 %v984_v38, %v888_v57  ;;  %v1003_v57 = vpop.f32.mrf.mxu1 }
 0x23e   :  { %v2617_v4 = vpop.f32.mrf.mxu0 }
 0x23f   :  { %2816 = vmatmul.mubr.bf16.gmra.mxu1 %v1034_v1  ;;  %v891_v10 = vadd.f32 %v2616_v33, %v3645_v5  ;;  %v1023_v18 = vmax.f32 %v985_v55, 0.0 }
 0x240   :  { %v2618_v61 = vpop.f32.mrf.mxu0  ;;  %2836 = vmatpush3.bf16.msra.mxu1 %v2962_v46 }
 0x241   :  { %v2619_v13 = vadd.f32 %v2618_v61, %v2617_v4  ;;  %v988_v16 = vadd.f32 %v987_v6, %v891_v10 }
 0x242   :  { %v2620_v11 = vpop.f32.mrf.mxu0 }
 0x243   :  { %v896_v22 = vadd.f32 %v2619_v13, %v3645_v5  ;;  %v1024_v23 = vmax.f32 %v988_v16, 0.0 }
 0x244   :  { %v2621_v25 = vpop.f32.mrf.mxu0 }
 0x245   :  { %v1035_v29 = vpack.c.bf16 %v1024_v23, %v1023_v18  ;;  %v2622_v30 = vadd.f32 %v2621_v25, %v2620_v11  ;;  %v993_v35 = vadd.f32 %v2789_v28, %v896_v22 }
 0x246   :  { %v2623_v32 = vpop.f32.mrf.mxu0 }
 0x247   :  { %v899_v36 = vadd.f32 %v2622_v30, %v3645_v5  ;;  %2819 = vmatprep.mubr.bf16.mxu1 %v1035_v29  ;;  %v1025_v42 = vmax.f32 %v993_v35, 0.0  ;;  %v2966_v30 = vld [vmem:[%s4277_s8 + $0x38] ss:$12 sps:$4 sm:$0xff]   ;;  %v2971_v35 = vld [vmem:[%s4277_s8] ss:$12 sps:$4 sm:$0xff]  }
 0x248   :  { %v2624_v41 = vpop.f32.mrf.mxu0  ;;  %2837 = vmatprep.subr.bf16.mxu1 %v2966_v30 }
 0x249   :  { %v996_v37 = vadd.f32 %v2790_v50, %v899_v36  ;;  %v2625_v38 = vadd.f32 %v2624_v41, %v2623_v32  ;;  %2838 = vmatpush3.bf16.msra.mxu1 %v2966_v30  ;;  %v2969_v32 = vld [vmem:[%s4277_s8 + $0x1c] ss:$12 sps:$4 sm:$0xff]   ;;  %v2977_v41 = vld [vmem:[%s4279_s10 + $0xac] ss:$12 sps:$4 sm:$0xff]  }
 0x24a   :  { %v2626_v39 = vpop.f32.mrf.mxu0  ;;  %1404 = vmatprep.subr.bf16.mxu0 %v2969_v32  ;;  %v2974_v36 = vld [vmem:[%s4277_s8 + $0x8] ss:$12 sps:$4 sm:$0xff]  }
 0x24b   :  { %v1026_v44 = vmax.f32 %v996_v37, 0.0  ;;  %v904_v45 = vadd.f32 %v2625_v38, %v3645_v5  ;;  %v2984_v37 = vld [vmem:[%s4279_s10 + $0xb0] ss:$12 sps:$4 sm:$0xff]  }
 0x24c   :  { %v2627_v46 = vpop.f32.mrf.mxu0 }
 0x24d   :  { %v2628_v47 = vadd.f32 %v2627_v46, %v2626_v39  ;;  %v1036_v52 = vpack.c.bf16 %v1026_v44, %v1025_v42  ;;  %v1001_v62 = vadd.f32 %v1000_v34, %v904_v45  ;;  %v2973_v34 = vld [vmem:[%s4277_s8 + $0x4] ss:$12 sps:$4 sm:$0xff]   ;;  %v3706_v42 = vld [vmem:[%s4280_s7] ss:$0 sm:$0xff] }
 0x24e   :  { %v2629_v56 = vpop.f32.mrf.mxu0 }
 0x24f   :  { %2820 = vmatmul.mubr.bf16.gmra.mxu1 %v1036_v52  ;;  %v907_v28 = vadd.f32 %v2628_v47, %v3645_v5  ;;  %v1027_v6 = vmax.f32 %v1001_v62, 0.0 }
 0x250   :  { %v2630_v33 = vpop.f32.mrf.mxu0 }
 0x251   :  { %v2631_v1 = vadd.f32 %v2630_v33, %v2629_v56  ;;  %v1004_v4 = vadd.f32 %v1003_v57, %v907_v28  ;;  %v2975_v57 = vld [vmem:[%s4279_s10 + $0xa8] ss:$12 sps:$4 sm:$0xff]   ;;  %v2988_v33 = vld [vmem:[%s4279_s10 + $0x98] ss:$12 sps:$4 sm:$0xff]  }
 0x252   :  { %v2632_v50 = vpop.f32.mrf.mxu0  ;;  %v2980_v28 = vld [vmem:[%s4279_s10 + $0x94] ss:$12 sps:$4 sm:$0xff]  }
 0x253   :  { %v912_v55 = vadd.f32 %v2631_v1, %v3645_v5  ;;  %v1028_v10 = vmax.f32 %v1004_v4, 0.0  ;;  %v2978_v1 = vld [vmem:[%s4279_s10 + $0x90] ss:$12 sps:$4 sm:$0xff]  }
 0x254   :  { %v2633_v61 = vpop.f32.mrf.mxu0  ;;  %v2983_v4 = vld [vmem:[%s4279_s10 + $0x7c] ss:$12 sps:$4 sm:$0xff]  }
 0x255   :  { %v1037_v13 = vpack.c.bf16 %v1028_v10, %v1027_v6  ;;  %v2634_v16 = vadd.f32 %v2633_v61, %v2632_v50  ;;  %v1009_v11 = vadd.f32 %v2793_v17, %v912_v55  ;;  %v2970_v17 = vld [vmem:[%s4277_s8 + $0x20] ss:$12 sps:$4 sm:$0xff]   ;;  %v2981_v55 = vld [vmem:[%s4279_s10 + $0x78] ss:$12 sps:$4 sm:$0xff]  }
 0x256   :  { %2839 = vmatprep.subr.bf16.mxu1 %v2970_v17  ;;  %v2992_v50 = vld [vmem:[%s4279_s10 + $0x80] ss:$12 sps:$4 sm:$0xff]   ;;  %v2987_v61 = vld [vmem:[%s4279_s10 + $0x64] ss:$12 sps:$4 sm:$0xff]  }
 0x257   :  { %v915_v18 = vadd.f32 %v2634_v16, %v3645_v5  ;;  %2823 = vmatprep.mubr.bf16.mxu1 %v1037_v13  ;;  %v1029_v23 = vmax.f32 %v1009_v11, 0.0  ;;  %v2967_v5 = vld [vmem:[%s4277_s8 + $0x18] ss:$12 sps:$4 sm:$0xff]   ;;  %2840 = vmatpush3.bf16.msra.mxu1 %v2970_v17  ;;  %v2996_v13 = vld [vmem:[%s4279_s10 + $0x68] ss:$12 sps:$4 sm:$0xff]  }
 0x258   :  { %1405 = vmatpush1.bf16.msra.mxu0 %v2967_v5  ;;  %2841 = vmatprep.subr.bf16.mxu1 %v2974_v36  ;;  %v2985_v11 = vld [vmem:[%s4279_s10 + $0x60] ss:$12 sps:$4 sm:$0xff]   ;;  %v2989_v17 = vld [vmem:[%s4279_s10 + $0x48] ss:$12 sps:$4 sm:$0xff]  }
 0x259   :  { %v1012_v22 = vadd.f32 %v2794_v40, %v915_v18  ;;  %1406 = vmatprep.subr.bf16.mxu0 %v2973_v34 }
 0x25b   :  { %v1030_v25 = vmax.f32 %v1012_v22, 0.0  ;;  %2842 = vmatpush3.bf16.msra.mxu1 %v2974_v36  ;;  %v3004_v36 = vld [vmem:[%s4279_s10 + $0x38] ss:$12 sps:$4 sm:$0xff]  }
 0x25c   :  { %1407 = vmatpush1.bf16.msra.mxu0 %v2971_v35  ;;  %1779 = vmatprep.subr.bf16.mxu1 %v2977_v41  ;;  %v2995_v35 = vld [vmem:[%s4279_s10 + $0x34] ss:$12 sps:$4 sm:$0xff]   ;;  %v2993_v41 = vld [vmem:[%s4279_s10 + $0x30] ss:$12 sps:$4 sm:$0xff]  }
 0x25d   :  { %v1038_v29 = vpack.c.bf16 %v1030_v25, %v1029_v23  ;;  %2859 = vmatprep.subr.bf16.mxu0 %v2984_v37  ;;  %v2991_v23 = vld [vmem:[%s4279_s10 + $0x4c] ss:$12 sps:$4 sm:$0xff]   ;;  %v3000_v25 = vld [vmem:[%s4279_s10 + $0x50] ss:$12 sps:$4 sm:$0xff]  }
 0x25f   :  { %2824 = vmatmul.mubr.bf16.gmra.mxu1 %v1038_v29 }
 0x2ef   :  { %v2813_v38 = vpop.f32.mrf.mxu1 }
 0x2f0   :  { %v1153_v52 = vadd.f32 %v2813_v38, %v3706_v42  ;;  %v3005_v38 = vld [vmem:[%s4279_s10 + $0x20] ss:$12 sps:$4 sm:$0xff]  }
 0x2f1   :  { %v1144_v39 = vpop.f32.mrf.mxu1 }
 0x2f2   :  { %v1145_v46 = vadd.f32 %v3706_v42, %v1144_v39 }
 0x2f3   :  { %v2814_v40 = vpop.f32.mrf.mxu1 }
 0x2f4   :  { %v1156_v44 = vadd.f32 %v2814_v40, %v3706_v42  ;;  %v2997_v40 = vld [vmem:[%s4279_s10 + $0x18] ss:$12 sps:$4 sm:$0xff]  }
 0x2f5   :  { %v1147_v45 = vpop.f32.mrf.mxu1 }
 0x2f6   :  { %v1148_v47 = vadd.f32 %v3706_v42, %v1147_v45  ;;  %v1208_v62 = vpack.c.bf16 %v1156_v44, %v1153_v52  ;;  %v3003_v45 = vld [vmem:[%s4279_s10 + $0x4] ss:$12 sps:$4 sm:$0xff]   ;;  %v3001_v52 = vld [vmem:[%s4279_s10] ss:$12 sps:$4 sm:$0xff]  }
 0x2f8   :  { %v1207_v56 = vpack.c.bf16 %v1148_v47, %v1145_v46  ;;  %v3006_v46 = vld [vmem:[%s4279_s10 + $0x8] ss:$12 sps:$4 sm:$0xff]  }
 0x2fa   :  { %1425 = vmatmul.mubr.bf16.vlgmr.msra.gmra.mxu0 %v1207_v56  ;;  %2843 = vmatprep.mubr.bf16.mxu1 %v1207_v56 }
 0x2fb   :  { %2844 = vmatmul.mubr.bf16.vlgmr.msra.gmra.mxu1 %v1208_v62  ;;  %1434 = vmatprep.mubr.bf16.mxu0 %v3167_v0 }
 0x2fc   :  { %1780 = vmatpush1.bf16.msra.mxu1 %v2975_v57  ;;  %2860 = vmatpush3.bf16.msra.mxu0 %v2984_v37  ;;  %v2999_v37 = vld [vmem:[%s4279_s10 + $0x1c] ss:$12 sps:$4 sm:$0xff]  }
 0x2fd   :  { %1781 = vmatprep.subr.bf16.mxu1 %v2980_v28  ;;  %2861 = vmatprep.subr.bf16.mxu0 %v2988_v33 }
 0x2ff   :  { %v2817_v6 = vpop.f32.mrf.mxu1 }
 0x300   :  { %1782 = vmatpush1.bf16.msra.mxu1 %v2978_v1  ;;  %2862 = vmatpush3.bf16.msra.mxu0 %v2988_v33  ;;  %v1169_v32 = vadd.f32 %v2817_v6, %v3706_v42 }
 0x301   :  { %v1160_v10 = vpop.f32.mrf.mxu1  ;;  %1783 = vmatprep.subr.bf16.mxu1 %v2983_v4  ;;  %2863 = vmatprep.subr.bf16.mxu0 %v2992_v50 }
 0x302   :  { %1435 = vmatmul.mubr.bf16.gmra.mxu0 %v1208_v62  ;;  %v1161_v29 = vadd.f32 %v3706_v42, %v1160_v10 }
 0x303   :  { %v2818_v16 = vpop.f32.mrf.mxu1  ;;  %1444 = vmatprep.mubr.bf16.mxu0 %v3167_v0 }
 0x304   :  { %1784 = vmatpush1.bf16.msra.mxu1 %v2981_v55  ;;  %2864 = vmatpush3.bf16.msra.mxu0 %v2992_v50  ;;  %v1172_v18 = vadd.f32 %v2818_v16, %v3706_v42 }
 0x305   :  { %v1163_v22 = vpop.f32.mrf.mxu1  ;;  %1785 = vmatprep.subr.bf16.mxu1 %v2987_v61  ;;  %2865 = vmatprep.subr.bf16.mxu0 %v2996_v13 }
 0x306   :  { %v1164_v30 = vadd.f32 %v3706_v42, %v1163_v22  ;;  %v1210_v34 = vpack.c.bf16 %v1172_v18, %v1169_v32 }
 0x308   :  { %v1209_v5 = vpack.c.bf16 %v1164_v30, %v1161_v29  ;;  %1786 = vmatpush1.bf16.msra.mxu1 %v2985_v11  ;;  %2866 = vmatpush3.bf16.msra.mxu0 %v2996_v13 }
 0x309   :  { %1787 = vmatprep.subr.bf16.mxu1 %v2991_v23  ;;  %2867 = vmatprep.subr.bf16.mxu0 %v3000_v25 }
 0x30a   :  { %1445 = vmatmul.mubr.bf16.gmra.mxu0 %v1209_v5  ;;  %2847 = vmatprep.mubr.bf16.mxu1 %v1209_v5 }
 0x30b   :  { %2848 = vmatmul.mubr.bf16.gmra.mxu1 %v1210_v34  ;;  %1454 = vmatprep.mubr.bf16.mxu0 %v3167_v0 }
 0x30c   :  { %1788 = vmatpush1.bf16.msra.mxu1 %v2989_v17  ;;  %2868 = vmatpush3.bf16.msra.mxu0 %v3000_v25 }
 0x30d   :  { %1789 = vmatprep.subr.bf16.mxu1 %v2995_v35  ;;  %2869 = vmatprep.subr.bf16.mxu0 %v3004_v36 }
 0x30f   :  { %v2821_v39 = vpop.f32.mrf.mxu1 }
 0x310   :  { %1790 = vmatpush1.bf16.msra.mxu1 %v2993_v41  ;;  %2870 = vmatpush3.bf16.msra.mxu0 %v3004_v36  ;;  %v1185_v33 = vadd.f32 %v2821_v39, %v3706_v42 }
 0x311   :  { %v1176_v44 = vpop.f32.mrf.mxu1  ;;  %1791 = vmatprep.subr.bf16.mxu1 %v2999_v37  ;;  %2871 = vmatprep.subr.bf16.mxu0 %v3005_v38 }
 0x312   :  { %1455 = vmatmul.mubr.bf16.gmra.mxu0 %v1210_v34  ;;  %v1177_v62 = vadd.f32 %v3706_v42, %v1176_v44 }
 0x313   :  { %v2822_v47 = vpop.f32.mrf.mxu1  ;;  %1464 = vmatprep.mubr.bf16.mxu0 %v3167_v0 }
 0x314   :  { %1792 = vmatpush1.bf16.msra.mxu1 %v2997_v40  ;;  %2872 = vmatpush3.bf16.msra.mxu0 %v3005_v38  ;;  %v1188_v56 = vadd.f32 %v2822_v47, %v3706_v42 }
 0x315   :  { %v1179_v57 = vpop.f32.mrf.mxu1  ;;  %1793 = vmatprep.subr.bf16.mxu1 %v3003_v45  ;;  %2873 = vmatprep.subr.bf16.mxu0 %v3006_v46 }
 0x316   :  { %v1180_v28 = vadd.f32 %v3706_v42, %v1179_v57  ;;  %v1212_v4 = vpack.c.bf16 %v1188_v56, %v1185_v33  ;;  %v3880_v56 = vshrl.u32 %v42_v43, 7 }
 0x318   :  { %v1211_v1 = vpack.c.bf16 %v1180_v28, %v1177_v62  ;;  %1794 = vmatpush1.bf16.msra.mxu1 %v3001_v52  ;;  %2874 = vmatpush3.bf16.msra.mxu0 %v3006_v46  ;;  %v4284_v33 = vsub.s32 2, %v3880_v56 }
 0x31a   :  { %1465 = vmatmul.mubr.bf16.gmra.mxu0 %v1211_v1  ;;  %2851 = vmatprep.mubr.bf16.mxu1 %v1211_v1 }
 0x31b   :  { %2852 = vmatmul.mubr.bf16.gmra.mxu1 %v1212_v4  ;;  %1474 = vmatprep.mubr.bf16.mxu0 %v3167_v0 }
 0x31f   :  { %v2825_v50 = vpop.f32.mrf.mxu1 }
 0x320   :  { %v1201_v11 = vadd.f32 %v2825_v50, %v3706_v42 }
 0x321   :  { %v1192_v6 = vpop.f32.mrf.mxu1 }
 0x322   :  { %1475 = vmatmul.mubr.bf16.gmra.mxu0 %v1212_v4  ;;  %v1193_v13 = vadd.f32 %v3706_v42, %v1192_v6  ;;  %v1247_v4 = vld [vmem:[%s4281_s9] sm:$0x7] }
 0x323   :  { %v2826_v55 = vpop.f32.mrf.mxu1  ;;  %1484 = vmatprep.mubr.bf16.mxu0 %v3167_v0  ;;  %v3900_v43 = vrot.slane %v1247_v4, %v4284_v33 }
 0x324   :  { %v1204_v10 = vadd.f32 %v2826_v55, %v3706_v42 }
 0x325   :  { %v1195_v61 = vpop.f32.mrf.mxu1 }
 0x326   :  { %v1196_v16 = vadd.f32 %v3706_v42, %v1195_v61  ;;  %v1214_v22 = vpack.c.bf16 %v1204_v10, %v1201_v11  ;;  %v1251_v61 = vsub.s32 0, %v3880_v56 }
 0x328   :  { %v1213_v18 = vpack.c.bf16 %v1196_v16, %v1193_v13  ;;  %v3920_v20 = vrot.slane %v1247_v4, %v1251_v61 }
 0x32a   :  { %1485 = vmatmul.mubr.bf16.gmra.mxu0 %v1213_v18  ;;  %2855 = vmatprep.mubr.bf16.mxu1 %v1213_v18  ;;  %v3915_v18 = vld [vmem:[%s4282_s11] sm:$0x7] }
 0x32b   :  { %2856 = vmatmul.mubr.bf16.gmra.mxu1 %v1214_v22  ;;  %1494 = vmatprep.mubr.bf16.mxu0 %v3167_v0  ;;  %v3928_v21 = vrot.slane %v3915_v18, %v1251_v61 }
 0x32c   :  { %1811 = vmatprep.mubr.bf16.mxu1 %v3167_v0 }
 0x332   :  { %1495 = vmatmul.mubr.bf16.gmra.mxu0 %v1214_v22  ;;  %v1255_v22 = vsub.s32 1, %v3880_v56 }
 0x333   :  { %1812 = vmatmul.mubr.bf16.vlgmr.msra.gmra.mxu1 %v3519_v54  ;;  %2875 = vmatprep.mubr.bf16.mxu0 %v3519_v54 }
 0x334   :  { %1821 = vmatprep.mubr.bf16.mxu1 %v3167_v0  ;;  %v3935_v8 = vrot.slane %v3915_v18, %v1255_v22 }
 0x33a   :  { %2876 = vmatmul.mubr.bf16.vlgmr.msra.gmra.mxu0 %v3524_v58 }
 0x33b   :  { %1822 = vmatmul.mubr.bf16.gmra.mxu1 %v3524_v58  ;;  %2879 = vmatprep.mubr.bf16.mxu0 %v3537_v3 }
 0x33c   :  { %1831 = vmatprep.mubr.bf16.mxu1 %v3167_v0 }
 0x342   :  { %2880 = vmatmul.mubr.bf16.gmra.mxu0 %v3542_v7 }
 0x343   :  { %1832 = vmatmul.mubr.bf16.gmra.mxu1 %v3537_v3  ;;  %2883 = vmatprep.mubr.bf16.mxu0 %v3555_v15 }
 0x344   :  { %1841 = vmatprep.mubr.bf16.mxu1 %v3167_v0 }
 0x34a   :  { %2884 = vmatmul.mubr.bf16.gmra.mxu0 %v3560_v19 }
 0x34b   :  { %1842 = vmatmul.mubr.bf16.gmra.mxu1 %v3542_v7  ;;  %2887 = vmatprep.mubr.bf16.mxu0 %v3573_v27 }
 0x34c   :  { %1851 = vmatprep.mubr.bf16.mxu1 %v3167_v0 }
 0x352   :  { %2888 = vmatmul.mubr.bf16.gmra.mxu0 %v3578_v31 }
 0x353   :  { %1852 = vmatmul.mubr.bf16.gmra.mxu1 %v3555_v15 }
 0x354   :  { %1861 = vmatprep.mubr.bf16.mxu1 %v3167_v0 }
 0x35b   :  { %1862 = vmatmul.mubr.bf16.gmra.mxu1 %v3560_v19 }
 0x35c   :  { %1871 = vmatprep.mubr.bf16.mxu1 %v3167_v0 }
 0x363   :  { %1872 = vmatmul.mubr.bf16.gmra.mxu1 %v3573_v27 }
 0x364   :  { %1881 = vmatprep.mubr.bf16.mxu1 %v3167_v0 }
 0x36b   :  { %1882 = vmatmul.mubr.bf16.gmra.mxu1 %v3578_v31 }
 0x3ba   :  { %v1426_v54 = vpop.f32.mrf.mxu0 }
 0x3bb   :  { %v3827_v15 = vpop.f32.mrf.mxu1 }
 0x3bc   :  { %v3821_v58 = vpop.f32.mrf.mxu0 }
 0x3bd   :  { %v3833_v23 = vpop.f32.mrf.mxu1 }
 0x3be   :  { %v3823_v3 = vpop.f32.mrf.mxu0 }
 0x3bf   :  { %v3839_v31 = vpop.f32.mrf.mxu1 }
 0x3c0   :  { %v3825_v7 = vpop.f32.mrf.mxu0 }
 0x3c1   :  { %v3845_v30 = vpop.f32.mrf.mxu1 }
 0x3c2   :  { %v3829_v42 = vpop.f32.mrf.mxu0 }
 0x3c4   :  { %v3831_v19 = vpop.f32.mrf.mxu0 }
 0x3c6   :  { %v3835_v27 = vpop.f32.mrf.mxu0 }
 0x3c8   :  { %v3837_v0 = vpop.f32.mrf.mxu0 }
 0x3ca   :  { %v3841_v25 = vpop.f32.mrf.mxu0 }
 0x3cb   :  { %v3849_v5 = vpop.f32.mrf.mxu1 }
 0x3cc   :  { %v3843_v29 = vpop.f32.mrf.mxu0 }
 0x3cd   :  { %v3855_v35 = vpop.f32.mrf.mxu1 }
 0x3ce   :  { %v3847_v32 = vpop.f32.mrf.mxu0 }
 0x3cf   :  { %v3861_v37 = vpop.f32.mrf.mxu1 }
 0x3d0   :  { %v3851_v17 = vpop.f32.mrf.mxu0 }
 0x3d1   :  { %v3867_v40 = vpop.f32.mrf.mxu1 }
 0x3d2   :  { %v3853_v34 = vpop.f32.mrf.mxu0 }
 0x3d4   :  { %v3857_v36 = vpop.f32.mrf.mxu0 }
 0x3d6   :  { %v3859_v41 = vpop.f32.mrf.mxu0 }
 0x3d8   :  { %v3863_v38 = vpop.f32.mrf.mxu0 }
 0x3da   :  { %v3865_v39 = vpop.f32.mrf.mxu0 }
 0x3db   :  { %v3871_v45 = vpop.f32.mrf.mxu1 }
 0x3dc   :  { %v3869_v44 = vpop.f32.mrf.mxu0  ;;  %4307 = vst [vmem:[#allocation13_spill] sm:$0xff] %v3871_v45 }
 0x3dd   :  { %v3877_v52 = vpop.f32.mrf.mxu1 }
 0x3de   :  { %v3873_v46 = vpop.f32.mrf.mxu0 }
 0x3df   :  { %v3886_v28 = vpop.f32.mrf.mxu1 }
 0x3e0   :  { %v3875_v47 = vpop.f32.mrf.mxu0  ;;  %4308 = vst [vmem:[#allocation14_spill] sm:$0xff] %v3886_v28 }
 0x3e1   :  { %v3896_v6 = vpop.f32.mrf.mxu1 }
 0x3e2   :  { %v3882_v57 = vpop.f32.mrf.mxu0  ;;  %4309 = vst [vmem:[#allocation15_spill] sm:$0xff] %v3896_v6 }
 0x3e4   :  { %v3884_v62 = vpop.f32.mrf.mxu0 }
 0x3e6   :  { %v3889_v1 = vpop.f32.mrf.mxu0 }
 0x3e8   :  { %v3894_v50 = vpop.f32.mrf.mxu0 }
 0x3ea   :  { %v3902_v55 = vpop.f32.mrf.mxu0 }
 0x3eb   :  { %v2857_v10 = vpop.f32.mrf.mxu1 }
 0x3ec   :  { %v3906_v13 = vadd.f32 %v2857_v10, %v3900_v43  ;;  %v3908_v16 = vpop.f32.mrf.mxu0 }
 0x3ed   :  { %v3910_v11 = vpop.f32.mrf.mxu1 }
 0x3ee   :  { %4310 = vst [vmem:[#allocation16_spill] sm:$0xff] %v3906_v13  ;;  %4311 = vst [vmem:[#allocation17_spill] sm:$0xff] %v3910_v11  ;;  %v3918_v33 = vpop.f32.mrf.mxu0  ;;  %v3932_v13 = vrot.slane %v1247_v4, %v1255_v22  ;;  %v1427_v11 = vadd.f32 %v1426_v54, %v3920_v20  ;;  %v1431_v4 = vadd.f32 %v3823_v3, %v3920_v20 }
 0x3ef   :  { %v2858_v24 = vpop.f32.mrf.mxu1 }
 0x3f0   :  { %v3923_v26 = vadd.f32 %v2858_v24, %v3900_v43  ;;  %v3925_v10 = vpop.f32.mrf.mxu0  ;;  %v1429_v28 = vadd.f32 %v3821_v58, %v3932_v13 }
 0x3f1   :  { %v3930_v12 = vpop.f32.mrf.mxu1 }
 0x3f2   :  { %4312 = vst [vmem:[#allocation18_spill] sm:$0xff] %v3923_v26  ;;  %4313 = vst [vmem:[#allocation19_spill] sm:$0xff] %v3930_v12  ;;  %v3938_v9 = vpop.f32.mrf.mxu0 }
 0x3f3   :  { %v1813_v14 = vpop.f32.mrf.mxu1 }
 0x3f4   :  { %v1814_v24 = vadd.f32 %v1813_v14, %v3928_v21  ;;  %v3946_v63 = vpop.f32.mrf.mxu0  ;;  %v1433_v14 = vadd.f32 %v3825_v7, %v3932_v13  ;;  %v1439_v7 = vadd.f32 %v3831_v19, %v3932_v13  ;;  %v1443_v19 = vadd.f32 %v3837_v0, %v3932_v13 }
 0x3f5   :  { %v1815_v26 = vpop.f32.mrf.mxu1 }
 0x3f6   :  { %v1989_v61 = vadd.f32 %v1814_v24, %v1427_v11  ;;  %v1816_v45 = vadd.f32 %v1815_v26, %v3935_v8  ;;  %v1437_v26 = vadd.f32 %v3829_v42, %v3920_v20  ;;  %v3954_v3 = vpop.f32.mrf.mxu0  ;;  %v1441_v42 = vadd.f32 %v3835_v27, %v3920_v20 }
 0x3f7   :  { %v1817_v12 = vpop.f32.mrf.mxu1  ;;  %v1447_v27 = vadd.f32 %v3841_v25, %v3920_v20  ;;  %v3978_v25 = vadd.f32 %v3827_v15, %v3900_v43  ;;  %v3993_v15 = vadd.f32 %v3839_v31, %v3900_v43  ;;  %v1457_v31 = vadd.f32 %v3853_v34, %v3920_v20 }
 0x3f8   :  { %v2507_v22 = vmul.f32 -1.442695, %v1989_v61  ;;  %v2101_v6 = vadd.f32 %v1816_v45, %v1429_v28  ;;  %v1818_v54 = vadd.f32 %v1817_v12, %v3928_v21 }
 0x3f9   :  { %v1819_v59 = vpop.f32.mrf.mxu1 }
 0x3fa   :  { %3007 = vpow2.f32 %v2507_v22  ;;  %v2523_v2 = vmul.f32 -1.442695, %v2101_v6  ;;  %v1990_v58 = vadd.f32 %v1818_v54, %v1431_v4  ;;  %v1820_v11 = vadd.f32 %v1819_v59, %v3935_v8 }
 0x3fb   :  { %v1823_v24 = vpop.f32.mrf.mxu1 }
 0x3fc   :  { %3009 = vpow2.f32 %v2523_v2  ;;  %v2508_v61 = vmul.f32 -1.442695, %v1990_v58  ;;  %v2102_v45 = vadd.f32 %v1820_v11, %v1433_v14  ;;  %v1824_v12 = vadd.f32 %v1823_v24, %v3928_v21  ;;  %v3962_v2 = vpop.f32.mrf.mxu0 }
 0x3fd   :  { %v1825_v28 = vpop.f32.mrf.mxu1 }
 0x3fe   :  { %3011 = vpow2.f32 %v2508_v61  ;;  %v2524_v6 = vmul.f32 -1.442695, %v2102_v45  ;;  %v1991_v4 = vadd.f32 %v1824_v12, %v1437_v26  ;;  %v1826_v59 = vadd.f32 %v1825_v28, %v3935_v8  ;;  %v3970_v12 = vpop.f32.mrf.mxu0 }
 0x3ff   :  { %v1827_v22 = vpop.f32.mrf.mxu1 }
 0x400   :  { %3013 = vpow2.f32 %v2524_v6  ;;  %v2509_v54 = vmul.f32 -1.442695, %v1991_v4  ;;  %v2103_v14 = vadd.f32 %v1826_v59, %v1439_v7  ;;  %v1828_v58 = vadd.f32 %v1827_v22, %v3928_v21 }
 0x401   :  { %v1829_v11 = vpop.f32.mrf.mxu1  ;;  %v1449_v4 = vadd.f32 %v3843_v29, %v3932_v13 }
 0x402   :  { %3015 = vpow2.f32 %v2509_v54  ;;  %v2525_v24 = vmul.f32 -1.442695, %v2103_v14  ;;  %v1992_v26 = vadd.f32 %v1828_v58, %v1441_v42  ;;  %v1830_v61 = vadd.f32 %v1829_v11, %v3935_v8 }
 0x403   :  { %v1833_v45 = vpop.f32.mrf.mxu1  ;;  %v3982_v14 = vadd.f32 %v3833_v23, %v3900_v43  ;;  %v4314_v58 = vsub.s32 2, %v3880_v56  ;;  %v1451_v23 = vadd.f32 %v3847_v32, %v3920_v20  ;;  %v1453_v56 = vadd.f32 %v3851_v17, %v3932_v13 }
 0x404   :  { %v2510_v28 = vmul.f32 -1.442695, %v1992_v26  ;;  %v2104_v6 = vadd.f32 %v1830_v61, %v1443_v19  ;;  %v1834_v7 = vadd.f32 %v1833_v45, %v3928_v21  ;;  %3017 = vpow2.f32 %v2525_v24  ;;  %v3989_v24 = vpop.f32.mrf.mxu0 }
 0x405   :  { %v1835_v0 = vpop.f32.mrf.mxu1  ;;  %v3987_v29 = vrot.slane %v3915_v18, %v4314_v58 }
 0x406   :  { %3019 = vpow2.f32 %v2510_v28  ;;  %v2526_v59 = vmul.f32 -1.442695, %v2104_v6  ;;  %v1993_v42 = vadd.f32 %v1834_v7, %v1447_v27  ;;  %v1836_v22 = vadd.f32 %v1835_v0, %v3935_v8 }
 0x407   :  { %v3008_v54 = vpop.eup %3007  ;;  %v1837_v19 = vpop.f32.mrf.mxu1  ;;  %v4003_v0 = vadd.f32 %v3845_v30, %v3900_v43  ;;  %v4016_v30 = vadd.f32 %v3855_v35, %v3900_v43 }
 0x408   :  { %v2053_v11 = vadd.f32 1.0, %v3008_v54  ;;  %3021 = vpow2.f32 %v2526_v59  ;;  %v2511_v26 = vmul.f32 -1.442695, %v1993_v42  ;;  %v2105_v61 = vadd.f32 %v1836_v22, %v1449_v4  ;;  %v4007_v42 = vpop.f32.mrf.mxu0 }
 0x409   :  { %v3010_v45 = vpop.eup %3009  ;;  %v1838_v18 = vadd.f32 %v1837_v19, %v3928_v21  ;;  %v1839_v27 = vpop.f32.mrf.mxu1  ;;  %v4012_v19 = vadd.f32 %v3849_v5, %v3900_v43  ;;  %v1461_v5 = vadd.f32 %v3859_v41, %v3920_v20 }
 0x40a   :  { %3023 = vrcp.f32 %v2053_v11  ;;  %v2165_v28 = vadd.f32 1.0, %v3010_v45  ;;  %v2527_v6 = vmul.f32 -1.442695, %v2105_v61  ;;  %v1840_v7 = vadd.f32 %v1839_v27, %v3935_v8 }
 0x40b   :  { %v3012_v4 = vpop.eup %3011  ;;  %3025 = vpow2.f32 %v2511_v26  ;;  %v1994_v32 = vadd.f32 %v1838_v18, %v1451_v23  ;;  %v1843_v59 = vpop.f32.mrf.mxu1  ;;  %v4020_v26 = vadd.f32 %v3861_v37, %v3900_v43 }
 0x40c   :  { %3027 = vrcp.f32 %v2165_v28  ;;  %v2054_v17 = vadd.f32 1.0, %v3012_v4  ;;  %v2106_v22 = vadd.f32 %v1840_v7, %v1453_v56  ;;  %v1844_v54 = vadd.f32 %v1843_v59, %v3928_v21  ;;  %v1929_v28 = vpop.f32.mrf.mxu0 }
 0x40d   :  { %v3014_v58 = vpop.eup %3013  ;;  %3029 = vpow2.f32 %v2527_v6  ;;  %v2512_v34 = vmul.f32 -1.442695, %v1994_v32  ;;  %v1845_v11 = vpop.f32.mrf.mxu1  ;;  %v1459_v56 = vadd.f32 %v3857_v36, %v3932_v13  ;;  %v4030_v4 = vadd.f32 %v3867_v40, %v3900_v43 }
 0x40e   :  { %3031 = vrcp.f32 %v2054_v17  ;;  %v2166_v61 = vadd.f32 1.0, %v3014_v58  ;;  %v1995_v45 = vadd.f32 %v1844_v54, %v1457_v31  ;;  %v1846_v35 = vadd.f32 %v1845_v11, %v3935_v8 }
 0x40f   :  { %v3016_v23 = vpop.eup %3015  ;;  %3033 = vpow2.f32 %v2512_v34  ;;  %v1847_v18 = vpop.f32.mrf.mxu1  ;;  %v2528_v6 = vmul.f32 -1.442695, %v2106_v22  ;;  %v1463_v36 = vadd.f32 %v3863_v38, %v3932_v13  ;;  %v1467_v59 = vadd.f32 %v3865_v39, %v3920_v20 }
 0x410   :  { %v2055_v27 = vadd.f32 1.0, %v3016_v23  ;;  %v2513_v7 = vmul.f32 -1.442695, %v1995_v45  ;;  %v1848_v37 = vadd.f32 %v1847_v18, %v3928_v21  ;;  %3035 = vrcp.f32 %v2166_v61  ;;  %v4047_v61 = vpop.f32.mrf.mxu0 }
 0x411   :  { %v2107_v31 = vadd.f32 %v1846_v35, %v1459_v56  ;;  %v1849_v41 = vpop.f32.mrf.mxu1  ;;  %v3018_v32 = vpop.eup %3017  ;;  %v1469_v58 = vadd.f32 %v3869_v44, %v3932_v13  ;;  %v4041_v40 = vadd.f32 %v3873_v46, %v3920_v20  ;;  %v4045_v11 = vadd.f32 %v3875_v47, %v3932_v13 }
 0x412   :  { %3037 = vrcp.f32 %v2055_v27  ;;  %v1996_v17 = vadd.f32 %v1848_v37, %v1461_v5  ;;  %v1850_v22 = vadd.f32 %v1849_v41, %v3935_v8  ;;  %v2167_v56 = vadd.f32 1.0, %v3018_v32  ;;  %v1942_v32 = vpop.f32.mrf.mxu0 }
 0x413   :  { %v3020_v54 = vpop.eup %3019  ;;  %3039 = vpow2.f32 %v2513_v7  ;;  %v2529_v38 = vmul.f32 -1.442695, %v2107_v31  ;;  %v1853_v34 = vpop.f32.mrf.mxu1  ;;  %v4052_v35 = vadd.f32 %v3882_v57, %v3920_v20  ;;  %v1927_v47 = vadd.f32 %v3989_v24, %v3987_v29 }
 0x414   :  { %v2056_v39 = vadd.f32 1.0, %v3020_v54  ;;  %3041 = vpow2.f32 %v2528_v6  ;;  %v2514_v45 = vmul.f32 -1.442695, %v1996_v17  ;;  %v2108_v44 = vadd.f32 %v1850_v22, %v1463_v36 }
 0x415   :  { %v3022_v23 = vpop.eup %3021  ;;  %3043 = vpow2.f32 %v2529_v38  ;;  %v1854_v5 = vadd.f32 %v1853_v34, %v3928_v21  ;;  %v1855_v46 = vpop.f32.mrf.mxu1  ;;  %v4058_v6 = vadd.f32 %v3884_v62, %v3932_v13  ;;  %v4062_v7 = vadd.f32 %v3889_v1, %v3920_v20 }
 0x416   :  { %3045 = vrcp.f32 %v2056_v39  ;;  %v2168_v18 = vadd.f32 1.0, %v3022_v23  ;;  %v4066_v57 = vadd.f32 %v3894_v50, %v3932_v13  ;;  %v4070_v24 = vadd.f32 %v3902_v55, %v3920_v20 }
 0x417   :  { %v3024_v27 = vpop.eup %3023  ;;  %3047 = vpow2.f32 %v2514_v45  ;;  %v1997_v37 = vadd.f32 %v1854_v5, %v1467_v59  ;;  %v1857_v36 = vpop.f32.mrf.mxu1  ;;  %v1930_v62 = vadd.f32 %v1929_v28, %v3987_v29  ;;  %v2530_v22 = vmul.f32 -1.442695, %v2108_v44 }
 0x418   :  { %v3026_v31 = vpop.eup %3025  ;;  %v2213_v41 = vmul.f32 %v3024_v27, %v1927_v47  ;;  %3049 = vrcp.f32 %v2167_v56  ;;  %v1856_v59 = vadd.f32 %v1855_v46, %v3935_v8  ;;  %v1858_v55 = vadd.f32 %v1857_v36, %v3928_v21  ;;  %v2882_v46 = vpop.f32.mrf.mxu0 }
 0x419   :  { %v4073_v17 = vpop.eup %3027  ;;  %v2057_v1 = vadd.f32 1.0, %v3026_v31  ;;  %v1859_v54 = vpop.f32.mrf.mxu1  ;;  %3051 = vrcp.f32 %v2168_v18  ;;  %v2515_v34 = vmul.f32 -1.442695, %v1997_v37  ;;  %v4080_v28 = vadd.f32 %v3908_v16, %v3932_v13 }
 0x41a   :  { %v3030_v38 = vpop.eup %3029  ;;  %v2229_v50 = vadd.f32 %v2213_v41, %v3982_v14  ;;  %v4084_v45 = vadd.f32 %v3918_v33, %v3920_v20  ;;  %v4088_v23 = vadd.f32 %v3925_v10, %v3932_v13  ;;  %v4092_v44 = vadd.f32 %v3938_v9, %v3920_v20 }
 0x41b   :  { %v3032_v39 = vpop.eup %3031  ;;  %3053 = vrcp.f32 %v2057_v1  ;;  %v1863_v56 = vpop.f32.mrf.mxu1  ;;  %v4096_v5 = vadd.f32 %v3946_v63, %v3932_v13  ;;  %v1935_v33 = vadd.f32 %v3970_v12, %v3987_v29  ;;  %v2109_v10 = vadd.f32 %v1856_v59, %v1469_v58 }
 0x41c   :  { %v3034_v14 = vpop.eup %3033  ;;  %3055 = vtanh.f32 %v2229_v50  ;;  %v2214_v16 = vmul.f32 %v3032_v39, %v1930_v62  ;;  %v2169_v9 = vadd.f32 1.0, %v3030_v38  ;;  %v1998_v36 = vadd.f32 %v1858_v55, %v4041_v40  ;;  %v1945_v40 = vpop.f32.mrf.mxu0 }
 0x41d   :  { %v2058_v47 = vadd.f32 1.0, %v3034_v14  ;;  %3057 = vpow2.f32 %v2530_v22  ;;  %v1865_v18 = vpop.f32.mrf.mxu1  ;;  %v4100_v27 = vpop.eup %3035  ;;  %v4106_v31 = vadd.f32 %v3954_v3, %v3920_v20  ;;  %v1938_v12 = vadd.f32 %v4007_v42, %v3987_v29 }
 0x41e   :  { %v2230_v37 = vadd.f32 %v2214_v16, %v4003_v0  ;;  %3059 = vpow2.f32 %v2515_v34  ;;  %v1864_v58 = vadd.f32 %v1863_v56, %v3928_v21  ;;  %v4113_v0 = vadd.f32 %v4047_v61, %v3987_v29 }
 0x41f   :  { %v3038_v63 = vpop.eup %3037  ;;  %3061 = vrcp.f32 %v2058_v47  ;;  %v1867_v41 = vpop.f32.mrf.mxu1  ;;  %v1860_v22 = vadd.f32 %v1859_v54, %v3935_v8  ;;  %v1943_v20 = vadd.f32 %v1942_v32, %v3987_v29  ;;  %v4118_v3 = vadd.f32 %v2882_v46, %v3987_v29 }
 0x420   :  { %v3040_v62 = vpop.eup %3039  ;;  %v2215_v1 = vmul.f32 %v3038_v63, %v1935_v33  ;;  %3063 = vtanh.f32 %v2230_v37  ;;  %v2531_v38 = vmul.f32 -1.442695, %v2109_v10  ;;  %v2516_v39 = vmul.f32 -1.442695, %v1998_v36 }
 0x421   :  { %v3042_v59 = vpop.eup %3041  ;;  %v2059_v42 = vadd.f32 1.0, %v3040_v62  ;;  %v1869_v50 = vpop.f32.mrf.mxu1  ;;  %3065 = vrcp.f32 %v2169_v9  ;;  %v1868_v61 = vadd.f32 %v1867_v41, %v3928_v21  ;;  %v2293_v54 = vmul.f32 %v4073_v17, %v3511_v49 }
 0x422   :  { %v3044_v34 = vpop.eup %3043  ;;  %v2231_v55 = vadd.f32 %v2215_v1, %v3978_v25  ;;  %v1946_v14 = vadd.f32 %v1945_v40, %v3987_v29  ;;  %v1999_v32 = vadd.f32 %v1864_v58, %v4052_v35  ;;  %v2110_v47 = vadd.f32 %v1860_v22, %v4045_v11 }
 0x423   :  { %v3046_v56 = vpop.eup %3045  ;;  %3067 = vrcp.f32 %v2059_v42  ;;  %v1873_v16 = vpop.f32.mrf.mxu1  ;;  %v1866_v25 = vadd.f32 %v1865_v18, %v3935_v8  ;;  %v2261_v10 = vsub.f32 1.0, %v4073_v17  ;;  %v2170_v37 = vadd.f32 1.0, %v3042_v59 }
 0x424   :  { %v3048_v46 = vpop.eup %3047  ;;  %3069 = vtanh.f32 %v2231_v55  ;;  %v2216_v33 = vmul.f32 %v3046_v56, %v1938_v12  ;;  %v2171_v41 = vadd.f32 1.0, %v3044_v34  ;;  %v2000_v35 = vadd.f32 %v1868_v61, %v4062_v7 }
 0x425   :  { %v2060_v9 = vadd.f32 1.0, %v3048_v46  ;;  %3071 = vpow2.f32 %v2531_v38  ;;  %v1875_v36 = vpop.f32.mrf.mxu1  ;;  %v4129_v49 = vpop.eup %3049  ;;  %v2294_v11 = vmul.f32 %v4100_v27, %v3515_v53  ;;  %v2517_v18 = vmul.f32 -1.442695, %v1999_v32 }
 0x426   :  { %v2232_v63 = vadd.f32 %v2216_v33, %v3993_v15  ;;  %3073 = vpow2.f32 %v2516_v39  ;;  %v4133_v58 = vpop.eup %3051  ;;  %v1874_v17 = vadd.f32 %v1873_v16, %v3928_v21  ;;  %v2262_v1 = vsub.f32 1.0, %v4100_v27 }
 0x427   :  { %3075 = vrcp.f32 %v2060_v9  ;;  %v1877_v12 = vpop.f32.mrf.mxu1  ;;  %v2532_v40 = vmul.f32 -1.442695, %v2110_v47  ;;  %v2111_v15 = vadd.f32 %v1866_v25, %v4058_v6  ;;  %v2263_v7 = vsub.f32 1.0, %v4129_v49 }
 0x428   :  { %v3054_v62 = vpop.eup %3053  ;;  %3077 = vtanh.f32 %v2232_v63  ;;  %v1870_v42 = vadd.f32 %v1869_v50, %v3935_v8  ;;  %v2295_v55 = vmul.f32 %v4129_v49, %v3509_v48  ;;  %v2518_v39 = vmul.f32 -1.442695, %v2000_v35 }
 0x429   :  { %v3056_v22 = vpop.eup %3055  ;;  %v2217_v59 = vmul.f32 %v3054_v62, %v1943_v20  ;;  %3079 = vrcp.f32 %v2170_v37  ;;  %v1879_v53 = vpop.f32.mrf.mxu1  ;;  %v2001_v6 = vadd.f32 %v1874_v17, %v4070_v24  ;;  %v1878_v56 = vadd.f32 %v1877_v12, %v3928_v21 }
 0x42a   :  { %v3058_v38 = vpop.eup %3057  ;;  %v2277_v34 = vmul.f32 %v3056_v22, %v2261_v10  ;;  %3081 = vrcp.f32 %v2171_v41  ;;  %v2264_v50 = vsub.f32 1.0, %v4133_v58  ;;  %v2533_v33 = vmul.f32 -1.442695, %v2111_v15 }
 0x42b   :  { %v3060_v61 = vpop.eup %3059  ;;  %v2233_v27 = vadd.f32 %v2217_v59, %v4016_v30  ;;  %3083 = vpow2.f32 %v2517_v18  ;;  %v1883_v20 = vpop.f32.mrf.mxu1  ;;  %v2172_v25 = vadd.f32 1.0, %v3058_v38  ;;  %v2112_v10 = vadd.f32 %v1870_v42, %v4066_v57 }
 0x42c   :  { %v3062_v32 = vpop.eup %3061  ;;  %v2309_v16 = vadd.f32 %v2293_v54, %v2277_v34  ;;  %v2061_v46 = vadd.f32 1.0, %v3060_v61  ;;  %v1884_v24 = vadd.f32 %v1883_v20, %v3928_v21  ;;  %v2002_v63 = vadd.f32 %v1878_v56, %v4084_v45 }
 0x42d   :  { %v3064_v47 = vpop.eup %3063  ;;  %3085 = vtanh.f32 %v2233_v27  ;;  %v2218_v48 = vmul.f32 %v3062_v32, %v1946_v14  ;;  %v1885_v37 = vpop.f32.mrf.mxu1  ;;  %v2519_v14 = vmul.f32 -1.442695, %v2001_v6  ;;  %v2296_v18 = vmul.f32 %v4133_v58, %v3513_v51 }
 0x42e   :  { %2325 = vst [vmem:[%s4283_s12] sm:$0xff] %v2309_v16  ;;  %v2278_v30 = vmul.f32 %v3064_v47, %v2262_v1  ;;  %3087 = vrcp.f32 %v2061_v46  ;;  %v1886_v54 = vadd.f32 %v1885_v37, %v3935_v8  ;;  %v4154_v9 = vpop.eup %3065  ;;  %v1876_v17 = vadd.f32 %v1875_v36, %v3935_v8 }
 0x42f   :  { %v2234_v49 = vadd.f32 %v2218_v48, %v4030_v4  ;;  %3089 = vpow2.f32 %v2518_v39  ;;  %v1887_v57 = vpop.f32.mrf.mxu1  ;;  %v2003_v1 = vadd.f32 %v1884_v24, %v4092_v44  ;;  %v1880_v51 = vadd.f32 %v1879_v53, %v3935_v8 }
 0x430   :  { %v3068_v41 = vpop.eup %3067  ;;  %v2310_v35 = vadd.f32 %v2294_v11, %v2278_v30  ;;  %3091 = vpow2.f32 %v2532_v40  ;;  %v4164_v4 = vadd.f32 %v1886_v54, %v4096_v5  ;;  %v1888_v36 = vadd.f32 %v1887_v57, %v3928_v21  ;;  %v4171_v11 = vpop.f32.mrf.mxu0 }
 0x431   :  { %v3070_v12 = vpop.eup %3069  ;;  %3093 = vtanh.f32 %v2234_v49  ;;  %v2219_v62 = vmul.f32 %v3068_v41, %v4113_v0  ;;  %v2534_v44 = vmul.f32 -1.442695, %v2112_v10  ;;  %v2520_v5 = vmul.f32 -1.442695, %v2002_v63  ;;  %v1889_v40 = vpop.f32.mrf.mxu1 }
 0x432   :  { %v3072_v15 = vpop.eup %3071  ;;  %v2279_v45 = vmul.f32 %v3070_v12, %v2263_v7  ;;  %2326 = vst [vmem:[%s4283_s12 + $0x8] sm:$0xff] %v2310_v35  ;;  %3095 = vrcp.f32 %v2172_v25  ;;  %v2113_v42 = vadd.f32 %v1876_v17, %v4080_v28  ;;  %v2004_v34 = vadd.f32 %v1888_v36, %v4106_v31  ;;  %v1958_v6 = vpop.f32.mrf.mxu0 }
 0x433   :  { %v3074_v58 = vpop.eup %3073  ;;  %v2235_v0 = vadd.f32 %v2219_v62, %v4012_v19  ;;  %3097 = vpow2.f32 %v2519_v14  ;;  %v2173_v21 = vadd.f32 1.0, %v3072_v15  ;;  %v1890_v61 = vadd.f32 %v1889_v40, %v3935_v8  ;;  %v4317_v40 = vld [vmem:[#allocation15_spill] sm:$0xff] }
 0x434   :  { %v3076_v22 = vpop.eup %3075  ;;  %v2311_v7 = vadd.f32 %v2295_v55, %v2279_v45  ;;  %v2062_v59 = vadd.f32 1.0, %v3074_v58  ;;  %3099 = vpow2.f32 %v2533_v33  ;;  %v2114_v55 = vadd.f32 %v1880_v51, %v4088_v23  ;;  %v4194_v47 = vpop.f32.mrf.mxu0 }
 0x435   :  { %v3078_v38 = vpop.eup %3077  ;;  %3101 = vtanh.f32 %v2235_v0  ;;  %v2220_v53 = vmul.f32 %v3076_v22, %v4118_v3  ;;  %v1503_v28 = vadd.f32 %v3962_v2, %v3932_v13  ;;  %v2265_v20 = vsub.f32 1.0, %v4154_v9  ;;  %v4316_v0 = vld [vmem:[#allocation2_spill] sm:$0xff] }
 0x436   :  { %v3080_v39 = vpop.eup %3079  ;;  %2327 = vst [vmem:[%s4283_s12 + $0x10] sm:$0xff] %v2311_v7  ;;  %v2280_v19 = vmul.f32 %v3078_v38, %v2264_v50  ;;  %3103 = vrcp.f32 %v2062_v59  ;;  %v2535_v32 = vmul.f32 -1.442695, %v2113_v42  ;;  %v2521_v50 = vmul.f32 -1.442695, %v2003_v1 }
 0x437   :  { %v3082_v27 = vpop.eup %3081  ;;  %v2236_v3 = vadd.f32 %v2220_v53, %v4020_v26  ;;  %3105 = vpow2.f32 %v2520_v5  ;;  %v4186_v23 = vadd.f32 %v1890_v61, %v1503_v28  ;;  %v1959_v13 = vadd.f32 %v1958_v6, %v3987_v29 }
 0x438   :  { %v3084_v31 = vpop.eup %3083  ;;  %v2312_v56 = vadd.f32 %v2296_v18, %v2280_v19  ;;  %3107 = vpow2.f32 %v2534_v44  ;;  %v2536_v2 = vmul.f32 -1.442695, %v2114_v55  ;;  %v2297_v33 = vmul.f32 %v4154_v9, %v3529_v60  ;;  %v4315_v9 = vld [vmem:[#allocation4_spill] sm:$0xff] }
 0x439   :  { %3109 = vtanh.f32 %v2236_v3  ;;  %v2063_v16 = vadd.f32 1.0, %v3084_v31  ;;  %v1572_v25 = vadd.f32 %v3877_v52, %v3900_v43  ;;  %v2266_v24 = vsub.f32 1.0, %v3080_v39  ;;  %v1961_v52 = vpop.f32.mrf.mxu0 }
 0x43a   :  { %v3086_v8 = vpop.eup %3085  ;;  %2328 = vst [vmem:[%s4283_s12 + $0x18] sm:$0xff] %v2312_v56  ;;  %3111 = vrcp.f32 %v2173_v21  ;;  %v2522_v63 = vmul.f32 -1.442695, %v2004_v34  ;;  %v2298_v41 = vmul.f32 %v3080_v39, %v4315_v9  ;;  %v2267_v62 = vsub.f32 1.0, %v3082_v27 }
 0x43b   :  { %v3088_v26 = vpop.eup %3087  ;;  %v2281_v46 = vmul.f32 %v3086_v8, %v2265_v20  ;;  %3113 = vrcp.f32 %v2063_v16  ;;  %v1962_v45 = vadd.f32 %v1961_v52, %v3987_v29  ;;  %v2537_v51 = vmul.f32 -1.442695, %v4164_v4  ;;  %v4210_v7 = vpop.f32.mrf.mxu0 }
 0x43c   :  { %v3090_v48 = vpop.eup %3089  ;;  %v2221_v10 = vmul.f32 %v3088_v26, %v1959_v13  ;;  %3115 = vpow2.f32 %v2535_v32  ;;  %v2299_v44 = vmul.f32 %v3082_v27, %v4316_v0  ;;  %v1575_v22 = vadd.f32 %v4317_v40, %v3900_v43  ;;  %v4318_v27 = vld [vmem:[#allocation3_spill] sm:$0xff] }
 0x43d   :  { %v3092_v37 = vpop.eup %3091  ;;  %v2313_v30 = vadd.f32 %v2297_v33, %v2281_v46  ;;  %v2064_v54 = vadd.f32 1.0, %v3090_v48  ;;  %3117 = vpow2.f32 %v2521_v50  ;;  %v1967_v39 = vadd.f32 %v4171_v11, %v3987_v29  ;;  %v1974_v31 = vpop.f32.mrf.mxu0  ;;  %v4319_v11 = vld [vmem:[#allocation13_spill] sm:$0xff]  ;;  %v4323_v0 = vld [vmem:[#allocation19_spill] sm:$0xff] }
 0x43e   :  { %v3094_v49 = vpop.eup %3093  ;;  %v2237_v14 = vadd.f32 %v2221_v10, %v1572_v25  ;;  %3119 = vpow2.f32 %v2536_v2  ;;  %v2174_v18 = vadd.f32 1.0, %v3092_v37  ;;  %v2538_v6 = vmul.f32 -1.442695, %v4186_v23  ;;  %v4320_v37 = vld [vmem:[#allocation14_spill] sm:$0xff] }
 0x43f   :  { %v3096_v57 = vpop.eup %3095  ;;  %2329 = vst [vmem:[%s4283_s12 + $0x20] sm:$0xff] %v2313_v30  ;;  %v2282_v60 = vmul.f32 %v3094_v49, %v2266_v24  ;;  %3121 = vrcp.f32 %v2064_v54  ;;  %v1580_v32 = vadd.f32 %v4319_v11, %v3900_v43  ;;  %v1970_v2 = vadd.f32 %v4194_v47, %v3987_v29  ;;  %v2890_v48 = vpop.f32.mrf.mxu0  ;;  %v4321_v47 = vld [vmem:[#allocation6_spill] sm:$0xff] }
 0x440   :  { %v3098_v35 = vpop.eup %3097  ;;  %3123 = vtanh.f32 %v2237_v14  ;;  %v2268_v38 = vsub.f32 1.0, %v3096_v57  ;;  %v2300_v28 = vmul.f32 %v3096_v57, %v4318_v27  ;;  %v1583_v30 = vadd.f32 %v4320_v37, %v3900_v43  ;;  %v4325_v27 = vld [vmem:[#allocation5_spill] sm:$0xff] }
 0x441   :  { %v3100_v17 = vpop.eup %3099  ;;  %v2314_v12 = vadd.f32 %v2298_v41, %v2282_v60  ;;  %v2065_v1 = vadd.f32 1.0, %v3098_v35  ;;  %3125 = vpow2.f32 %v2522_v63  ;;  %v1975_v63 = vadd.f32 %v1974_v31, %v3987_v29  ;;  %v1977_v41 = vpop.f32.mrf.mxu0 }
 0x442   :  { %v3102_v15 = vpop.eup %3101  ;;  %v2175_v53 = vadd.f32 1.0, %v3100_v17  ;;  %v4322_v17 = vld [vmem:[#allocation17_spill] sm:$0xff] }
 0x443   :  { %v3104_v36 = vpop.eup %3103  ;;  %2330 = vst [vmem:[%s4283_s12 + $0x28] sm:$0xff] %v2314_v12  ;;  %v2283_v58 = vmul.f32 %v3102_v15, %v2267_v62  ;;  %3127 = vrcp.f32 %v2065_v1  ;;  %v1588_v12 = vadd.f32 %v4322_v17, %v3900_v43  ;;  %v1978_v15 = vadd.f32 %v1977_v41, %v3987_v29 }
 0x444   :  { %v3106_v5 = vpop.eup %3105  ;;  %v2222_v59 = vmul.f32 %v3104_v36, %v1962_v45  ;;  %3129 = vrcp.f32 %v2174_v18 }
 0x445   :  { %v3108_v42 = vpop.eup %3107  ;;  %v2315_v4 = vadd.f32 %v2299_v44, %v2283_v58  ;;  %v2066_v21 = vadd.f32 1.0, %v3106_v5  ;;  %3131 = vpow2.f32 %v2537_v51  ;;  %v1591_v44 = vadd.f32 %v4323_v0, %v3900_v43 }
 0x446   :  { %v3110_v34 = vpop.eup %3109  ;;  %v2238_v19 = vadd.f32 %v2222_v59, %v1575_v22  ;;  %v2176_v56 = vadd.f32 1.0, %v3108_v42  ;;  %v4324_v59 = vld [vmem:[#allocation8_spill] sm:$0xff] }
 0x447   :  { %v3112_v55 = vpop.eup %3111  ;;  %2331 = vst [vmem:[%s4283_s12 + $0x30] sm:$0xff] %v2315_v4  ;;  %v2284_v61 = vmul.f32 %v3110_v34, %v2268_v38  ;;  %3133 = vrcp.f32 %v2066_v21 }
 0x448   :  { %v3114_v3 = vpop.eup %3113  ;;  %3135 = vtanh.f32 %v2238_v19  ;;  %v2269_v33 = vsub.f32 1.0, %v3112_v55  ;;  %v2301_v49 = vmul.f32 %v3112_v55, %v4321_v47  ;;  %v1983_v55 = vadd.f32 %v4210_v7, %v3987_v29 }
 0x449   :  { %v3116_v20 = vpop.eup %3115  ;;  %v2316_v16 = vadd.f32 %v2300_v28, %v2284_v61  ;;  %v2223_v50 = vmul.f32 %v3114_v3, %v1967_v39  ;;  %3137 = vrcp.f32 %v2175_v53 }
 0x44a   :  { %v3118_v8 = vpop.eup %3117  ;;  %3139 = vpow2.f32 %v2538_v6  ;;  %v2177_v25 = vadd.f32 1.0, %v3116_v20 }
 0x44b   :  { %v3120_v13 = vpop.eup %3119  ;;  %2332 = vst [vmem:[%s4283_s12 + $0x38] sm:$0xff] %v2316_v16  ;;  %v2239_v23 = vadd.f32 %v2223_v50, %v1580_v32  ;;  %v2067_v26 = vadd.f32 1.0, %v3118_v8  ;;  %3141 = vrcp.f32 %v2176_v56  ;;  %v1986_v32 = vadd.f32 %v2890_v48, %v3987_v29  ;;  %v4326_v16 = vld [vmem:[#allocation16_spill] sm:$0xff]  ;;  %v4329_v48 = vld [vmem:[#allocation10_spill] sm:$0xff] }
 0x44c   :  { %v3122_v46 = vpop.eup %3121  ;;  %v2178_v52 = vadd.f32 1.0, %v3120_v13  ;;  %v4327_v13 = vld [vmem:[#allocation7_spill] sm:$0xff] }
 0x44d   :  { %v3124_v10 = vpop.eup %3123  ;;  %3143 = vtanh.f32 %v2239_v23  ;;  %v2224_v24 = vmul.f32 %v3122_v46, %v1970_v2 }
 0x44e   :  { %v2285_v54 = vmul.f32 %v3124_v10, %v2269_v33  ;;  %3145 = vrcp.f32 %v2067_v26  ;;  %v3126_v14 = vpop.eup %3125  ;;  %v4328_v10 = vld [vmem:[#allocation18_spill] sm:$0xff] }
 0x44f   :  { %v2240_v57 = vadd.f32 %v2224_v24, %v1583_v30  ;;  %3147 = vrcp.f32 %v2177_v25  ;;  %v2068_v35 = vadd.f32 1.0, %v3126_v14  ;;  %v4330_v14 = vld [vmem:[#allocation12_spill] sm:$0xff] }
 0x450   :  { %v3128_v60 = vpop.eup %3127  ;;  %v2317_v9 = vadd.f32 %v2301_v49, %v2285_v54 }
 0x451   :  { %v3130_v18 = vpop.eup %3129  ;;  %3149 = vtanh.f32 %v2240_v57  ;;  %v2225_v62 = vmul.f32 %v3128_v60, %v1975_v63 }
 0x452   :  { %2333 = vst [vmem:[%s4283_s12 + $0x40] sm:$0xff] %v2317_v9  ;;  %3151 = vrcp.f32 %v2068_v35  ;;  %v3132_v1 = vpop.eup %3131  ;;  %v2270_v36 = vsub.f32 1.0, %v3130_v18  ;;  %v2302_v42 = vmul.f32 %v3130_v18, %v4324_v59  ;;  %v4331_v18 = vld [vmem:[#allocation9_spill] sm:$0xff] }
 0x453   :  { %v2241_v45 = vadd.f32 %v2225_v62, %v1588_v12  ;;  %3153 = vrcp.f32 %v2178_v52  ;;  %v2179_v21 = vadd.f32 1.0, %v3132_v1 }
 0x454   :  { %v3134_v51 = vpop.eup %3133 }
 0x455   :  { %v3136_v58 = vpop.eup %3135  ;;  %3155 = vtanh.f32 %v2241_v45  ;;  %v2226_v5 = vmul.f32 %v3134_v51, %v1978_v15  ;;  %v4332_v45 = vld [vmem:[#allocation11_spill] sm:$0xff] }
 0x456   :  { %v3138_v40 = vpop.eup %3137  ;;  %v2286_v22 = vmul.f32 %v3136_v58, %v2270_v36 }
 0x457   :  { %v2242_v4 = vadd.f32 %v2226_v5, %v1591_v44  ;;  %v3140_v38 = vpop.eup %3139  ;;  %v2271_v39 = vsub.f32 1.0, %v3138_v40  ;;  %v2303_v28 = vmul.f32 %v3138_v40, %v4325_v27 }
 0x458   :  { %v2318_v53 = vadd.f32 %v2302_v42, %v2286_v22  ;;  %v3142_v34 = vpop.eup %3141  ;;  %v2180_v6 = vadd.f32 1.0, %v3140_v38 }
 0x459   :  { %3157 = vtanh.f32 %v2242_v4  ;;  %v2272_v20 = vsub.f32 1.0, %v3142_v34  ;;  %v2304_v2 = vmul.f32 %v3142_v34, %v4327_v13 }
 0x45a   :  { %v3144_v19 = vpop.eup %3143  ;;  %2334 = vst [vmem:[%s4283_s12 + $0x48] sm:$0xff] %v2318_v53  ;;  %3159 = vrcp.f32 %v2179_v21 }
 0x45b   :  { %v3146_v43 = vpop.eup %3145  ;;  %v2287_v61 = vmul.f32 %v3144_v19, %v2271_v39  ;;  %3161 = vrcp.f32 %v2180_v6 }
 0x45c   :  { %v2227_v3 = vmul.f32 %v3146_v43, %v1983_v55  ;;  %v3148_v31 = vpop.eup %3147 }
 0x45d   :  { %v2319_v56 = vadd.f32 %v2303_v28, %v2287_v61  ;;  %v2273_v33 = vsub.f32 1.0, %v3148_v31  ;;  %v2305_v30 = vmul.f32 %v3148_v31, %v4329_v48 }
 0x45e   :  { %v3150_v11 = vpop.eup %3149  ;;  %v2243_v50 = vadd.f32 %v2227_v3, %v4326_v16 }
 0x45f   :  { %v3152_v7 = vpop.eup %3151  ;;  %2335 = vst [vmem:[%s4283_s12 + $0x50] sm:$0xff] %v2319_v56  ;;  %v2288_v8 = vmul.f32 %v3150_v11, %v2272_v20 }
 0x460   :  { %3163 = vtanh.f32 %v2243_v50  ;;  %v2228_v23 = vmul.f32 %v3152_v7, %v1986_v32  ;;  %v3154_v26 = vpop.eup %3153 }
 0x461   :  { %v2320_v46 = vadd.f32 %v2304_v2, %v2288_v8  ;;  %v2274_v54 = vsub.f32 1.0, %v3154_v26  ;;  %v2306_v63 = vmul.f32 %v3154_v26, %v4330_v14 }
 0x462   :  { %v3156_v25 = vpop.eup %3155  ;;  %v2244_v37 = vadd.f32 %v2228_v23, %v4328_v10 }
 0x463   :  { %2336 = vst [vmem:[%s4283_s12 + $0x58] sm:$0xff] %v2320_v46  ;;  %v2289_v29 = vmul.f32 %v3156_v25, %v2273_v33 }
 0x464   :  { %3165 = vtanh.f32 %v2244_v37 }
 0x465   :  { %v2321_v24 = vadd.f32 %v2305_v30, %v2289_v29 }
 0x466   :  { %v3158_v47 = vpop.eup %3157 }
 0x467   :  { %2337 = vst [vmem:[%s4283_s12 + $0x60] sm:$0xff] %v2321_v24  ;;  %v2290_v49 = vmul.f32 %v3158_v47, %v2274_v54  ;;  %v3160_v57 = vpop.eup %3159 }
 0x468   :  { %v3162_v9 = vpop.eup %3161  ;;  %v2275_v41 = vsub.f32 1.0, %v3160_v57  ;;  %v2307_v17 = vmul.f32 %v3160_v57, %v4331_v18 }
 0x469   :  { %v2322_v60 = vadd.f32 %v2306_v63, %v2290_v49  ;;  %v2276_v62 = vsub.f32 1.0, %v3162_v9  ;;  %v2308_v51 = vmul.f32 %v3162_v9, %v4332_v45 }
 0x46b   :  { %2338 = vst [vmem:[%s4283_s12 + $0x68] sm:$0xff] %v2322_v60 }
 0x46d   :  { %v3164_v52 = vpop.eup %3163 }
 0x46e   :  { %v2291_v35 = vmul.f32 %v3164_v52, %v2275_v41 }
 0x470   :  { %v2323_v12 = vadd.f32 %v2307_v17, %v2291_v35 }
 0x471   :  { %v3166_v1 = vpop.eup %3165 }
 0x472   :  { %2339 = vst [vmem:[%s4283_s12 + $0x70] sm:$0xff] %v2323_v12  ;;  %v2292_v15 = vmul.f32 %v3166_v1, %v2276_v62 }
 0x474   :  { %v2324_v36 = vadd.f32 %v2308_v51, %v2292_v15 }
 0x476   :  { %2340 = vst [vmem:[%s4283_s12 + $0x78] sm:$0xff] %v2324_v36 }

// kernel: tgn_forward.3
= control target key start
LH: loop header
LB: loop body
LE: loop exit
PB: predicated region body
PF: predicated region fallthrough
CT: control target
= control target key end

     0   :  { %v5136_v0 = vmov 0   ;;  %v81_v15 = vlaneseq  ;;  %v3470_v21 = vmov 1.0|1.0   ;;  %s5121_s2 = inlined_call_operand.vmem [shape: s32[128,1], index: 2, kind: input, shape index: {}]   ;;  %s5122_s3 = inlined_call_operand.vmem [shape: s32[1,128], index: 3, kind: input, shape index: {}]   ;;  %s5123_s6 = inlined_call_operand.vmem [shape: bf16[128,256], index: 6, kind: input, shape index: {}]   ;;  %s5124_s0 = inlined_call_operand.vmem [shape: bf16[128,128], index: 0, kind: input, shape index: {}, may-alias: {0,1}]   ;;  %s5125_s4 = inlined_call_operand.vmem [shape: bf16[128,256], index: 4, kind: input, shape index: {}]   ;;  %s5126_s1 = inlined_call_operand.vmem [shape: bf16[128,128], index: 1, kind: input, shape index: {}, may-alias: {0,1}]   ;;  %s5127_s8 = inlined_call_operand.vmem [shape: bf16[128,256], index: 8, kind: input, shape index: {}]   ;;  %s5128_s7 = inlined_call_operand.vmem [shape: f32[1,256], index: 7, kind: input, shape index: {}]   ;;  %s5129_s5 = inlined_call_operand.vmem [shape: f32[1,256], index: 5, kind: input, shape index: {}]   ;;  %s5130_s9 = inlined_call_operand.vmem [shape: f32[1,256], index: 9, kind: input, shape index: {}]   ;;  %s5131_s10 = inlined_call_operand.vmem [shape: bf16[128,256], index: 10, kind: input, shape index: {}]   ;;  %s5132_s12 = inlined_call_operand.vmem [shape: bf16[256,128], index: 12, kind: input, shape index: {}]   ;;  %s5133_s11 = inlined_call_operand.vmem [shape: f32[1,256], index: 11, kind: input, shape index: {}]   ;;  %s5134_s13 = inlined_call_operand.vmem [shape: f32[1,128], index: 13, kind: input, shape index: {}]   ;;  %s5135_s14 = inlined_call_operand.vmem [shape: f32[128,128], index: 14, kind: output, shape index: {}]  }
   0x1   :  { %3204 = vset.pattern.permute.xlu1 %v5136_v0  ;;  %3203 = vset.pattern.permute.xlu0 %v5136_v0  ;;  %v192_v1 = vld [vmem:[%s5121_s2 + $0x70] sm:$0xff]  ;;  %v190_v2 = vld [vmem:[%s5121_s2 + $0x60] sm:$0xff]  ;;  %v193_v3 = vld [vmem:[%s5121_s2 + $0x78] sm:$0xff] }
   0x2   :  { %237 = vperm.xlu0 %3203, %v192_v1   ;;  %231 = vperm.xlu1 %3204, %v190_v2   ;;  %v191_v4 = vld [vmem:[%s5121_s2 + $0x68] sm:$0xff]  ;;  %v189_v5 = vld [vmem:[%s5121_s2 + $0x58] sm:$0xff]  ;;  %v188_v6 = vld [vmem:[%s5121_s2 + $0x50] sm:$0xff]  ;;  %v3597_v18 = vshrl.u32 %v81_v15, 7  ;;  %v3612_v25 = vand.u32 127, %v81_v15 }
   0x3   :  { %599 = vmatprep.mubr.bf16.mxu1 %v5136_v0  ;;  %v187_v7 = vld [vmem:[%s5121_s2 + $0x48] sm:$0xff]  ;;  %v186_v8 = vld [vmem:[%s5121_s2 + $0x40] sm:$0xff]  ;;  %v185_v9 = vld [vmem:[%s5121_s2 + $0x38] sm:$0xff] }
   0x4   :  { %v184_v10 = vld [vmem:[%s5121_s2 + $0x30] sm:$0xff]  ;;  %v183_v11 = vld [vmem:[%s5121_s2 + $0x28] sm:$0xff]  ;;  %v182_v12 = vld [vmem:[%s5121_s2 + $0x20] sm:$0xff]  ;;  %v83_v19 = vadd.s32 8, %v3597_v18  ;;  %v84_v45 = vadd.s32 16, %v3597_v18  ;;  %v85_v46 = vadd.s32 24, %v3597_v18 }
   0x5   :  { %v181_v13 = vld [vmem:[%s5121_s2 + $0x18] sm:$0xff]  ;;  %v180_v14 = vld [vmem:[%s5121_s2 + $0x10] sm:$0xff]  ;;  %v179_v16 = vld [vmem:[%s5121_s2 + $0x8] sm:$0xff]  ;;  %v86_v47 = vadd.s32 32, %v3597_v18  ;;  %v87_v48 = vadd.s32 40, %v3597_v18  ;;  %v88_v52 = vadd.s32 48, %v3597_v18 }
   0x6   :  { %240 = vperm.xlu0 %3203, %v193_v3   ;;  %234 = vperm.xlu1 %3204, %v191_v4   ;;  %v178_v17 = vld [vmem:[%s5121_s2] sm:$0xff]  ;;  %v3237_v24 = vld [vmem:[%s5125_s4 + $0x74] ss:$8 sps:$4 sm:$0xff]   ;;  %v3239_v26 = vld [vmem:[%s5125_s4 + $0x70] ss:$8 sps:$4 sm:$0xff]   ;;  %v89_v53 = vadd.s32 56, %v3597_v18 }
   0x7   :  { %v3603_v20 = vld [vmem:[%s5122_s3] ss:$0 sm:$0xff]  ;;  %567 = vmatprep.subr.bf16.mxu1 %v3237_v24  ;;  %v3240_v27 = vld [vmem:[%s5125_s4 + $0x64] ss:$8 sps:$4 sm:$0xff]   ;;  %v3243_v31 = vld [vmem:[%s5125_s4 + $0x54] ss:$8 sps:$4 sm:$0xff]  }
   0x8   :  { %vm120_vm0 = vcmp.eq.s32.totalorder %v3597_v18, %v3603_v20  ;;  %vm121_vm1 = vcmp.eq.s32.totalorder %v83_v19, %v3603_v20  ;;  %568 = vmatpush1.bf16.msra.mxu1 %v3239_v26  ;;  %v3242_v30 = vld [vmem:[%s5125_s4 + $0x60] ss:$8 sps:$4 sm:$0xff]   ;;  %v3245_v32 = vld [vmem:[%s5125_s4 + $0x50] ss:$8 sps:$4 sm:$0xff]   ;;  %v3207_v49 = vld [vmem:[%s5123_s6 + $0x74] ss:$8 sps:$4 sm:$0xff]  }
   0x9   :  { %vm2768_vm2 = vmpackc.low %vm121_vm1, %vm120_vm0  ;;  %569 = vmatprep.subr.bf16.mxu1 %v3240_v27  ;;  %v3205_v50 = vld [vmem:[%s5123_s6 + $0x70] ss:$8 sps:$4 sm:$0xff]   ;;  %v3210_v51 = vld [vmem:[%s5123_s6 + $0x64] ss:$8 sps:$4 sm:$0xff]   ;;  %v90_v54 = vadd.s32 64, %v3597_v18  ;;  %v91_v55 = vadd.s32 72, %v3597_v18 }
   0xa   :  { %228 = vperm.xlu1 %3204, %v189_v5   ;;  %225 = vperm.xlu0 %3203, %v188_v6   ;;  %v3208_v56 = vld [vmem:[%s5123_s6 + $0x60] ss:$8 sps:$4 sm:$0xff]   ;;  %v3213_v57 = vld [vmem:[%s5123_s6 + $0x54] ss:$8 sps:$4 sm:$0xff]   ;;  %v3211_v58 = vld [vmem:[%s5123_s6 + $0x50] ss:$8 sps:$4 sm:$0xff]  }
   0xb   :  { %3041 = vmatprep.mubr.msk.bf16.mxu0 %vm2768_vm2, %v3470_v21  ;;  %v3216_v59 = vld [vmem:[%s5123_s6 + $0x44] ss:$8 sps:$4 sm:$0xff]   ;;  %v92_v60 = vadd.s32 80, %v3597_v18  ;;  %v93_v61 = vadd.s32 88, %v3597_v18  ;;  %v94_v62 = vadd.s32 96, %v3597_v18  ;;  %v95_v63 = vadd.s32 104, %v3597_v18 }
   0xc   :  { %570 = vmatpush1.bf16.msra.mxu1 %v3242_v30  ;;  %v3214_v1 = vld [vmem:[%s5123_s6 + $0x40] ss:$8 sps:$4 sm:$0xff]   ;;  %v3219_v2 = vld [vmem:[%s5123_s6 + $0x34] ss:$8 sps:$4 sm:$0xff]   ;;  %v3217_v3 = vld [vmem:[%s5123_s6 + $0x30] ss:$8 sps:$4 sm:$0xff]  }
   0xd   :  { %571 = vmatprep.subr.bf16.mxu1 %v3243_v31  ;;  %v3222_v4 = vld [vmem:[%s5123_s6 + $0x24] ss:$8 sps:$4 sm:$0xff]   ;;  %v96_v5 = vadd.s32 112, %v3597_v18  ;;  %v97_v6 = vadd.s32 120, %v3597_v18  ;;  %v3769_v15 = vld [vmem:[%s5124_s0 + $0x18] sm:$0xff]  }
   0xe   :  { %222 = vperm.xlu1 %3204, %v187_v7   ;;  %219 = vperm.xlu0 %3203, %v186_v8   ;;  %v3220_v7 = vld [vmem:[%s5123_s6 + $0x20] ss:$8 sps:$4 sm:$0xff]   ;;  %v3225_v8 = vld [vmem:[%s5123_s6 + $0x14] ss:$8 sps:$4 sm:$0xff]   ;;  %v3257_v26 = vld [vmem:[%s5125_s4 + $0x10] ss:$8 sps:$4 sm:$0xff]  }
   0xf   :  { %v3782_v19 = vld [vmem:[%s5124_s0 + $0x20] sm:$0xff]   ;;  %v3801_v24 = vld [vmem:[%s5124_s0 + $0x28] sm:$0xff]   ;;  %v3831_v31 = vld [vmem:[%s5124_s0 + $0x38] sm:$0xff]  }
  0x10   :  { %572 = vmatpush1.bf16.msra.mxu1 %v3245_v32  ;;  %v3258_v27 = vld [vmem:[%s5125_s4 + $0x4] ss:$8 sps:$4 sm:$0xff]  }
  0x11   :  { %v3261_v30 = vld [vmem:[%s5126_s1] sm:$0xff]   ;;  %v3262_v32 = vld [vmem:[%s5126_s1 + $0x8] sm:$0xff]  }
  0x12   :  { %216 = vperm.xlu1 %3204, %v185_v9   ;;  %213 = vperm.xlu0 %3203, %v184_v10   ;;  %v3223_v9 = vld [vmem:[%s5123_s6 + $0x10] ss:$8 sps:$4 sm:$0xff]   ;;  %v3228_v10 = vld [vmem:[%s5123_s6 + $0x4] ss:$8 sps:$4 sm:$0xff]  }
  0x16   :  { %210 = vperm.xlu1 %3204, %v183_v11   ;;  %207 = vperm.xlu0 %3203, %v182_v12   ;;  %v3226_v11 = vld [vmem:[%s5123_s6] ss:$8 sps:$4 sm:$0xff]  }
  0x17   :  { %v3748_v12 = vld [vmem:[%s5124_s0] sm:$0xff]  }
  0x1a   :  { %204 = vperm.xlu1 %3204, %v181_v13   ;;  %201 = vperm.xlu0 %3203, %v180_v14   ;;  %v3755_v13 = vld [vmem:[%s5124_s0 + $0x8] sm:$0xff]   ;;  %v3762_v14 = vld [vmem:[%s5124_s0 + $0x10] sm:$0xff]  }
  0x1e   :  { %198 = vperm.xlu1 %3204, %v179_v16   ;;  %195 = vperm.xlu0 %3203, %v178_v17   ;;  %v3246_v16 = vld [vmem:[%s5125_s4 + $0x44] ss:$8 sps:$4 sm:$0xff]   ;;  %v3248_v17 = vld [vmem:[%s5125_s4 + $0x40] ss:$8 sps:$4 sm:$0xff]  }
  0x1f   :  { %573 = vmatprep.subr.bf16.mxu1 %v3246_v16 }
  0x20   :  { %574 = vmatpush1.bf16.msra.mxu1 %v3248_v17 }
  0x7d   :  { %v238_v22 = vpop.permute.xlu0 %237  ;;  %v232_v23 = vpop.permute.xlu1 %231 }
  0x7e   :  { %vm254_vm4 = vcmp.eq.s32.totalorder %v3612_v25, %v232_v23  ;;  %vm256_vm6 = vcmp.eq.s32.totalorder %v3612_v25, %v238_v22  ;;  %v3252_v22 = vld [vmem:[%s5125_s4 + $0x24] ss:$8 sps:$4 sm:$0xff]   ;;  %v3254_v23 = vld [vmem:[%s5125_s4 + $0x20] ss:$8 sps:$4 sm:$0xff]  }
  0x81   :  { %v241_v28 = vpop.permute.xlu0 %240  ;;  %v235_v29 = vpop.permute.xlu1 %234 }
  0x82   :  { %vm257_vm3 = vcmp.eq.s32.totalorder %v3612_v25, %v241_v28  ;;  %vm255_vm5 = vcmp.eq.s32.totalorder %v3612_v25, %v235_v29  ;;  %v3260_v28 = vld [vmem:[%s5125_s4] ss:$8 sps:$4 sm:$0xff]   ;;  %v3820_v29 = vld [vmem:[%s5124_s0 + $0x30] sm:$0xff]  }
  0x83   :  { %vm2752_vm7 = vmpackc.low %vm257_vm3, %vm256_vm6 }
  0x84   :  { %3025 = vmatprep.subr.msk.bf16.mxu0 %vm2752_vm7, %v3470_v21  ;;  %vm2754_vm8 = vmpackc.low %vm255_vm5, %vm254_vm4 }
  0x85   :  { %v229_v33 = vpop.permute.xlu1 %228  ;;  %v226_v34 = vpop.permute.xlu0 %225  ;;  %3026 = vmatpush3.bf16.msk.msra.mxu0 %vm2752_vm7, %v3470_v21 }
  0x86   :  { %vm253_vm9 = vcmp.eq.s32.totalorder %v3612_v25, %v229_v33  ;;  %vm252_vm10 = vcmp.eq.s32.totalorder %v3612_v25, %v226_v34  ;;  %3027 = vmatprep.subr.msk.bf16.mxu0 %vm2754_vm8, %v3470_v21  ;;  %v3263_v33 = vld [vmem:[%s5126_s1 + $0x10] sm:$0xff]   ;;  %v3264_v34 = vld [vmem:[%s5126_s1 + $0x18] sm:$0xff]  }
  0x87   :  { %vm2756_vm11 = vmpackc.low %vm253_vm9, %vm252_vm10 }
  0x89   :  { %v223_v35 = vpop.permute.xlu1 %222  ;;  %v220_v36 = vpop.permute.xlu0 %219  ;;  %3028 = vmatpush3.bf16.msk.msra.mxu0 %vm2754_vm8, %v3470_v21 }
  0x8a   :  { %vm251_vm12 = vcmp.eq.s32.totalorder %v3612_v25, %v223_v35  ;;  %vm250_vm13 = vcmp.eq.s32.totalorder %v3612_v25, %v220_v36  ;;  %3029 = vmatprep.subr.msk.bf16.mxu0 %vm2756_vm11, %v3470_v21  ;;  %v3265_v35 = vld [vmem:[%s5126_s1 + $0x20] sm:$0xff]   ;;  %v3266_v36 = vld [vmem:[%s5126_s1 + $0x28] sm:$0xff]  }
  0x8b   :  { %vm2758_vm14 = vmpackc.low %vm251_vm12, %vm250_vm13  ;;  %vm123_vm12 = vcmp.eq.s32.totalorder %v85_v46, %v3603_v20  ;;  %vm124_vm13 = vcmp.eq.s32.totalorder %v86_v47, %v3603_v20  ;;  %v3278_v46 = vld [vmem:[%s5127_s8 + $0x40] ss:$8 sps:$4 sm:$0xff]   ;;  %v3283_v47 = vld [vmem:[%s5127_s8 + $0x34] ss:$8 sps:$4 sm:$0xff]  }
  0x8d   :  { %v217_v37 = vpop.permute.xlu1 %216  ;;  %v214_v38 = vpop.permute.xlu0 %213  ;;  %3030 = vmatpush3.bf16.msk.msra.mxu0 %vm2756_vm11, %v3470_v21  ;;  %vm122_vm11 = vcmp.eq.s32.totalorder %v84_v45, %v3603_v20  ;;  %v3280_v45 = vld [vmem:[%s5127_s8 + $0x44] ss:$8 sps:$4 sm:$0xff]  }
  0x8e   :  { %vm249_vm15 = vcmp.eq.s32.totalorder %v3612_v25, %v217_v37  ;;  %vm248_vm0 = vcmp.eq.s32.totalorder %v3612_v25, %v214_v38  ;;  %3031 = vmatprep.subr.msk.bf16.mxu0 %vm2758_vm14, %v3470_v21  ;;  %v3267_v37 = vld [vmem:[%s5126_s1 + $0x30] sm:$0xff]   ;;  %v3268_v38 = vld [vmem:[%s5126_s1 + $0x38] sm:$0xff]  }
  0x8f   :  { %vm2760_vm1 = vmpackc.low %vm249_vm15, %vm248_vm0 }
  0x90   :  { %vm2770_vm15 = vmpackc.low %vm123_vm12, %vm122_vm11 }
  0x91   :  { %v211_v39 = vpop.permute.xlu1 %210  ;;  %v208_v40 = vpop.permute.xlu0 %207  ;;  %3032 = vmatpush3.bf16.msk.msra.mxu0 %vm2758_vm14, %v3470_v21  ;;  %vm125_vm14 = vcmp.eq.s32.totalorder %v87_v48, %v3603_v20  ;;  %v3281_v48 = vld [vmem:[%s5127_s8 + $0x30] ss:$8 sps:$4 sm:$0xff]  }
  0x92   :  { %vm247_vm2 = vcmp.eq.s32.totalorder %v3612_v25, %v211_v39  ;;  %vm246_vm3 = vcmp.eq.s32.totalorder %v3612_v25, %v208_v40  ;;  %3033 = vmatprep.subr.msk.bf16.mxu0 %vm2760_vm1, %v3470_v21  ;;  %vm2772_vm0 = vmpackc.low %vm125_vm14, %vm124_vm13  ;;  %vm134_vm13 = vcmp.eq.s32.totalorder %v96_v5, %v3603_v20  ;;  %vm135_vm14 = vcmp.eq.s32.totalorder %v97_v6, %v3603_v20  ;;  %v3269_v39 = vld [vmem:[%s5127_s8 + $0x70] ss:$8 sps:$4 sm:$0xff]   ;;  %v3271_v40 = vld [vmem:[%s5127_s8 + $0x74] ss:$8 sps:$4 sm:$0xff]  }
  0x93   :  { %vm2762_vm4 = vmpackc.low %vm247_vm2, %vm246_vm3  ;;  %vm127_vm2 = vcmp.eq.s32.totalorder %v89_v53, %v3603_v20  ;;  %vm128_vm3 = vcmp.eq.s32.totalorder %v90_v54, %v3603_v20  ;;  %v3292_v53 = vld [vmem:[%s5127_s8 + $0x4] ss:$8 sps:$4 sm:$0xff]   ;;  %v3943_v5 = vsub.s32 0, %v3597_v18 }
  0x95   :  { %v205_v41 = vpop.permute.xlu1 %204  ;;  %v202_v42 = vpop.permute.xlu0 %201  ;;  %3034 = vmatpush3.bf16.msk.msra.mxu0 %vm2760_vm1, %v3470_v21  ;;  %vm126_vm1 = vcmp.eq.s32.totalorder %v88_v52, %v3603_v20  ;;  %v3287_v52 = vld [vmem:[%s5127_s8 + $0x10] ss:$8 sps:$4 sm:$0xff]   ;;  %5183 = vst [vmem:[#allocation15_spill] sm:$0xff] %v3943_v5 }
  0x96   :  { %vm245_vm5 = vcmp.eq.s32.totalorder %v3612_v25, %v205_v41  ;;  %vm244_vm6 = vcmp.eq.s32.totalorder %v3612_v25, %v202_v42  ;;  %3035 = vmatprep.subr.msk.bf16.mxu0 %vm2762_vm4, %v3470_v21  ;;  %v3274_v41 = vld [vmem:[%s5127_s8 + $0x64] ss:$8 sps:$4 sm:$0xff]   ;;  %v3272_v42 = vld [vmem:[%s5127_s8 + $0x60] ss:$8 sps:$4 sm:$0xff]  }
  0x97   :  { %vm2764_vm7 = vmpackc.low %vm245_vm5, %vm244_vm6 }
  0x98   :  { %vm2774_vm5 = vmpackc.low %vm127_vm2, %vm126_vm1 }
  0x99   :  { %v199_v43 = vpop.permute.xlu1 %198  ;;  %v196_v44 = vpop.permute.xlu0 %195  ;;  %3036 = vmatpush3.bf16.msk.msra.mxu0 %vm2762_vm4, %v3470_v21  ;;  %vm129_vm4 = vcmp.eq.s32.totalorder %v91_v55, %v3603_v20  ;;  %v3290_v55 = vld [vmem:[%s5127_s8] ss:$8 sps:$4 sm:$0xff]  }
  0x9a   :  { %vm243_vm8 = vcmp.eq.s32.totalorder %v3612_v25, %v199_v43  ;;  %vm242_vm9 = vcmp.eq.s32.totalorder %v3612_v25, %v196_v44  ;;  %3037 = vmatprep.subr.msk.bf16.mxu0 %vm2764_vm7, %v3470_v21  ;;  %vm2776_vm6 = vmpackc.low %vm129_vm4, %vm128_vm3  ;;  %v3255_v25 = vld [vmem:[%s5125_s4 + $0x14] ss:$8 sps:$4 sm:$0xff]   ;;  %v3275_v44 = vld [vmem:[%s5127_s8 + $0x50] ss:$8 sps:$4 sm:$0xff]  }
  0x9b   :  { %vm2766_vm10 = vmpackc.low %vm243_vm8, %vm242_vm9  ;;  %vm131_vm8 = vcmp.eq.s32.totalorder %v93_v61, %v3603_v20  ;;  %vm132_vm9 = vcmp.eq.s32.totalorder %v94_v62, %v3603_v20  ;;  %v3277_v43 = vld [vmem:[%s5127_s8 + $0x54] ss:$8 sps:$4 sm:$0xff]  }
  0x9d   :  { %3038 = vmatpush3.bf16.msk.msra.mxu0 %vm2764_vm7, %v3470_v21  ;;  %vm130_vm7 = vcmp.eq.s32.totalorder %v92_v60, %v3603_v20 }
  0x9e   :  { %3039 = vmatprep.subr.msk.bf16.mxu0 %vm2766_vm10, %v3470_v21  ;;  %vm2778_vm11 = vmpackc.low %vm131_vm8, %vm130_vm7 }
  0xa1   :  { %3040 = vmatpush3.bf16.msk.msra.mxu0 %vm2766_vm10, %v3470_v21  ;;  %vm133_vm10 = vcmp.eq.s32.totalorder %v95_v63, %v3603_v20  ;;  %v3249_v20 = vld [vmem:[%s5125_s4 + $0x34] ss:$8 sps:$4 sm:$0xff]  }
  0xa2   :  { %836 = vmatprep.subr.bf16.mxu0 %v3207_v49  ;;  %vm2780_vm12 = vmpackc.low %vm133_vm10, %vm132_vm9  ;;  %575 = vmatprep.subr.bf16.mxu1 %v3249_v20  ;;  %v3286_v49 = vld [vmem:[%s5127_s8 + $0x24] ss:$8 sps:$4 sm:$0xff]  }
  0xa4   :  { %3042 = vmatmul.mubr.msk.bf16.vlgmr.msra.gmra.mxu0 %vm2770_vm15, %v3470_v21  ;;  %vm2782_vm15 = vmpackc.low %vm135_vm14, %vm134_vm13 }
  0xa5   :  { %837 = vmatpush1.bf16.msra.mxu0 %v3205_v50  ;;  %3045 = vmatprep.mubr.msk.bf16.mxu0 %vm2772_vm0, %v3470_v21  ;;  %v3284_v50 = vld [vmem:[%s5127_s8 + $0x20] ss:$8 sps:$4 sm:$0xff]  }
  0xa6   :  { %838 = vmatprep.subr.bf16.mxu0 %v3210_v51  ;;  %v3289_v51 = vld [vmem:[%s5127_s8 + $0x14] ss:$8 sps:$4 sm:$0xff]  }
  0xa9   :  { %839 = vmatpush1.bf16.msra.mxu0 %v3208_v56 }
  0xaa   :  { %840 = vmatprep.subr.bf16.mxu0 %v3213_v57 }
  0xac   :  { %3046 = vmatmul.mubr.msk.bf16.gmra.mxu0 %vm2774_vm5, %v3470_v21 }
  0xad   :  { %841 = vmatpush1.bf16.msra.mxu0 %v3211_v58  ;;  %3049 = vmatprep.mubr.msk.bf16.mxu0 %vm2776_vm6, %v3470_v21 }
  0xae   :  { %842 = vmatprep.subr.bf16.mxu0 %v3216_v59 }
  0xb1   :  { %843 = vmatpush1.bf16.msra.mxu0 %v3214_v1 }
  0xb2   :  { %844 = vmatprep.subr.bf16.mxu0 %v3219_v2 }
  0xb4   :  { %3050 = vmatmul.mubr.msk.bf16.gmra.mxu0 %vm2778_vm11, %v3470_v21 }
  0xb5   :  { %845 = vmatpush1.bf16.msra.mxu0 %v3217_v3  ;;  %3053 = vmatprep.mubr.msk.bf16.mxu0 %vm2780_vm12, %v3470_v21 }
  0xb6   :  { %846 = vmatprep.subr.bf16.mxu0 %v3222_v4 }
  0xb9   :  { %847 = vmatpush1.bf16.msra.mxu0 %v3220_v7  ;;  %v696_v7 = vld [vmem:[%s5128_s7] sm:$0x3] }
  0xba   :  { %848 = vmatprep.subr.bf16.mxu0 %v3225_v8  ;;  %v3951_v8 = vsub.s32 1, %v3597_v18 }
  0xbc   :  { %3054 = vmatmul.mubr.msk.bf16.gmra.mxu0 %vm2782_vm15, %v3470_v21  ;;  %v3251_v21 = vld [vmem:[%s5125_s4 + $0x30] ss:$8 sps:$4 sm:$0xff]   ;;  %5185 = vst [vmem:[#allocation17_spill] sm:$0xff] %v3951_v8 }
  0xbd   :  { %849 = vmatpush1.bf16.msra.mxu0 %v3223_v9  ;;  %868 = vmatprep.mubr.bf16.mxu0 %v5136_v0 }
  0xbe   :  { %850 = vmatprep.subr.bf16.mxu0 %v3228_v10  ;;  %576 = vmatpush1.bf16.msra.mxu1 %v3251_v21  ;;  %v3956_v10 = vrot.slane %v696_v7, %v3943_v5 }
  0xbf   :  { %577 = vmatprep.subr.bf16.mxu1 %v3252_v22 }
  0xc1   :  { %851 = vmatpush1.bf16.msra.mxu0 %v3226_v11 }
  0xc2   :  { %578 = vmatpush1.bf16.msra.mxu1 %v3254_v23 }
  0xc3   :  { %579 = vmatprep.subr.bf16.mxu1 %v3255_v25 }
  0xc4   :  { %869 = vmatmul.mubr.bf16.vlgmr.msra.gmra.mxu0 %v3748_v12 }
  0xc5   :  { %878 = vmatprep.mubr.bf16.mxu0 %v5136_v0 }
  0xc6   :  { %580 = vmatpush1.bf16.msra.mxu1 %v3257_v26 }
  0xc7   :  { %581 = vmatprep.subr.bf16.mxu1 %v3258_v27 }
  0xca   :  { %582 = vmatpush1.bf16.msra.mxu1 %v3260_v28 }
  0xcb   :  { %1057 = vmatprep.subr.bf16.mxu1 %v3271_v40 }
  0xcc   :  { %879 = vmatmul.mubr.bf16.gmra.mxu0 %v3755_v13 }
  0xcd   :  { %888 = vmatprep.mubr.bf16.mxu0 %v5136_v0  ;;  %600 = vmatmul.mubr.bf16.vlgmr.msra.gmra.mxu1 %v3261_v30 }
  0xce   :  { %609 = vmatprep.mubr.bf16.mxu1 %v5136_v0  ;;  %1058 = vmatpush1.bf16.msra.mxu1 %v3269_v39 }
  0xcf   :  { %1059 = vmatprep.subr.bf16.mxu1 %v3274_v41 }
  0xd2   :  { %1060 = vmatpush1.bf16.msra.mxu1 %v3272_v42 }
  0xd3   :  { %1061 = vmatprep.subr.bf16.mxu1 %v3277_v43 }
  0xd4   :  { %889 = vmatmul.mubr.bf16.gmra.mxu0 %v3762_v14 }
  0xd5   :  { %898 = vmatprep.mubr.bf16.mxu0 %v5136_v0  ;;  %610 = vmatmul.mubr.bf16.gmra.mxu1 %v3262_v32 }
  0xd6   :  { %619 = vmatprep.mubr.bf16.mxu1 %v5136_v0  ;;  %1062 = vmatpush1.bf16.msra.mxu1 %v3275_v44 }
  0xd7   :  { %1063 = vmatprep.subr.bf16.mxu1 %v3280_v45 }
  0xda   :  { %1064 = vmatpush1.bf16.msra.mxu1 %v3278_v46 }
  0xdb   :  { %1065 = vmatprep.subr.bf16.mxu1 %v3283_v47 }
  0xdc   :  { %899 = vmatmul.mubr.bf16.gmra.mxu0 %v3769_v15 }
  0xdd   :  { %908 = vmatprep.mubr.bf16.mxu0 %v5136_v0  ;;  %620 = vmatmul.mubr.bf16.gmra.mxu1 %v3263_v33 }
  0xde   :  { %629 = vmatprep.mubr.bf16.mxu1 %v5136_v0  ;;  %1066 = vmatpush1.bf16.msra.mxu1 %v3281_v48 }
  0xdf   :  { %1067 = vmatprep.subr.bf16.mxu1 %v3286_v49 }
  0xe2   :  { %1068 = vmatpush1.bf16.msra.mxu1 %v3284_v50 }
  0xe3   :  { %1069 = vmatprep.subr.bf16.mxu1 %v3289_v51 }
  0xe4   :  { %909 = vmatmul.mubr.bf16.gmra.mxu0 %v3782_v19 }
  0xe5   :  { %918 = vmatprep.mubr.bf16.mxu0 %v5136_v0  ;;  %630 = vmatmul.mubr.bf16.gmra.mxu1 %v3264_v34 }
  0xe6   :  { %639 = vmatprep.mubr.bf16.mxu1 %v5136_v0  ;;  %1070 = vmatpush1.bf16.msra.mxu1 %v3287_v52 }
  0xe7   :  { %1071 = vmatprep.subr.bf16.mxu1 %v3292_v53 }
  0xea   :  { %1072 = vmatpush1.bf16.msra.mxu1 %v3290_v55 }
  0xec   :  { %919 = vmatmul.mubr.bf16.gmra.mxu0 %v3801_v24 }
  0xed   :  { %928 = vmatprep.mubr.bf16.mxu0 %v5136_v0  ;;  %640 = vmatmul.mubr.bf16.gmra.mxu1 %v3265_v35 }
  0xee   :  { %649 = vmatprep.mubr.bf16.mxu1 %v5136_v0 }
  0xf4   :  { %929 = vmatmul.mubr.bf16.gmra.mxu0 %v3820_v29 }
  0xf5   :  { %938 = vmatprep.mubr.bf16.mxu0 %v5136_v0  ;;  %650 = vmatmul.mubr.bf16.gmra.mxu1 %v3266_v36 }
  0xf6   :  { %659 = vmatprep.mubr.bf16.mxu1 %v5136_v0 }
  0xfc   :  { %939 = vmatmul.mubr.bf16.gmra.mxu0 %v3831_v31 }
  0xfd   :  { %660 = vmatmul.mubr.bf16.gmra.mxu1 %v3267_v37 }
  0xfe   :  { %669 = vmatprep.mubr.bf16.mxu1 %v5136_v0 }
 0x105   :  { %670 = vmatmul.mubr.bf16.gmra.mxu1 %v3268_v38 }
 0x106   :  { %1089 = vmatprep.mubr.bf16.mxu1 %v5136_v0 }
 0x10d   :  { %1090 = vmatmul.mubr.bf16.vlgmr.msra.gmra.mxu1 %v3748_v12  ;;  %v3963_v12 = vrot.slane %v696_v7, %v3951_v8 }
 0x10e   :  { %1099 = vmatprep.mubr.bf16.mxu1 %v5136_v0 }
 0x115   :  { %1100 = vmatmul.mubr.bf16.gmra.mxu1 %v3755_v13 }
 0x116   :  { %1109 = vmatprep.mubr.bf16.mxu1 %v5136_v0 }
 0x11d   :  { %1110 = vmatmul.mubr.bf16.gmra.mxu1 %v3762_v14 }
 0x11e   :  { %1119 = vmatprep.mubr.bf16.mxu1 %v5136_v0 }
 0x125   :  { %1120 = vmatmul.mubr.bf16.gmra.mxu1 %v3769_v15 }
 0x126   :  { %1129 = vmatprep.mubr.bf16.mxu1 %v5136_v0 }
 0x12d   :  { %1130 = vmatmul.mubr.bf16.gmra.mxu1 %v3782_v19 }
 0x12e   :  { %1139 = vmatprep.mubr.bf16.mxu1 %v5136_v0 }
 0x135   :  { %1140 = vmatmul.mubr.bf16.gmra.mxu1 %v3801_v24 }
 0x136   :  { %1149 = vmatprep.mubr.bf16.mxu1 %v5136_v0 }
 0x13d   :  { %1150 = vmatmul.mubr.bf16.gmra.mxu1 %v3820_v29 }
 0x13e   :  { %1159 = vmatprep.mubr.bf16.mxu1 %v5136_v0 }
 0x145   :  { %1160 = vmatmul.mubr.bf16.gmra.mxu1 %v3831_v31 }
 0x164   :  { %v3907_v54 = vpop.f32.mrf.mxu0 }
 0x165   :  { %5170 = vst [vmem:[#allocation2_spill] sm:$0xff] %v3907_v54 }
 0x166   :  { %v3912_v56 = vpop.f32.mrf.mxu0 }
 0x167   :  { %5171 = vst [vmem:[#allocation3_spill] sm:$0xff] %v3912_v56 }
 0x168   :  { %v3914_v57 = vpop.f32.mrf.mxu0 }
 0x169   :  { %5172 = vst [vmem:[#allocation4_spill] sm:$0xff] %v3914_v57 }
 0x16a   :  { %v3917_v58 = vpop.f32.mrf.mxu0 }
 0x16b   :  { %5173 = vst [vmem:[#allocation5_spill] sm:$0xff] %v3917_v58 }
 0x16c   :  { %v3920_v59 = vpop.f32.mrf.mxu0 }
 0x16d   :  { %5174 = vst [vmem:[#allocation6_spill] sm:$0xff] %v3920_v59 }
 0x16e   :  { %v3922_v60 = vpop.f32.mrf.mxu0 }
 0x16f   :  { %5175 = vst [vmem:[#allocation7_spill] sm:$0xff] %v3922_v60 }
 0x170   :  { %v3924_v61 = vpop.f32.mrf.mxu0 }
 0x171   :  { %5176 = vst [vmem:[#allocation8_spill] sm:$0xff] %v3924_v61 }
 0x172   :  { %v3927_v62 = vpop.f32.mrf.mxu0 }
 0x173   :  { %5177 = vst [vmem:[#allocation9_spill] sm:$0xff] %v3927_v62 }
 0x174   :  { %v3930_v63 = vpop.f32.mrf.mxu0 }
 0x175   :  { %5178 = vst [vmem:[#allocation10_spill] sm:$0xff] %v3930_v63 }
 0x176   :  { %v3932_v1 = vpop.f32.mrf.mxu0 }
 0x177   :  { %5179 = vst [vmem:[#allocation11_spill] sm:$0xff] %v3932_v1 }
 0x178   :  { %v3934_v2 = vpop.f32.mrf.mxu0 }
 0x179   :  { %5180 = vst [vmem:[#allocation12_spill] sm:$0xff] %v3934_v2 }
 0x17a   :  { %v3937_v3 = vpop.f32.mrf.mxu0 }
 0x17b   :  { %5181 = vst [vmem:[#allocation13_spill] sm:$0xff] %v3937_v3 }
 0x17c   :  { %v3940_v4 = vpop.f32.mrf.mxu0 }
 0x17d   :  { %5182 = vst [vmem:[#allocation14_spill] sm:$0xff] %v3940_v4 }
 0x17e   :  { %v3945_v6 = vpop.f32.mrf.mxu0 }
 0x17f   :  { %5184 = vst [vmem:[#allocation16_spill] sm:$0xff] %v3945_v6 }
 0x180   :  { %v3953_v9 = vpop.f32.mrf.mxu0 }
 0x181   :  { %5186 = vst [vmem:[#allocation18_spill] sm:$0xff] %v3953_v9 }
 0x182   :  { %v3959_v11 = vpop.f32.mrf.mxu0 }
 0x183   :  { %5187 = vst [vmem:[#allocation19_spill] sm:$0xff] %v3959_v11 }
 0x184   :  { %v870_v13 = vpop.f32.mrf.mxu0 }
 0x185   :  { %v871_v14 = vadd.f32 %v870_v13, %v3956_v10 }
 0x186   :  { %v872_v16 = vpop.f32.mrf.mxu0 }
 0x187   :  { %v873_v18 = vadd.f32 %v872_v16, %v3963_v12  ;;  %1202 = vxpose.xlu0.b32.start [1/16] %v871_v14, 128 }
 0x188   :  { %v874_v17 = vpop.f32.mrf.mxu0 }
 0x189   :  { %v875_v20 = vadd.f32 %v874_v17, %v3956_v10  ;;  %1234 = vxpose.xlu1.b32.start [1/16] %v873_v18, 128 }
 0x18a   :  { %v876_v15 = vpop.f32.mrf.mxu0 }
 0x18b   :  { %v877_v21 = vadd.f32 %v876_v15, %v3963_v12  ;;  %1203 = vxpose.xlu0.b32.cont [2/16] %v875_v20, 128 }
 0x18c   :  { %v880_v22 = vpop.f32.mrf.mxu0 }
 0x18d   :  { %v881_v23 = vadd.f32 %v880_v22, %v3956_v10  ;;  %1235 = vxpose.xlu1.b32.cont [2/16] %v877_v21, 128  ;;  %v601_v20 = vpop.f32.mrf.mxu1 }
 0x18e   :  { %v882_v25 = vpop.f32.mrf.mxu0 }
 0x18f   :  { %v883_v26 = vadd.f32 %v882_v25, %v3963_v12  ;;  %1204 = vxpose.xlu0.b32.cont [3/16] %v881_v23, 128  ;;  %v603_v22 = vpop.f32.mrf.mxu1 }
 0x190   :  { %v884_v27 = vpop.f32.mrf.mxu0 }
 0x191   :  { %v885_v28 = vadd.f32 %v884_v27, %v3956_v10  ;;  %1236 = vxpose.xlu1.b32.cont [3/16] %v883_v26, 128  ;;  %v427_v26 = vld [vmem:[%s5129_s5] sm:$0x3]  ;;  %v605_v27 = vpop.f32.mrf.mxu1 }
 0x192   :  { %v886_v19 = vpop.f32.mrf.mxu0 }
 0x193   :  { %v887_v30 = vadd.f32 %v886_v19, %v3963_v12  ;;  %1205 = vxpose.xlu0.b32.cont [4/16] %v885_v28, 128  ;;  %v4002_v19 = vrot.slane %v427_v26, %v3943_v5 }
 0x194   :  { %v890_v32 = vpop.f32.mrf.mxu0 }
 0x195   :  { %v891_v33 = vadd.f32 %v890_v32, %v3956_v10  ;;  %1237 = vxpose.xlu1.b32.cont [4/16] %v887_v30, 128  ;;  %v4005_v30 = vrot.slane %v427_v26, %v3951_v8 }
 0x196   :  { %v892_v34 = vpop.f32.mrf.mxu0 }
 0x197   :  { %v893_v35 = vadd.f32 %v892_v34, %v3963_v12  ;;  %1206 = vxpose.xlu0.b32.cont [5/16] %v891_v33, 128  ;;  %v607_v33 = vpop.f32.mrf.mxu1 }
 0x198   :  { %v894_v36 = vpop.f32.mrf.mxu0 }
 0x199   :  { %v895_v37 = vadd.f32 %v894_v36, %v3956_v10  ;;  %1238 = vxpose.xlu1.b32.cont [5/16] %v893_v35, 128  ;;  %v602_v35 = vadd.f32 %v601_v20, %v4002_v19  ;;  %v604_v36 = vadd.f32 %v603_v22, %v4005_v30 }
 0x19a   :  { %v896_v24 = vpop.f32.mrf.mxu0 }
 0x19b   :  { %v897_v38 = vadd.f32 %v896_v24, %v3963_v12  ;;  %1207 = vxpose.xlu0.b32.cont [6/16] %v895_v37, 128  ;;  %v606_v37 = vadd.f32 %v605_v27, %v4002_v19  ;;  %v608_v24 = vadd.f32 %v607_v33, %v4005_v30 }
 0x19c   :  { %v900_v39 = vpop.f32.mrf.mxu0 }
 0x19d   :  { %v901_v40 = vadd.f32 %v900_v39, %v3956_v10  ;;  %1239 = vxpose.xlu1.b32.cont [6/16] %v897_v38, 128  ;;  %v611_v39 = vpop.f32.mrf.mxu1 }
 0x19e   :  { %v902_v41 = vpop.f32.mrf.mxu0 }
 0x19f   :  { %v903_v42 = vadd.f32 %v902_v41, %v3963_v12  ;;  %1208 = vxpose.xlu0.b32.cont [7/16] %v901_v40, 128  ;;  %v1170_v41 = vpack.c.bf16 %v606_v37, %v602_v35 }
 0x1a0   :  { %v904_v43 = vpop.f32.mrf.mxu0 }
 0x1a1   :  { %v905_v44 = vadd.f32 %v904_v43, %v3956_v10  ;;  %1240 = vxpose.xlu1.b32.cont [7/16] %v903_v42, 128  ;;  %v1171_v42 = vpack.c.bf16 %v608_v24, %v604_v36  ;;  %3073 = vmatprep.mubr.bf16.mxu0 %v1170_v41 }
 0x1a2   :  { %v906_v29 = vpop.f32.mrf.mxu0 }
 0x1a3   :  { %v907_v45 = vadd.f32 %v906_v29, %v3963_v12  ;;  %1209 = vxpose.xlu0.b32.cont [8/16] %v905_v44, 128  ;;  %v613_v44 = vpop.f32.mrf.mxu1  ;;  %3137 = vmatprep.mubr.bf16.mxu1 %v1171_v42 }
 0x1a4   :  { %v910_v46 = vpop.f32.mrf.mxu0 }
 0x1a5   :  { %v911_v47 = vadd.f32 %v910_v46, %v3956_v10  ;;  %1241 = vxpose.xlu1.b32.cont [8/16] %v907_v45, 128  ;;  %v615_v46 = vpop.f32.mrf.mxu1 }
 0x1a6   :  { %v912_v48 = vpop.f32.mrf.mxu0 }
 0x1a7   :  { %v913_v49 = vadd.f32 %v912_v48, %v3963_v12  ;;  %1210 = vxpose.xlu0.b32.cont [9/16] %v911_v47, 128  ;;  %v4016_v48 = vadd.f32 %v611_v39, %v4002_v19 }
 0x1a8   :  { %v914_v50 = vpop.f32.mrf.mxu0 }
 0x1a9   :  { %v915_v51 = vadd.f32 %v914_v50, %v3956_v10  ;;  %1242 = vxpose.xlu1.b32.cont [9/16] %v913_v49, 128  ;;  %v617_v50 = vpop.f32.mrf.mxu1 }
 0x1aa   :  { %v916_v52 = vpop.f32.mrf.mxu0 }
 0x1ab   :  { %v917_v53 = vadd.f32 %v916_v52, %v3963_v12  ;;  %1211 = vxpose.xlu0.b32.cont [10/16] %v915_v51, 128  ;;  %v4020_v52 = vadd.f32 %v613_v44, %v4005_v30 }
 0x1ac   :  { %v920_v31 = vpop.f32.mrf.mxu0 }
 0x1ad   :  { %v921_v55 = vadd.f32 %v920_v31, %v3956_v10  ;;  %1243 = vxpose.xlu1.b32.cont [10/16] %v917_v53, 128  ;;  %v4023_v53 = vadd.f32 %v615_v46, %v4002_v19  ;;  %v4026_v31 = vadd.f32 %v617_v50, %v4005_v30 }
 0x1ae   :  { %v922_v7 = vpop.f32.mrf.mxu0 }
 0x1af   :  { %v923_v13 = vadd.f32 %v922_v7, %v3963_v12  ;;  %1212 = vxpose.xlu0.b32.cont [11/16] %v921_v55, 128  ;;  %v621_v7 = vpop.f32.mrf.mxu1 }
 0x1b0   :  { %v924_v14 = vpop.f32.mrf.mxu0 }
 0x1b1   :  { %v925_v16 = vadd.f32 %v924_v14, %v3956_v10  ;;  %1244 = vxpose.xlu1.b32.cont [11/16] %v923_v13, 128  ;;  %v623_v14 = vpop.f32.mrf.mxu1 }
 0x1b2   :  { %v926_v18 = vpop.f32.mrf.mxu0 }
 0x1b3   :  { %v927_v17 = vadd.f32 %v926_v18, %v3963_v12  ;;  %1213 = vxpose.xlu0.b32.cont [12/16] %v925_v16, 128  ;;  %v625_v16 = vpop.f32.mrf.mxu1  ;;  %v4034_v18 = vadd.f32 %v621_v7, %v4002_v19 }
 0x1b4   :  { %v930_v15 = vpop.f32.mrf.mxu0 }
 0x1b5   :  { %v931_v21 = vadd.f32 %v930_v15, %v3956_v10  ;;  %1245 = vxpose.xlu1.b32.cont [12/16] %v927_v17, 128  ;;  %v4037_v17 = vadd.f32 %v623_v14, %v4005_v30  ;;  %v627_v20 = vpop.f32.mrf.mxu1 }
 0x1b6   :  { %v932_v23 = vpop.f32.mrf.mxu0  ;;  %v4043_v15 = vadd.f32 %v627_v20, %v4005_v30 }
 0x1b7   :  { %v933_v25 = vadd.f32 %v932_v23, %v3963_v12  ;;  %1214 = vxpose.xlu0.b32.cont [13/16] %v931_v21, 128  ;;  %v631_v21 = vpop.f32.mrf.mxu1 }
 0x1b8   :  { %v934_v28 = vpop.f32.mrf.mxu0  ;;  %v4050_v27 = vadd.f32 %v631_v21, %v4002_v19 }
 0x1b9   :  { %v935_v32 = vadd.f32 %v934_v28, %v3956_v10  ;;  %1246 = vxpose.xlu1.b32.cont [13/16] %v933_v25, 128  ;;  %v633_v25 = vpop.f32.mrf.mxu1 }
 0x1ba   :  { %v936_v34 = vpop.f32.mrf.mxu0 }
 0x1bb   :  { %v937_v38 = vadd.f32 %v936_v34, %v3963_v12  ;;  %1215 = vxpose.xlu0.b32.cont [14/16] %v935_v32, 128  ;;  %v635_v26 = vpop.f32.mrf.mxu1  ;;  %v4053_v32 = vadd.f32 %v633_v25, %v4005_v30 }
 0x1bc   :  { %v940_v40 = vpop.f32.mrf.mxu0  ;;  %v4056_v33 = vadd.f32 %v635_v26, %v4002_v19 }
 0x1bd   :  { %v941_v43 = vadd.f32 %v940_v40, %v3956_v10  ;;  %1247 = vxpose.xlu1.b32.cont [14/16] %v937_v38, 128  ;;  %v637_v28 = vpop.f32.mrf.mxu1 }
 0x1be   :  { %v942_v29 = vpop.f32.mrf.mxu0  ;;  %v4059_v34 = vadd.f32 %v637_v28, %v4005_v30 }
 0x1bf   :  { %v943_v45 = vadd.f32 %v942_v29, %v3963_v12  ;;  %1216 = vxpose.xlu0.b32.cont [15/16] %v941_v43, 128  ;;  %v641_v35 = vpop.f32.mrf.mxu1 }
 0x1c0   :  { %v944_v47 = vpop.f32.mrf.mxu0  ;;  %v4066_v39 = vadd.f32 %v641_v35, %v4002_v19 }
 0x1c1   :  { %v945_v49 = vadd.f32 %v944_v47, %v3956_v10  ;;  %1248 = vxpose.xlu1.b32.cont [15/16] %v943_v45, 128  ;;  %v643_v24 = vpop.f32.mrf.mxu1 }
 0x1c2   :  { %v946_v51 = vpop.f32.mrf.mxu0  ;;  %v4069_v41 = vadd.f32 %v643_v24, %v4005_v30 }
 0x1c3   :  { %v947_v55 = vadd.f32 %v946_v51, %v3963_v12  ;;  %1217 = vxpose.xlu0.b32.end [16/16] %v945_v49, 128  ;;  %v4040_v12 = vadd.f32 %v625_v16, %v4002_v19  ;;  %v645_v38 = vpop.f32.mrf.mxu1 }
 0x1c4   :  { %v4072_v42 = vadd.f32 %v645_v38, %v4002_v19 }
 0x1c5   :  { %1249 = vxpose.xlu1.b32.end [16/16] %v947_v55, 128  ;;  %v647_v40 = vpop.f32.mrf.mxu1 }
 0x1c6   :  { %v4075_v43 = vadd.f32 %v647_v40, %v4005_v30 }
 0x1c7   :  { %v651_v44 = vpop.f32.mrf.mxu1 }
 0x1c8   :  { %v4082_v47 = vadd.f32 %v651_v44, %v4002_v19 }
 0x1c9   :  { %v653_v46 = vpop.f32.mrf.mxu1 }
 0x1ca   :  { %v4085_v51 = vadd.f32 %v653_v46, %v4005_v30 }
 0x1cb   :  { %v655_v49 = vpop.f32.mrf.mxu1 }
 0x1cc   :  { %5188 = vst [vmem:[#allocation20_spill] sm:$0xff] %v4085_v51  ;;  %v4088_v55 = vadd.f32 %v655_v49, %v4002_v19 }
 0x1cd   :  { %v657_v50 = vpop.f32.mrf.mxu1 }
 0x1ce   :  { %v4091_v7 = vadd.f32 %v657_v50, %v4005_v30 }
 0x1cf   :  { %v661_v14 = vpop.f32.mrf.mxu1 }
 0x1d0   :  { %v4098_v21 = vadd.f32 %v661_v14, %v4002_v19 }
 0x1d1   :  { %v663_v25 = vpop.f32.mrf.mxu1 }
 0x1d2   :  { %v4101_v35 = vadd.f32 %v663_v25, %v4005_v30 }
 0x1d3   :  { %v665_v26 = vpop.f32.mrf.mxu1 }
 0x1d4   :  { %5189 = vst [vmem:[#allocation21_spill] sm:$0xff] %v4101_v35  ;;  %v4104_v24 = vadd.f32 %v665_v26, %v4002_v19 }
 0x1d5   :  { %v667_v28 = vpop.f32.mrf.mxu1 }
 0x1d6   :  { %v4107_v38 = vadd.f32 %v667_v28, %v4005_v30 }
 0x1d7   :  { %v671_v40 = vpop.f32.mrf.mxu1 }
 0x1d8   :  { %5190 = vst [vmem:[#allocation22_spill] sm:$0xff] %v4107_v38  ;;  %v4114_v49 = vadd.f32 %v671_v40, %v4002_v19 }
 0x1d9   :  { %v673_v50 = vpop.f32.mrf.mxu1 }
 0x1da   :  { %5191 = vst [vmem:[#allocation23_spill] sm:$0xff] %v4114_v49  ;;  %v4117_v0 = vadd.f32 %v673_v50, %v4005_v30 }
 0x1db   :  { %v675_v14 = vpop.f32.mrf.mxu1 }
 0x1dc   :  { %5192 = vst [vmem:[#allocation24_spill] sm:$0xff] %v4117_v0  ;;  %v4120_v26 = vadd.f32 %v675_v14, %v4002_v19 }
 0x1dd   :  { %v677_v25 = vpop.f32.mrf.mxu1 }
 0x1de   :  { %5193 = vst [vmem:[#allocation25_spill] sm:$0xff] %v4120_v26  ;;  %v4123_v28 = vadd.f32 %v677_v25, %v4005_v30 }
 0x1df   :  { %v1091_v9 = vpop.f32.mrf.mxu1 }
 0x1e0   :  { %5194 = vst [vmem:[#allocation26_spill] sm:$0xff] %v4123_v28 }
 0x1e1   :  { %v1093_v6 = vpop.f32.mrf.mxu1 }
 0x1e3   :  { %v1095_v1 = vpop.f32.mrf.mxu1 }
 0x1e5   :  { %v1097_v59 = vpop.f32.mrf.mxu1 }
 0x1e7   :  { %v1101_v58 = vpop.f32.mrf.mxu1 }
 0x1e9   :  { %v1103_v54 = vpop.f32.mrf.mxu1 }
 0x1eb   :  { %v1105_v0 = vpop.f32.mrf.mxu1 }
 0x1ed   :  { %v1107_v49 = vpop.f32.mrf.mxu1 }
 0x203   :  { %v1218_v40 = vpop.trf.xlu0 }
 0x205   :  { %v1250_v44 = vpop.trf.xlu1 }
 0x207   :  { %v1219_v16 = vpop.trf.xlu0 }
 0x208   :  { %v4129_v45 = vpack.c.bf16 %v1219_v16, %v1218_v40 }
 0x209   :  { %v1251_v37 = vpop.trf.xlu1 }
 0x20a   :  { %v4131_v50 = vpack.c.bf16 %v1251_v37, %v1250_v44 }
 0x20b   :  { %v1220_v29 = vpop.trf.xlu0 }
 0x20d   :  { %v1252_v19 = vpop.trf.xlu1 }
 0x20f   :  { %v1221_v14 = vpop.trf.xlu0 }
 0x210   :  { %v4133_v36 = vpack.c.bf16 %v1221_v14, %v1220_v29 }
 0x211   :  { %v1253_v30 = vpop.trf.xlu1 }
 0x212   :  { %v4135_v25 = vpack.c.bf16 %v1253_v30, %v1252_v19  ;;  %v965_v30 = vld [vmem:[%s5130_s9] sm:$0x3] }
 0x213   :  { %v4137_v20 = vpop.trf.xlu0  ;;  %v4163_v22 = vrot.slane %v965_v30, %v3951_v8  ;;  %v4168_v11 = vrot.slane %v965_v30, %v3943_v5 }
 0x215   :  { %v4139_v23 = vpop.trf.xlu1  ;;  %v1092_v2 = vadd.f32 %v1091_v9, %v4168_v11  ;;  %v1094_v3 = vadd.f32 %v1093_v6, %v4163_v22  ;;  %v1096_v61 = vadd.f32 %v1095_v1, %v4168_v11  ;;  %v1098_v60 = vadd.f32 %v1097_v59, %v4163_v22 }
 0x216   :  { %v1102_v9 = vadd.f32 %v1101_v58, %v4168_v11  ;;  %v1104_v6 = vadd.f32 %v1103_v54, %v4163_v22  ;;  %v1106_v1 = vadd.f32 %v1105_v0, %v4168_v11  ;;  %v1108_v59 = vadd.f32 %v1107_v49, %v4163_v22 }
 0x217   :  { %v4141_v46 = vpop.trf.xlu0  ;;  %v4173_v8 = vpack.c.bf16 %v1096_v61, %v1092_v2  ;;  %v4176_v30 = vpack.c.bf16 %v1098_v60, %v1094_v3 }
 0x218   :  { %v4181_v61 = vpack.c.bf16 %v1106_v1, %v1102_v9  ;;  %v4186_v60 = vpack.c.bf16 %v1108_v59, %v1104_v6 }
 0x219   :  { %v4143_v10 = vpop.trf.xlu1  ;;  %5195 = vst [vmem:[#allocation27_spill] sm:$0xff] %v4173_v8  ;;  %5196 = vst [vmem:[#allocation28_spill] sm:$0xff] %v4176_v30  ;;  %v4184_v8 = vpop.f32.mrf.mxu1 }
 0x21a   :  { %5197 = vst [vmem:[#allocation29_spill] sm:$0xff] %v4181_v61  ;;  %5198 = vst [vmem:[#allocation30_spill] sm:$0xff] %v4184_v8 }
 0x21b   :  { %v4145_v16 = vpop.trf.xlu0  ;;  %5199 = vst [vmem:[#allocation31_spill] sm:$0xff] %v4186_v60  ;;  %v1113_v30 = vpop.f32.mrf.mxu1 }
 0x21c   :  { %v1114_v58 = vadd.f32 %v1113_v30, %v4163_v22 }
 0x21d   :  { %v4147_v37 = vpop.trf.xlu1  ;;  %v4189_v26 = vpop.f32.mrf.mxu1 }
 0x21f   :  { %v4149_v44 = vpop.trf.xlu0  ;;  %v1117_v0 = vpop.f32.mrf.mxu1 }
 0x220   :  { %v1118_v9 = vadd.f32 %v1117_v0, %v4163_v22 }
 0x221   :  { %v4151_v40 = vpop.trf.xlu1  ;;  %v4192_v61 = vpop.f32.mrf.mxu1 }
 0x222   :  { %v4194_v6 = vpack.c.bf16 %v1118_v9, %v1114_v58 }
 0x223   :  { %v4153_v29 = vpop.trf.xlu0  ;;  %v1123_v59 = vpop.f32.mrf.mxu1 }
 0x224   :  { %5200 = vst [vmem:[#allocation32_spill] sm:$0xff] %v4194_v6  ;;  %v1124_v30 = vadd.f32 %v1123_v59, %v4163_v22 }
 0x225   :  { %v4155_v19 = vpop.trf.xlu1  ;;  %v4197_v60 = vpop.f32.mrf.mxu1 }
 0x227   :  { %v4157_v14 = vpop.trf.xlu0  ;;  %v1127_v0 = vpop.f32.mrf.mxu1 }
 0x229   :  { %v4165_v13 = vpop.trf.xlu1 }
 0x22b   :  { %v1228_v4 = vpop.trf.xlu0 }
 0x22d   :  { %v1260_v63 = vpop.trf.xlu1 }
 0x22f   :  { %v1229_v62 = vpop.trf.xlu0 }
 0x231   :  { %v1261_v57 = vpop.trf.xlu1 }
 0x233   :  { %v1230_v5 = vpop.trf.xlu0 }
 0x235   :  { %v1262_v56 = vpop.trf.xlu1 }
 0x237   :  { %v1231_v28 = vpop.trf.xlu0 }
 0x238   :  { %v1272_v49 = vpack.c.bf16 %v1231_v28, %v1230_v5  ;;  %v4200_v5 = vpop.f32.mrf.mxu1 }
 0x239   :  { %v1263_v2 = vpop.trf.xlu1 }
 0x23a   :  { %v1280_v51 = vpack.c.bf16 %v1263_v2, %v1262_v56  ;;  %v1128_v56 = vadd.f32 %v1127_v0, %v4163_v22 }
 0x23b   :  { %v1232_v3 = vpop.trf.xlu0 }
 0x23c   :  { %v4204_v28 = vpack.c.bf16 %v1128_v56, %v1124_v30 }
 0x23d   :  { %v1264_v54 = vpop.trf.xlu1 }
 0x23e   :  { %5201 = vst [vmem:[#allocation33_spill] sm:$0xff] %v4204_v28 }
 0x23f   :  { %v1233_v35 = vpop.trf.xlu0 }
 0x240   :  { %v1273_v38 = vpack.c.bf16 %v1233_v35, %v1232_v3  ;;  %v1271_v35 = vpack.c.bf16 %v1229_v62, %v1228_v4  ;;  %v1279_v3 = vpack.c.bf16 %v1261_v57, %v1260_v63  ;;  %v1278_v57 = vpack.c.bf16 %v4165_v13, %v4155_v19 }
 0x241   :  { %v1265_v1 = vpop.trf.xlu1  ;;  %v1269_v4 = vpack.c.bf16 %v4149_v44, %v4145_v16  ;;  %v1268_v13 = vpack.c.bf16 %v4141_v46, %v4137_v20  ;;  %v1276_v16 = vpack.c.bf16 %v4143_v10, %v4139_v23 }
 0x242   :  { %v1281_v8 = vpack.c.bf16 %v1265_v1, %v1264_v54  ;;  %3057 = vmatprep.subr.bf16.mxu0 %v1273_v38 }
 0x243   :  { %3058 = vmatpush3.bf16.msra.mxu0 %v1273_v38  ;;  %v1270_v38 = vpack.c.bf16 %v4157_v14, %v4153_v29  ;;  %v1277_v29 = vpack.c.bf16 %v4151_v40, %v4147_v37 }
 0x244   :  { %3059 = vmatprep.subr.bf16.mxu0 %v1272_v49  ;;  %3121 = vmatprep.subr.bf16.mxu1 %v1281_v8 }
 0x245   :  { %3122 = vmatpush3.bf16.msra.mxu1 %v1281_v8  ;;  %v1133_v8 = vpop.f32.mrf.mxu1 }
 0x246   :  { %3123 = vmatprep.subr.bf16.mxu1 %v1280_v51  ;;  %v1134_v62 = vadd.f32 %v1133_v8, %v4163_v22  ;;  %v5208_v8 = vpack.c.bf16 %v4072_v42, %v4066_v39  ;;  %v1126_v39 = vadd.f32 %v4197_v60, %v4168_v11  ;;  %v5212_v42 = vpack.c.bf16 %v4104_v24, %v4098_v21  ;;  %v5219_v24 = vld [vmem:[#allocation25_spill] sm:$0xff] }
 0x247   :  { %3060 = vmatpush3.bf16.msra.mxu0 %v1272_v49  ;;  %v1135_v63 = vpop.f32.mrf.mxu1  ;;  %v1116_v60 = vadd.f32 %v4189_v26, %v4168_v11 }
 0x248   :  { %3061 = vmatprep.subr.bf16.mxu0 %v1271_v35 }
 0x249   :  { %3124 = vmatpush3.bf16.msra.mxu1 %v1280_v51  ;;  %v1137_v51 = vpop.f32.mrf.mxu1 }
 0x24a   :  { %3125 = vmatprep.subr.bf16.mxu1 %v1279_v3  ;;  %v1138_v14 = vadd.f32 %v1137_v51, %v4163_v22  ;;  %v5220_v51 = vld [vmem:[#allocation23_spill] sm:$0xff] }
 0x24b   :  { %3062 = vmatpush3.bf16.msra.mxu0 %v1271_v35  ;;  %v1141_v2 = vpop.f32.mrf.mxu1 }
 0x24c   :  { %3063 = vmatprep.subr.bf16.mxu0 %v1270_v38  ;;  %v4216_v19 = vpack.c.bf16 %v1138_v14, %v1134_v62  ;;  %v5223_v14 = vld [vmem:[#allocation24_spill] sm:$0xff] }
 0x24d   :  { %3126 = vmatpush3.bf16.msra.mxu1 %v1279_v3  ;;  %v1143_v58 = vpop.f32.mrf.mxu1 }
 0x24e   :  { %3127 = vmatprep.subr.bf16.mxu1 %v1278_v57  ;;  %5202 = vst [vmem:[#allocation34_spill] sm:$0xff] %v4216_v19  ;;  %v1144_v44 = vadd.f32 %v1143_v58, %v4163_v22 }
 0x24f   :  { %3064 = vmatpush3.bf16.msra.mxu0 %v1270_v38  ;;  %v1145_v37 = vpop.f32.mrf.mxu1 }
 0x250   :  { %3065 = vmatprep.subr.bf16.mxu0 %v1269_v4 }
 0x251   :  { %3128 = vmatpush3.bf16.msra.mxu1 %v1278_v57  ;;  %v1147_v40 = vpop.f32.mrf.mxu1  ;;  %v1136_v57 = vadd.f32 %v1135_v63, %v4168_v11 }
 0x252   :  { %3129 = vmatprep.subr.bf16.mxu1 %v1277_v29  ;;  %v1148_v20 = vadd.f32 %v1147_v40, %v4163_v22 }
 0x253   :  { %3066 = vmatpush3.bf16.msra.mxu0 %v1269_v4  ;;  %v1151_v46 = vpop.f32.mrf.mxu1  ;;  %v5216_v4 = vld [vmem:[#allocation22_spill] sm:$0xff] }
 0x254   :  { %3067 = vmatprep.subr.bf16.mxu0 %v1268_v13  ;;  %v4224_v54 = vpack.c.bf16 %v1148_v20, %v1144_v44  ;;  %v1152_v3 = vadd.f32 %v1151_v46, %v4168_v11 }
 0x255   :  { %3130 = vmatpush3.bf16.msra.mxu1 %v1277_v29  ;;  %v1153_v10 = vpop.f32.mrf.mxu1  ;;  %v5221_v29 = vpack.c.bf16 %v5219_v24, %v5220_v51 }
 0x256   :  { %3131 = vmatprep.subr.bf16.mxu1 %v1276_v16  ;;  %v1154_v23 = vadd.f32 %v1153_v10, %v4163_v22 }
 0x257   :  { %3068 = vmatpush3.bf16.msra.mxu0 %v1268_v13  ;;  %v1155_v9 = vpop.f32.mrf.mxu1 }
 0x258   :  { %3069 = vmatprep.subr.bf16.mxu0 %v4133_v36 }
 0x259   :  { %3132 = vmatpush3.bf16.msra.mxu1 %v1276_v16  ;;  %v1157_v1 = vpop.f32.mrf.mxu1  ;;  %v5226_v16 = vld [vmem:[#allocation29_spill] sm:$0xff] }
 0x25a   :  { %3133 = vmatprep.subr.bf16.mxu1 %v4135_v25  ;;  %v1158_v49 = vadd.f32 %v1157_v1, %v4163_v22 }
 0x25b   :  { %3070 = vmatpush3.bf16.msra.mxu0 %v4133_v36  ;;  %v1161_v59 = vpop.f32.mrf.mxu1  ;;  %v5203_v36 = vpack.c.bf16 %v4023_v53, %v4016_v48  ;;  %v5206_v48 = vpack.c.bf16 %v4043_v15, %v4037_v17  ;;  %v5209_v17 = vpack.c.bf16 %v4059_v34, %v4053_v32  ;;  %v1132_v15 = vadd.f32 %v4200_v5, %v4168_v11 }
 0x25c   :  { %3071 = vmatprep.subr.bf16.mxu0 %v4129_v45  ;;  %v4237_v30 = vpack.c.bf16 %v1158_v49, %v1154_v23  ;;  %v1162_v0 = vadd.f32 %v1161_v59, %v4168_v11  ;;  %v5211_v34 = vpack.c.bf16 %v4088_v55, %v4082_v47  ;;  %v5217_v47 = vld [vmem:[#allocation21_spill] sm:$0xff] }
 0x25d   :  { %3134 = vmatpush3.bf16.msra.mxu1 %v4135_v25  ;;  %v5204_v25 = vpack.c.bf16 %v4040_v12, %v4034_v18  ;;  %v1163_v35 = vpop.f32.mrf.mxu1  ;;  %v1142_v18 = vadd.f32 %v1141_v2, %v4168_v11  ;;  %v1146_v12 = vadd.f32 %v1145_v37, %v4168_v11  ;;  %v1194_v32 = vpack.c.bf16 %v1136_v57, %v1132_v15  ;;  %v5227_v37 = vld [vmem:[#allocation27_spill] sm:$0xff] }
 0x25e   :  { %3135 = vmatprep.subr.bf16.mxu1 %v4131_v50  ;;  %v5218_v55 = vpack.c.bf16 %v5216_v4, %v5217_v47  ;;  %v1164_v13 = vadd.f32 %v1163_v35, %v4163_v22 }
 0x25f   :  { %3072 = vmatpush3.bf16.msra.mxu0 %v4129_v45  ;;  %v5205_v45 = vpack.c.bf16 %v4026_v31, %v4020_v52  ;;  %v1165_v53 = vpop.f32.mrf.mxu1  ;;  %v5207_v31 = vpack.c.bf16 %v4056_v33, %v4050_v27  ;;  %v1196_v62 = vpack.c.bf16 %v1146_v12, %v1142_v18  ;;  %v5210_v27 = vpack.c.bf16 %v4075_v43, %v4069_v41  ;;  %v5213_v41 = vld [vmem:[#allocation20_spill] sm:$0xff] }
 0x260   :  { %v1166_v56 = vadd.f32 %v1165_v53, %v4168_v11  ;;  %v1122_v33 = vadd.f32 %v4192_v61, %v4168_v11  ;;  %v5214_v43 = vpack.c.bf16 %v4091_v7, %v5213_v41  ;;  %v5215_v61 = vld [vmem:[#allocation30_spill] sm:$0xff] }
 0x261   :  { %3136 = vmatpush3.bf16.msra.mxu1 %v4131_v50  ;;  %v1156_v50 = vadd.f32 %v1155_v9, %v4168_v11  ;;  %v1112_v5 = vadd.f32 %v5215_v61, %v4168_v11  ;;  %v5222_v7 = vld [vmem:[#allocation26_spill] sm:$0xff]  ;;  %v5225_v11 = vmov 0   ;;  %v1167_v26 = vpop.f32.mrf.mxu1 }
 0x262   :  { %3074 = vmatmul.mubr.bf16.vlgmr.msra.gmra.mxu0 %v5203_v36  ;;  %v1200_v52 = vpack.c.bf16 %v1166_v56, %v1162_v0  ;;  %v1192_v63 = vpack.c.bf16 %v1126_v39, %v1122_v33  ;;  %v5224_v2 = vpack.c.bf16 %v5222_v7, %v5223_v14  ;;  %v1168_v58 = vadd.f32 %v1167_v26, %v4163_v22  ;;  %v5228_v22 = vld [vmem:[#allocation3_spill] sm:$0xff]  ;;  %v5233_v33 = vld [vmem:[#allocation6_spill] sm:$0xff]  ;;  %v5234_v39 = vld [vmem:[#allocation9_spill] sm:$0xff] }
 0x263   :  { %3077 = vmatprep.mubr.bf16.mxu0 %v5204_v25  ;;  %v1198_v38 = vpack.c.bf16 %v1156_v50, %v1152_v3  ;;  %v1190_v21 = vpack.c.bf16 %v1116_v60, %v1112_v5  ;;  %vm395_vm0 = vcmp.gt.f32.partialorder %v5228_v22, 0.0  ;;  %v5230_v3 = vld [vmem:[#allocation5_spill] sm:$0xff]  ;;  %vm401_vm5 = vcmp.gt.f32.partialorder %v5233_v33, 0.0  ;;  %v5235_v60 = vld [vmem:[#allocation8_spill] sm:$0xff]  ;;  %v5237_v7 = vld [vmem:[#allocation10_spill] sm:$0xff] }
 0x264   :  { %3138 = vmatmul.mubr.bf16.vlgmr.msra.gmra.mxu1 %v5205_v45  ;;  %3089 = vmatprep.subr.bf16.mxu0 %v1200_v52  ;;  %v4300_v44 = vpack.c.bf16 %v1168_v58, %v1164_v13  ;;  %v5229_v45 = vld [vmem:[#allocation2_spill] sm:$0xff]  ;;  %vm396_vm2 = vcmp.gt.f32.partialorder %v5230_v3, 0.0  ;;  %vm400_vm6 = vcmp.gt.f32.partialorder %v5234_v39, 0.0  ;;  %vm402_vm7 = vcmp.gt.f32.partialorder %v5235_v60, 0.0  ;;  %v5238_v14 = vld [vmem:[#allocation13_spill] sm:$0xff] }
 0x265   :  { %3141 = vmatprep.mubr.bf16.mxu1 %v5206_v48  ;;  %3090 = vmatpush3.bf16.msra.mxu0 %v1200_v52  ;;  %vm397_vm1 = vcmp.gt.f32.partialorder %v5229_v45, 0.0  ;;  %v5232_v52 = vld [vmem:[#allocation7_spill] sm:$0xff]  ;;  %vm405_vm9 = vcmp.gt.f32.partialorder %v5237_v7, 0.0  ;;  %vm404_vm10 = vcmp.gt.f32.partialorder %v5238_v14, 0.0 }
 0x266   :  { %3091 = vmatprep.subr.bf16.mxu0 %v1198_v38  ;;  %vm399_vm4 = vcmp.gt.f32.partialorder %v5232_v52, 0.0 }
 0x269   :  { %3092 = vmatpush3.bf16.msra.mxu0 %v1198_v38  ;;  %v5231_v38 = vld [vmem:[#allocation4_spill] sm:$0xff] }
 0x26a   :  { %3078 = vmatmul.mubr.bf16.gmra.mxu0 %v5207_v31  ;;  %3093 = vmatprep.subr.bf16.mxu0 %v1196_v62  ;;  %vm398_vm3 = vcmp.gt.f32.partialorder %v5231_v38, 0.0 }
 0x26b   :  { %3081 = vmatprep.mubr.bf16.mxu0 %v5208_v8 }
 0x26c   :  { %3142 = vmatmul.mubr.bf16.gmra.mxu1 %v5209_v17 }
 0x26d   :  { %3145 = vmatprep.mubr.bf16.mxu1 %v5210_v27  ;;  %3094 = vmatpush3.bf16.msra.mxu0 %v1196_v62 }
 0x26e   :  { %3095 = vmatprep.subr.bf16.mxu0 %v1194_v32 }
 0x271   :  { %3096 = vmatpush3.bf16.msra.mxu0 %v1194_v32 }
 0x272   :  { %3082 = vmatmul.mubr.bf16.gmra.mxu0 %v5211_v34  ;;  %3097 = vmatprep.subr.bf16.mxu0 %v1192_v63 }
 0x273   :  { %3085 = vmatprep.mubr.bf16.mxu0 %v5212_v42 }
 0x274   :  { %3146 = vmatmul.mubr.bf16.gmra.mxu1 %v5214_v43 }
 0x275   :  { %3149 = vmatprep.mubr.bf16.mxu1 %v5218_v55  ;;  %3098 = vmatpush3.bf16.msra.mxu0 %v1192_v63  ;;  %v5236_v63 = vld [vmem:[#allocation11_spill] sm:$0xff] }
 0x276   :  { %3099 = vmatprep.subr.bf16.mxu0 %v1190_v21  ;;  %vm403_vm8 = vcmp.gt.f32.partialorder %v5236_v63, 0.0 }
 0x279   :  { %3100 = vmatpush3.bf16.msra.mxu0 %v1190_v21 }
 0x27a   :  { %3086 = vmatmul.mubr.bf16.gmra.mxu0 %v5221_v29  ;;  %3101 = vmatprep.subr.bf16.mxu0 %v5226_v16 }
 0x27c   :  { %3150 = vmatmul.mubr.bf16.gmra.mxu1 %v5224_v2 }
 0x27d   :  { %2294 = vmatprep.mubr.bf16.mxu1 %v5225_v11  ;;  %3102 = vmatpush3.bf16.msra.mxu0 %v5226_v16 }
 0x27e   :  { %3103 = vmatprep.subr.bf16.mxu0 %v5227_v37 }
 0x281   :  { %3104 = vmatpush3.bf16.msra.mxu0 %v5227_v37 }
 0x282   :  { %3153 = vmatprep.subr.bf16.mxu0 %v4300_v44 }
 0x322   :  { %v3075_v40 = vpop.f32.mrf.mxu0 }
 0x323   :  { %v1381_v1 = vmul.f32 0.17677669, %v3075_v40 }
 0x324   :  { %v1316_v20 = vpop.f32.mrf.mxu0  ;;  %v4305_v46 = vpop.f32.mrf.mxu1 }
 0x325   :  { %v1379_v10 = vmul.f32 0.17677669, %v1316_v20  ;;  %v4321_v0 = vsel %vm397_vm1, %v1381_v1, -1e+30  ;;  %v5239_v20 = vld [vmem:[#allocation12_spill] sm:$0xff] }
 0x326   :  { %v3076_v23 = vpop.f32.mrf.mxu0  ;;  %v4307_v9 = vpop.f32.mrf.mxu1  ;;  %vm406_vm11 = vcmp.gt.f32.partialorder %v5239_v20, 0.0 }
 0x327   :  { %v4312_v49 = vsel %vm395_vm0, %v1379_v10, -1e+30  ;;  %v1382_v50 = vmul.f32 0.17677669, %v3076_v23  ;;  %v5240_v10 = vld [vmem:[#allocation16_spill] sm:$0xff] }
 0x328   :  { %v4314_v59 = vpop.f32.mrf.mxu1  ;;  %1411 = vmax.xlane.f32.xlu0 %v4312_v49  ;;  %v1319_v36 = vpop.f32.mrf.mxu0  ;;  %vm407_vm12 = vcmp.gt.f32.partialorder %v5240_v10, 0.0 }
 0x329   :  { %v1380_v25 = vmul.f32 0.17677669, %v1319_v36  ;;  %v4335_v8 = vsel %vm398_vm3, %v1382_v50, -1e+30 }
 0x32a   :  { %v3079_v35 = vpop.f32.mrf.mxu0  ;;  %v4327_v53 = vpop.f32.mrf.mxu1 }
 0x32b   :  { %v4325_v48 = vsel %vm396_vm2, %v1380_v25, -1e+30  ;;  %v1385_v31 = vmul.f32 0.17677669, %v3079_v35 }
 0x32c   :  { %1415 = vmax.xlane.f32.xlu0 %v4321_v0  ;;  %1413 = vmax.xlane.f32.xlu1 %v4325_v48  ;;  %v1332_v56 = vpop.f32.mrf.mxu0  ;;  %v4341_v15 = vpop.f32.mrf.mxu1 }
 0x32d   :  { %v1383_v18 = vmul.f32 0.17677669, %v1332_v56  ;;  %v4349_v34 = vsel %vm401_vm5, %v1385_v31, -1e+30  ;;  %v1821_v56 = vmul.f32 0.17677669, %v4307_v9 }
 0x32e   :  { %v3080_v12 = vpop.f32.mrf.mxu0  ;;  %v1774_v41 = vpop.f32.mrf.mxu1  ;;  %v1823_v9 = vmul.f32 0.17677669, %v4305_v46 }
 0x32f   :  { %v4339_v17 = vsel %vm399_vm4, %v1383_v18, -1e+30  ;;  %v1386_v32 = vmul.f32 0.17677669, %v3080_v12  ;;  %v5241_v18 = vld [vmem:[#allocation14_spill] sm:$0xff]  ;;  %v5242_v12 = vld [vmem:[#allocation19_spill] sm:$0xff] }
 0x330   :  { %1417 = vmax.xlane.f32.xlu0 %v4335_v8  ;;  %1419 = vmax.xlane.f32.xlu1 %v4339_v17  ;;  %v1335_v57 = vpop.f32.mrf.mxu0  ;;  %v3144_v21 = vpop.f32.mrf.mxu1  ;;  %vm409_vm13 = vcmp.gt.f32.partialorder %v5241_v18, 0.0  ;;  %vm408_vm14 = vcmp.gt.f32.partialorder %v5242_v12, 0.0  ;;  %v1825_v46 = vmul.f32 0.17677669, %v1774_v41 }
 0x331   :  { %v1384_v62 = vmul.f32 0.17677669, %v1335_v57  ;;  %v4361_v47 = vsel %vm402_vm7, %v1386_v32, -1e+30  ;;  %v5243_v32 = vld [vmem:[#allocation18_spill] sm:$0xff] }
 0x332   :  { %v3083_v27 = vpop.f32.mrf.mxu0  ;;  %v1777_v58 = vpop.f32.mrf.mxu1  ;;  %vm410_vm15 = vcmp.gt.f32.partialorder %v5243_v32, 0.0 }
 0x333   :  { %v4353_v42 = vsel %vm400_vm6, %v1384_v62, -1e+30  ;;  %v1389_v4 = vmul.f32 0.17677669, %v3083_v27  ;;  %v1826_v41 = vmul.f32 0.17677669, %v1777_v58 }
 0x334   :  { %1423 = vmax.xlane.f32.xlu1 %v4349_v34  ;;  %1421 = vmax.xlane.f32.xlu0 %v4353_v42  ;;  %v1348_v43 = vpop.f32.mrf.mxu0  ;;  %v3147_v25 = vpop.f32.mrf.mxu1 }
 0x335   :  { %v1387_v61 = vmul.f32 0.17677669, %v1348_v43  ;;  %v4373_v26 = vsel %vm405_vm9, %v1389_v4, -1e+30  ;;  %v1822_v43 = vmul.f32 0.17677669, %v4327_v53 }
 0x336   :  { %v3084_v5 = vpop.f32.mrf.mxu0  ;;  %v1790_v27 = vpop.f32.mrf.mxu1 }
 0x337   :  { %v4365_v55 = vsel %vm403_vm8, %v1387_v61, -1e+30  ;;  %v1390_v2 = vmul.f32 0.17677669, %v3084_v5  ;;  %v4411_v61 = vsel %vm395_vm0, %v1821_v56, -1e+30 }
 0x338   :  { %1425 = vmax.xlane.f32.xlu0 %v4361_v47  ;;  %1427 = vmax.xlane.f32.xlu1 %v4365_v55  ;;  %v1351_v24 = vpop.f32.mrf.mxu0  ;;  %v3148_v4 = vpop.f32.mrf.mxu1  ;;  %v4426_v53 = vsel %vm396_vm2, %v1822_v43, -1e+30  ;;  %v1831_v56 = vmul.f32 0.17677669, %v3147_v25 }
 0x339   :  { %v1388_v51 = vmul.f32 0.17677669, %v1351_v24  ;;  %v4385_v1 = vsel %vm406_vm11, %v1390_v2, -1e+30  ;;  %v1824_v24 = vmul.f32 0.17677669, %v4314_v59 }
 0x33a   :  { %v3087_v29 = vpop.f32.mrf.mxu0  ;;  %v1827_v59 = vmul.f32 0.17677669, %v4341_v15 }
 0x33b   :  { %v4377_v13 = vsel %vm404_vm10, %v1388_v51, -1e+30  ;;  %v1393_v23 = vmul.f32 0.17677669, %v3087_v29  ;;  %v4422_v51 = vsel %vm397_vm1, %v1823_v9, -1e+30  ;;  %v1793_v29 = vpop.f32.mrf.mxu1 }
 0x33c   :  { %1431 = vmax.xlane.f32.xlu1 %v4373_v26  ;;  %1429 = vmax.xlane.f32.xlu0 %v4377_v13  ;;  %v1364_v16 = vpop.f32.mrf.mxu0  ;;  %v4432_v2 = vsel %vm398_vm3, %v1824_v24, -1e+30  ;;  %v1832_v9 = vmul.f32 0.17677669, %v3148_v4  ;;  %v4463_v24 = vsel %vm405_vm9, %v1831_v56, -1e+30 }
 0x33d   :  { %v1391_v37 = vmul.f32 0.17677669, %v1364_v16  ;;  %v4398_v57 = vsel %vm409_vm13, %v1393_v23, -1e+30  ;;  %v4437_v16 = vsel %vm399_vm4, %v1825_v46, -1e+30 }
 0x33e   :  { %v3088_v40 = vpop.f32.mrf.mxu0  ;;  %v1829_v23 = vmul.f32 0.17677669, %v1790_v27  ;;  %v3293_v56 = vld [vmem:[%s5131_s10 + $0x70] ss:$8 sps:$4 sm:$0xff]  }
 0x33f   :  { %v4389_v36 = vsel %vm407_vm12, %v1391_v37, -1e+30  ;;  %v1394_v31 = vmul.f32 0.17677669, %v3088_v40  ;;  %v3151_v37 = vpop.f32.mrf.mxu1  ;;  %v1828_v40 = vmul.f32 0.17677669, %v3144_v21 }
 0x340   :  { %1433 = vmax.xlane.f32.xlu0 %v4385_v1  ;;  %1435 = vmax.xlane.f32.xlu1 %v4389_v36  ;;  %v1367_v35 = vpop.f32.mrf.mxu0  ;;  %v1830_v21 = vmul.f32 0.17677669, %v1793_v29  ;;  %v4473_v29 = vsel %vm406_vm11, %v1832_v9, -1e+30  ;;  %v3296_v9 = vld [vmem:[%s5131_s10 + $0x60] ss:$8 sps:$4 sm:$0xff]  }
 0x341   :  { %v1392_v50 = vmul.f32 0.17677669, %v1367_v35  ;;  %v4415_v5 = vsel %vm410_vm15, %v1394_v31, -1e+30  ;;  %v4443_v35 = vsel %vm401_vm5, %v1827_v59, -1e+30  ;;  %v1806_v15 = vpop.f32.mrf.mxu1 }
 0x342   :  { %v4453_v58 = vsel %vm402_vm7, %v1828_v40, -1e+30  ;;  %v4457_v31 = vsel %vm403_vm8, %v1829_v23, -1e+30  ;;  %v1833_v43 = vmul.f32 0.17677669, %v1806_v15 }
 0x343   :  { %v4402_v62 = vsel %vm408_vm14, %v1392_v50, -1e+30  ;;  %v4447_v50 = vsel %vm400_vm6, %v1826_v41, -1e+30  ;;  %v3152_v27 = vpop.f32.mrf.mxu1  ;;  %v4467_v46 = vsel %vm404_vm10, %v1830_v21, -1e+30 }
 0x344   :  { %1439 = vmax.xlane.f32.xlu1 %v4398_v57  ;;  %1437 = vmax.xlane.f32.xlu0 %v4402_v62  ;;  %v1835_v59 = vmul.f32 0.17677669, %v3151_v37  ;;  %v4477_v41 = vsel %vm407_vm12, %v1833_v43, -1e+30  ;;  %v1836_v40 = vmul.f32 0.17677669, %v3152_v27 }
 0x345   :  { %v1809_v25 = vpop.f32.mrf.mxu1  ;;  %v3295_v21 = vld [vmem:[%s5131_s10 + $0x74] ss:$8 sps:$4 sm:$0xff]   ;;  %v3298_v27 = vld [vmem:[%s5131_s10 + $0x64] ss:$8 sps:$4 sm:$0xff]  }
 0x346   :  { %v1834_v4 = vmul.f32 0.17677669, %v1809_v25  ;;  %v4483_v23 = vsel %vm409_vm13, %v1835_v59, -1e+30  ;;  %v4493_v37 = vsel %vm410_vm15, %v1836_v40, -1e+30  ;;  %2262 = vmatprep.subr.bf16.mxu1 %v3295_v21 }
 0x347   :  { %2263 = vmatpush1.bf16.msra.mxu1 %v3293_v56  ;;  %v3301_v43 = vld [vmem:[%s5131_s10 + $0x54] ss:$8 sps:$4 sm:$0xff]   ;;  %v3299_v25 = vld [vmem:[%s5131_s10 + $0x50] ss:$8 sps:$4 sm:$0xff]   ;;  %v3304_v59 = vld [vmem:[%s5131_s10 + $0x44] ss:$8 sps:$4 sm:$0xff]  }
 0x348   :  { %1853 = vmax.xlane.f32.xlu1 %v4411_v61  ;;  %1441 = vmax.xlane.f32.xlu0 %v4415_v5  ;;  %v4487_v15 = vsel %vm408_vm14, %v1834_v4, -1e+30  ;;  %v3302_v4 = vld [vmem:[%s5131_s10 + $0x40] ss:$8 sps:$4 sm:$0xff]   ;;  %v3307_v40 = vld [vmem:[%s5131_s10 + $0x34] ss:$8 sps:$4 sm:$0xff]  }
 0x349   :  { %2264 = vmatprep.subr.bf16.mxu1 %v3298_v27  ;;  %v3305_v56 = vld [vmem:[%s5131_s10 + $0x30] ss:$8 sps:$4 sm:$0xff]   ;;  %v3310_v21 = vld [vmem:[%s5131_s10 + $0x24] ss:$8 sps:$4 sm:$0xff]   ;;  %v3308_v27 = vld [vmem:[%s5131_s10 + $0x20] ss:$8 sps:$4 sm:$0xff]  }
 0x34b   :  { %2265 = vmatpush1.bf16.msra.mxu1 %v3296_v9  ;;  %v3313_v9 = vld [vmem:[%s5131_s10 + $0x14] ss:$8 sps:$4 sm:$0xff]  }
 0x34c   :  { %1857 = vmax.xlane.f32.xlu1 %v4422_v51  ;;  %1855 = vmax.xlane.f32.xlu0 %v4426_v53 }
 0x34d   :  { %2266 = vmatprep.subr.bf16.mxu1 %v3301_v43  ;;  %v3311_v43 = vld [vmem:[%s5131_s10 + $0x10] ss:$8 sps:$4 sm:$0xff]  }
 0x34f   :  { %2267 = vmatpush1.bf16.msra.mxu1 %v3299_v25  ;;  %v3316_v25 = vld [vmem:[%s5131_s10 + $0x4] ss:$8 sps:$4 sm:$0xff]  }
 0x350   :  { %1861 = vmax.xlane.f32.xlu1 %v4437_v16  ;;  %1859 = vmax.xlane.f32.xlu0 %v4432_v2 }
 0x351   :  { %2268 = vmatprep.subr.bf16.mxu1 %v3304_v59  ;;  %v3314_v59 = vld [vmem:[%s5131_s10] ss:$8 sps:$4 sm:$0xff]  }
 0x353   :  { %2269 = vmatpush1.bf16.msra.mxu1 %v3302_v4  ;;  %v3461_v4 = vld [vmem:[%s5126_s1] sm:$0xff]  }
 0x354   :  { %1865 = vmax.xlane.f32.xlu1 %v4443_v35  ;;  %1863 = vmax.xlane.f32.xlu0 %v4447_v50 }
 0x355   :  { %2270 = vmatprep.subr.bf16.mxu1 %v3307_v40 }
 0x357   :  { %2271 = vmatpush1.bf16.msra.mxu1 %v3305_v56 }
 0x358   :  { %1869 = vmax.xlane.f32.xlu1 %v4457_v31  ;;  %1867 = vmax.xlane.f32.xlu0 %v4453_v58 }
 0x359   :  { %2272 = vmatprep.subr.bf16.mxu1 %v3310_v21  ;;  %v3462_v21 = vld [vmem:[%s5126_s1 + $0x8] sm:$0xff]  }
 0x35b   :  { %2273 = vmatpush1.bf16.msra.mxu1 %v3308_v27 }
 0x35c   :  { %1873 = vmax.xlane.f32.xlu1 %v4463_v24  ;;  %1871 = vmax.xlane.f32.xlu0 %v4467_v46 }
 0x35d   :  { %2274 = vmatprep.subr.bf16.mxu1 %v3313_v9 }
 0x35f   :  { %2275 = vmatpush1.bf16.msra.mxu1 %v3311_v43 }
 0x360   :  { %1877 = vmax.xlane.f32.xlu1 %v4477_v41  ;;  %1875 = vmax.xlane.f32.xlu0 %v4473_v29 }
 0x361   :  { %2276 = vmatprep.subr.bf16.mxu1 %v3316_v25 }
 0x363   :  { %2277 = vmatpush1.bf16.msra.mxu1 %v3314_v59 }
 0x364   :  { %1881 = vmax.xlane.f32.xlu1 %v4483_v23  ;;  %1879 = vmax.xlane.f32.xlu0 %v4487_v15 }
 0x366   :  { %2295 = vmatmul.mubr.bf16.vlgmr.msra.gmra.mxu1 %v3461_v4 }
 0x367   :  { %2304 = vmatprep.mubr.bf16.mxu1 %v5225_v11 }
 0x368   :  { %1883 = vmax.xlane.f32.xlu0 %v4493_v37 }
 0x36e   :  { %2305 = vmatmul.mubr.bf16.gmra.mxu1 %v3462_v21 }
 0x36f   :  { %2314 = vmatprep.mubr.bf16.mxu1 %v5225_v11 }
 0x3b1   :  { %v1412_v40 = vpop.xlane.xlu0 %1411 }
 0x3b2   :  { %v1443_v56 = vsub.f32 %v4312_v49, %v1412_v40 }
 0x3b4   :  { %v1459_v27 = vmul.f32 1.442695, %v1443_v56  ;;  %v3463_v56 = vld [vmem:[%s5126_s1 + $0x10] sm:$0xff]  }
 0x3b5   :  { %v1416_v9 = vpop.xlane.xlu0 %1415  ;;  %v1414_v43 = vpop.xlane.xlu1 %1413  ;;  %2315 = vmatmul.mubr.bf16.gmra.mxu1 %v3463_v56 }
 0x3b6   :  { %3333 = vpow2.f32 %v1459_v27  ;;  %v1445_v25 = vsub.f32 %v4321_v0, %v1416_v9  ;;  %v1444_v59 = vsub.f32 %v4325_v48, %v1414_v43  ;;  %2324 = vmatprep.mubr.bf16.mxu1 %v5225_v11 }
 0x3b8   :  { %v1463_v4 = vmul.f32 1.442695, %v1445_v25  ;;  %v1461_v6 = vmul.f32 1.442695, %v1444_v59 }
 0x3b9   :  { %v1418_v28 = vpop.xlane.xlu0 %1417  ;;  %v1420_v19 = vpop.xlane.xlu1 %1419 }
 0x3ba   :  { %3335 = vpow2.f32 %v1463_v4  ;;  %v1446_v49 = vsub.f32 %v4335_v8, %v1418_v28  ;;  %v1447_v40 = vsub.f32 %v4339_v17, %v1420_v19  ;;  %v3464_v4 = vld [vmem:[%s5126_s1 + $0x18] sm:$0xff]  }
 0x3bb   :  { %3337 = vpow2.f32 %v1461_v6 }
 0x3bc   :  { %v1465_v21 = vmul.f32 1.442695, %v1446_v49  ;;  %v1467_v27 = vmul.f32 1.442695, %v1447_v40 }
 0x3bd   :  { %v1424_v0 = vpop.xlane.xlu1 %1423  ;;  %v1422_v48 = vpop.xlane.xlu0 %1421  ;;  %2325 = vmatmul.mubr.bf16.gmra.mxu1 %v3464_v4 }
 0x3be   :  { %3339 = vpow2.f32 %v1465_v21  ;;  %v1449_v9 = vsub.f32 %v4349_v34, %v1424_v0  ;;  %v1448_v43 = vsub.f32 %v4353_v42, %v1422_v48  ;;  %2334 = vmatprep.mubr.bf16.mxu1 %v5225_v11 }
 0x3bf   :  { %3341 = vpow2.f32 %v1467_v27 }
 0x3c0   :  { %v1471_v28 = vmul.f32 1.442695, %v1449_v9  ;;  %v1469_v19 = vmul.f32 1.442695, %v1448_v43 }
 0x3c1   :  { %v1426_v6 = vpop.xlane.xlu0 %1425  ;;  %v1428_v8 = vpop.xlane.xlu1 %1427 }
 0x3c2   :  { %3343 = vpow2.f32 %v1471_v28  ;;  %v1450_v17 = vsub.f32 %v4361_v47, %v1426_v6  ;;  %v1451_v25 = vsub.f32 %v4365_v55, %v1428_v8  ;;  %v3465_v8 = vld [vmem:[%s5126_s1 + $0x20] sm:$0xff]  }
 0x3c3   :  { %v3334_v59 = vpop.eup %3333  ;;  %3345 = vpow2.f32 %v1469_v19 }
 0x3c4   :  { %v1473_v34 = vmul.f32 1.442695, %v1450_v17  ;;  %v1475_v49 = vmul.f32 1.442695, %v1451_v25  ;;  %v4569_v42 = vmul.f32 %v3334_v59, %v5228_v22 }
 0x3c5   :  { %v1432_v40 = vpop.xlane.xlu1 %1431  ;;  %v1430_v56 = vpop.xlane.xlu0 %1429  ;;  %2335 = vmatmul.mubr.bf16.gmra.mxu1 %v3465_v8 }
 0x3c6   :  { %3347 = vpow2.f32 %v1473_v34  ;;  %v1453_v47 = vsub.f32 %v4373_v26, %v1432_v40  ;;  %v1452_v55 = vsub.f32 %v4377_v13, %v1430_v56  ;;  %1507 = vadd.xlane.f32.xlu1 %v4569_v42  ;;  %2344 = vmatprep.mubr.bf16.mxu1 %v5225_v11 }
 0x3c7   :  { %v3336_v21 = vpop.eup %3335  ;;  %3349 = vpow2.f32 %v1475_v49 }
 0x3c8   :  { %v3338_v27 = vpop.eup %3337  ;;  %v1479_v0 = vmul.f32 1.442695, %v1453_v47  ;;  %v1477_v48 = vmul.f32 1.442695, %v1452_v55  ;;  %v4576_v9 = vmul.f32 %v3336_v21, %v5229_v45 }
 0x3c9   :  { %v1434_v43 = vpop.xlane.xlu0 %1433  ;;  %v1436_v28 = vpop.xlane.xlu1 %1435  ;;  %v4579_v19 = vmul.f32 %v3338_v27, %v5230_v3 }
 0x3ca   :  { %3351 = vpow2.f32 %v1479_v0  ;;  %v1454_v26 = vsub.f32 %v4385_v1, %v1434_v43  ;;  %v1455_v13 = vsub.f32 %v4389_v36, %v1436_v28  ;;  %1511 = vadd.xlane.f32.xlu1 %v4576_v9 }
 0x3cb   :  { %v3340_v6 = vpop.eup %3339  ;;  %3353 = vpow2.f32 %v1477_v48  ;;  %1509 = vadd.xlane.f32.xlu0 %v4579_v19 }
 0x3cc   :  { %v3342_v17 = vpop.eup %3341  ;;  %v1481_v25 = vmul.f32 1.442695, %v1454_v26  ;;  %v1483_v59 = vmul.f32 1.442695, %v1455_v13  ;;  %v4589_v4 = vmul.f32 %v3340_v6, %v5231_v38 }
 0x3cd   :  { %v1440_v1 = vpop.xlane.xlu1 %1439  ;;  %v1438_v36 = vpop.xlane.xlu0 %1437  ;;  %v4593_v34 = vmul.f32 %v3342_v17, %v5232_v52  ;;  %v3466_v17 = vld [vmem:[%s5126_s1 + $0x28] sm:$0xff]  }
 0x3ce   :  { %3355 = vpow2.f32 %v1481_v25  ;;  %v1457_v49 = vsub.f32 %v4398_v57, %v1440_v1  ;;  %v1456_v40 = vsub.f32 %v4402_v62, %v1438_v36  ;;  %2345 = vmatmul.mubr.bf16.gmra.mxu1 %v3466_v17 }
 0x3cf   :  { %v3344_v56 = vpop.eup %3343  ;;  %3357 = vpow2.f32 %v1483_v59  ;;  %1515 = vadd.xlane.f32.xlu1 %v4593_v34  ;;  %1513 = vadd.xlane.f32.xlu0 %v4589_v4 }
 0x3d0   :  { %v3346_v47 = vpop.eup %3345  ;;  %v1487_v55 = vmul.f32 1.442695, %v1457_v49  ;;  %v1485_v21 = vmul.f32 1.442695, %v1456_v40  ;;  %v4600_v27 = vmul.f32 %v3344_v56, %v5233_v33  ;;  %2354 = vmatprep.mubr.bf16.mxu1 %v5225_v11 }
 0x3d1   :  { %v1854_v0 = vpop.xlane.xlu1 %1853  ;;  %v1442_v48 = vpop.xlane.xlu0 %1441  ;;  %v4603_v43 = vmul.f32 %v3346_v47, %v5234_v39 }
 0x3d2   :  { %3359 = vpow2.f32 %v1487_v55  ;;  %v1885_v57 = vsub.f32 %v4411_v61, %v1854_v0  ;;  %v1458_v62 = vsub.f32 %v4415_v5, %v1442_v48 }
 0x3d3   :  { %v3348_v28 = vpop.eup %3347  ;;  %3361 = vpow2.f32 %v1485_v21  ;;  %1519 = vadd.xlane.f32.xlu1 %v4600_v27  ;;  %1517 = vadd.xlane.f32.xlu0 %v4603_v43 }
 0x3d4   :  { %v3350_v26 = vpop.eup %3349  ;;  %v1901_v13 = vmul.f32 1.442695, %v1885_v57  ;;  %v1489_v6 = vmul.f32 1.442695, %v1458_v62  ;;  %v4610_v8 = vmul.f32 %v3348_v28, %v5235_v60 }
 0x3d5   :  { %v1858_v61 = vpop.xlane.xlu1 %1857  ;;  %v1856_v25 = vpop.xlane.xlu0 %1855  ;;  %v4616_v5 = vmul.f32 %v3350_v26, %v5236_v63 }
 0x3d6   :  { %3363 = vpow2.f32 %v1901_v13  ;;  %v1887_v59 = vsub.f32 %v4422_v51, %v1858_v61  ;;  %v1886_v1 = vsub.f32 %v4426_v53, %v1856_v25  ;;  %v3467_v13 = vld [vmem:[%s5126_s1 + $0x30] sm:$0xff]  }
 0x3d7   :  { %v3352_v36 = vpop.eup %3351  ;;  %3365 = vpow2.f32 %v1489_v6  ;;  %1523 = vadd.xlane.f32.xlu1 %v4616_v5  ;;  %1521 = vadd.xlane.f32.xlu0 %v4610_v8 }
 0x3d8   :  { %v3354_v49 = vpop.eup %3353  ;;  %v1905_v40 = vmul.f32 1.442695, %v1887_v59  ;;  %v1903_v56 = vmul.f32 1.442695, %v1886_v1  ;;  %v4624_v47 = vmul.f32 %v3352_v36, %v5237_v7  ;;  %2355 = vmatmul.mubr.bf16.gmra.mxu1 %v3467_v13 }
 0x3d9   :  { %v1862_v55 = vpop.xlane.xlu1 %1861  ;;  %v1860_v21 = vpop.xlane.xlu0 %1859  ;;  %v4627_v0 = vmul.f32 %v3354_v49, %v5238_v14  ;;  %2364 = vmatprep.mubr.bf16.mxu1 %v5225_v11 }
 0x3da   :  { %3367 = vpow2.f32 %v1905_v40  ;;  %v1889_v51 = vsub.f32 %v4437_v16, %v1862_v55  ;;  %v1888_v53 = vsub.f32 %v4432_v2, %v1860_v21 }
 0x3db   :  { %v3356_v48 = vpop.eup %3355  ;;  %3369 = vpow2.f32 %v1903_v56  ;;  %1527 = vadd.xlane.f32.xlu1 %v4624_v47  ;;  %1525 = vadd.xlane.f32.xlu0 %v4627_v0 }
 0x3dc   :  { %v3358_v57 = vpop.eup %3357  ;;  %v1909_v62 = vmul.f32 1.442695, %v1889_v51  ;;  %v1907_v28 = vmul.f32 1.442695, %v1888_v53  ;;  %v4634_v26 = vmul.f32 %v3356_v48, %v5239_v20 }
 0x3dd   :  { %v1866_v16 = vpop.xlane.xlu1 %1865  ;;  %v1864_v6 = vpop.xlane.xlu0 %1863  ;;  %v4640_v2 = vmul.f32 %v3358_v57, %v5240_v10  ;;  %v3468_v57 = vld [vmem:[%s5126_s1 + $0x38] sm:$0xff]  }
 0x3de   :  { %3371 = vpow2.f32 %v1909_v62  ;;  %v1891_v17 = vsub.f32 %v4443_v35, %v1866_v16  ;;  %v1890_v61 = vsub.f32 %v4447_v50, %v1864_v6 }
 0x3df   :  { %v3360_v25 = vpop.eup %3359  ;;  %3373 = vpow2.f32 %v1907_v28  ;;  %1531 = vadd.xlane.f32.xlu1 %v4640_v2  ;;  %1529 = vadd.xlane.f32.xlu0 %v4634_v26 }
 0x3e0   :  { %v3362_v59 = vpop.eup %3361  ;;  %v1913_v1 = vmul.f32 1.442695, %v1891_v17  ;;  %v1911_v36 = vmul.f32 1.442695, %v1890_v61  ;;  %v4648_v49 = vmul.f32 %v3360_v25, %v5241_v18  ;;  %2365 = vmatmul.mubr.bf16.gmra.mxu1 %v3468_v57 }
 0x3e1   :  { %v1870_v40 = vpop.xlane.xlu1 %1869  ;;  %v1868_v56 = vpop.xlane.xlu0 %1867  ;;  %v4651_v11 = vmul.f32 %v3362_v59, %v5242_v12 }
 0x3e2   :  { %3375 = vpow2.f32 %v1913_v1  ;;  %v1893_v35 = vsub.f32 %v4457_v31, %v1870_v40  ;;  %v1892_v50 = vsub.f32 %v4453_v58, %v1868_v56 }
 0x3e3   :  { %v3364_v55 = vpop.eup %3363  ;;  %3377 = vpow2.f32 %v1911_v36  ;;  %1535 = vadd.xlane.f32.xlu1 %v4648_v49  ;;  %1533 = vadd.xlane.f32.xlu0 %v4651_v11 }
 0x3e4   :  { %v3366_v21 = vpop.eup %3365  ;;  %v1917_v51 = vmul.f32 1.442695, %v1893_v35  ;;  %v1915_v53 = vmul.f32 1.442695, %v1892_v50  ;;  %v4658_v48 = vmul.f32 %v3364_v55, %v5228_v22 }
 0x3e5   :  { %v1874_v31 = vpop.xlane.xlu1 %1873  ;;  %v1872_v62 = vpop.xlane.xlu0 %1871  ;;  %v4664_v58 = vmul.f32 %v3366_v21, %v5243_v32 }
 0x3e6   :  { %3379 = vpow2.f32 %v1917_v51  ;;  %v1895_v28 = vsub.f32 %v4463_v24, %v1874_v31  ;;  %v1894_v13 = vsub.f32 %v4467_v46, %v1872_v62 }
 0x3e7   :  { %v3368_v16 = vpop.eup %3367  ;;  %3381 = vpow2.f32 %v1915_v53  ;;  %1949 = vadd.xlane.f32.xlu1 %v4658_v48  ;;  %1537 = vadd.xlane.f32.xlu0 %v4664_v58 }
 0x3e8   :  { %v3370_v22 = vpop.eup %3369  ;;  %v1921_v6 = vmul.f32 1.442695, %v1895_v28  ;;  %v1919_v17 = vmul.f32 1.442695, %v1894_v13  ;;  %v4671_v61 = vmul.f32 %v3368_v16, %v5229_v45 }
 0x3e9   :  { %v1878_v25 = vpop.xlane.xlu1 %1877  ;;  %v1876_v59 = vpop.xlane.xlu0 %1875  ;;  %v4674_v1 = vmul.f32 %v3370_v22, %v5230_v3 }
 0x3ea   :  { %3383 = vpow2.f32 %v1921_v6  ;;  %v1897_v24 = vsub.f32 %v4477_v41, %v1878_v25  ;;  %v1896_v46 = vsub.f32 %v4473_v29, %v1876_v59 }
 0x3eb   :  { %v3372_v36 = vpop.eup %3371  ;;  %3385 = vpow2.f32 %v1919_v17  ;;  %1953 = vadd.xlane.f32.xlu1 %v4671_v61  ;;  %1951 = vadd.xlane.f32.xlu0 %v4674_v1 }
 0x3ec   :  { %v3374_v40 = vpop.eup %3373  ;;  %v1925_v56 = vmul.f32 1.442695, %v1897_v24  ;;  %v1923_v45 = vmul.f32 1.442695, %v1896_v46  ;;  %v4681_v35 = vmul.f32 %v3372_v36, %v5232_v52 }
 0x3ed   :  { %v1882_v50 = vpop.xlane.xlu1 %1881  ;;  %v1880_v3 = vpop.xlane.xlu0 %1879  ;;  %v4684_v55 = vmul.f32 %v3374_v40, %v5231_v38 }
 0x3ee   :  { %3387 = vpow2.f32 %v1925_v56  ;;  %v1899_v29 = vsub.f32 %v4483_v23, %v1882_v50  ;;  %v1898_v41 = vsub.f32 %v4487_v15, %v1880_v3 }
 0x3ef   :  { %v3376_v21 = vpop.eup %3375  ;;  %3389 = vpow2.f32 %v1923_v45  ;;  %1957 = vadd.xlane.f32.xlu1 %v4681_v35  ;;  %1955 = vadd.xlane.f32.xlu0 %v4684_v55 }
 0x3f0   :  { %v3378_v51 = vpop.eup %3377  ;;  %v1929_v53 = vmul.f32 1.442695, %v1899_v29  ;;  %v1927_v52 = vmul.f32 1.442695, %v1898_v41  ;;  %v4691_v57 = vmul.f32 %v3376_v21, %v5233_v33 }
 0x3f1   :  { %v1884_v31 = vpop.xlane.xlu0 %1883  ;;  %v4694_v38 = vmul.f32 %v3378_v51, %v5234_v39 }
 0x3f2   :  { %3391 = vpow2.f32 %v1929_v53  ;;  %v1900_v23 = vsub.f32 %v4493_v37, %v1884_v31 }
 0x3f3   :  { %v3380_v15 = vpop.eup %3379  ;;  %3393 = vpow2.f32 %v1927_v52  ;;  %1961 = vadd.xlane.f32.xlu1 %v4691_v57  ;;  %1959 = vadd.xlane.f32.xlu0 %v4694_v38 }
 0x3f4   :  { %v3382_v62 = vpop.eup %3381  ;;  %v1931_v28 = vmul.f32 1.442695, %v1900_v23  ;;  %v4700_v13 = vmul.f32 %v3380_v15, %v5236_v63 }
 0x3f5   :  { %v4703_v33 = vmul.f32 %v3382_v62, %v5235_v60 }
 0x3f6   :  { %3395 = vpow2.f32 %v1931_v28 }
 0x3f7   :  { %v3384_v39 = vpop.eup %3383  ;;  %1965 = vadd.xlane.f32.xlu1 %v4700_v13  ;;  %1963 = vadd.xlane.f32.xlu0 %v4703_v33 }
 0x3f8   :  { %v3386_v37 = vpop.eup %3385  ;;  %v4708_v16 = vmul.f32 %v3384_v39, %v5237_v7 }
 0x3f9   :  { %v4711_v22 = vmul.f32 %v3386_v37, %v5238_v14 }
 0x3fb   :  { %v3388_v6 = vpop.eup %3387  ;;  %1969 = vadd.xlane.f32.xlu1 %v4708_v16  ;;  %1967 = vadd.xlane.f32.xlu0 %v4711_v22 }
 0x3fc   :  { %v3390_v60 = vpop.eup %3389  ;;  %v4716_v63 = vmul.f32 %v3388_v6, %v5240_v10 }
 0x3fd   :  { %v4719_v17 = vmul.f32 %v3390_v60, %v5239_v20 }
 0x3ff   :  { %v3392_v25 = vpop.eup %3391  ;;  %1973 = vadd.xlane.f32.xlu1 %v4716_v63  ;;  %1971 = vadd.xlane.f32.xlu0 %v4719_v17 }
 0x400   :  { %v3394_v7 = vpop.eup %3393  ;;  %v4724_v14 = vmul.f32 %v3392_v25, %v5241_v18 }
 0x401   :  { %v4727_v59 = vmul.f32 %v3394_v7, %v5242_v12 }
 0x403   :  { %v3396_v24 = vpop.eup %3395  ;;  %1977 = vadd.xlane.f32.xlu1 %v4724_v14  ;;  %1975 = vadd.xlane.f32.xlu0 %v4727_v59 }
 0x404   :  { %v4732_v20 = vmul.f32 %v3396_v24, %v5243_v32 }
 0x407   :  { %1979 = vadd.xlane.f32.xlu0 %v4732_v20 }
 0x44f   :  { %v1508_v10 = vpop.xlane.xlu1 %1507 }
 0x450   :  { %v1555_v46 = vmax.f32 %v1508_v10, 1e-30  ;;  %vm1539_vm0 = vcmp.gt.f32.partialorder %v1508_v10, 0.0 }
 0x452   :  { %3397 = vrcp.f32 %v1555_v46 }
 0x453   :  { %v1512_v36 = vpop.xlane.xlu1 %1511 }
 0x454   :  { %v1557_v40 = vmax.f32 %v1512_v36, 1e-30  ;;  %v1510_v18 = vpop.xlane.xlu0 %1509  ;;  %vm1541_vm2 = vcmp.gt.f32.partialorder %v1512_v36, 0.0 }
 0x455   :  { %v1556_v56 = vmax.f32 %v1510_v18, 1e-30  ;;  %vm1540_vm1 = vcmp.gt.f32.partialorder %v1510_v18, 0.0 }
 0x457   :  { %3399 = vrcp.f32 %v1556_v56 }
 0x458   :  { %3401 = vrcp.f32 %v1557_v40  ;;  %v1516_v12 = vpop.xlane.xlu1 %1515  ;;  %v1514_v45 = vpop.xlane.xlu0 %1513 }
 0x459   :  { %v1559_v50 = vmax.f32 %v1516_v12, 1e-30  ;;  %v1558_v3 = vmax.f32 %v1514_v45, 1e-30  ;;  %vm1542_vm3 = vcmp.gt.f32.partialorder %v1514_v45, 0.0  ;;  %vm1543_vm4 = vcmp.gt.f32.partialorder %v1516_v12, 0.0 }
 0x45b   :  { %3403 = vrcp.f32 %v1558_v3 }
 0x45c   :  { %v4735_v29 = vpop.xlane.xlu1 %1519  ;;  %v1518_v32 = vpop.xlane.xlu0 %1517  ;;  %3405 = vrcp.f32 %v1559_v50 }
 0x45d   :  { %v1561_v41 = vmax.f32 %v4735_v29, 1e-30  ;;  %v1560_v21 = vmax.f32 %v1518_v32, 1e-30  ;;  %vm1544_vm5 = vcmp.gt.f32.partialorder %v1518_v32, 0.0  ;;  %vm1545_vm6 = vcmp.gt.f32.partialorder %v4735_v29, 0.0 }
 0x45f   :  { %v3398_v51 = vpop.eup %3397  ;;  %3407 = vrcp.f32 %v1560_v21 }
 0x460   :  { %v4738_v53 = vpop.xlane.xlu1 %1523  ;;  %v4740_v52 = vpop.xlane.xlu0 %1521  ;;  %3409 = vrcp.f32 %v1561_v41  ;;  %v1587_v15 = vsel %vm1539_vm0, %v3398_v51, 0.0 }
 0x461   :  { %v1563_v31 = vmax.f32 %v4738_v53, 1e-30  ;;  %v1562_v23 = vmax.f32 %v4740_v52, 1e-30  ;;  %v1603_v25 = vmul.f32 %v1587_v15, %v4569_v42  ;;  %vm1546_vm7 = vcmp.gt.f32.partialorder %v4740_v52, 0.0 }
 0x462   :  { %vm1547_vm8 = vcmp.gt.f32.partialorder %v4738_v53, 0.0 }
 0x463   :  { %3411 = vrcp.f32 %v1562_v23 }
 0x464   :  { %v3400_v62 = vpop.eup %3399  ;;  %v4744_v28 = vpop.xlane.xlu1 %1527  ;;  %3413 = vrcp.f32 %v1563_v31 }
 0x465   :  { %v4746_v39 = vpop.xlane.xlu0 %1525  ;;  %v3402_v37 = vpop.eup %3401  ;;  %v1588_v6 = vsel %vm1540_vm1, %v3400_v62, 0.0  ;;  %v1565_v60 = vmax.f32 %v4744_v28, 1e-30  ;;  %vm1549_vm10 = vcmp.gt.f32.partialorder %v4744_v28, 0.0 }
 0x466   :  { %v1604_v7 = vmul.f32 %v1588_v6, %v4579_v19  ;;  %v1564_v24 = vmax.f32 %v4746_v39, 1e-30  ;;  %v1589_v10 = vsel %vm1541_vm2, %v3402_v37, 0.0  ;;  %vm1548_vm9 = vcmp.gt.f32.partialorder %v4746_v39, 0.0 }
 0x467   :  { %v1605_v19 = vmul.f32 %v1589_v10, %v4576_v9 }
 0x468   :  { %3415 = vrcp.f32 %v1564_v24  ;;  %v4752_v46 = vpop.xlane.xlu1 %1531  ;;  %v1619_v18 = vpack.c.bf16 %v1604_v7, %v1603_v25  ;;  %v3404_v56 = vpop.eup %3403 }
 0x469   :  { %v4754_v40 = vpop.xlane.xlu0 %1529  ;;  %3417 = vrcp.f32 %v1565_v60  ;;  %v1567_v50 = vmax.f32 %v4752_v46, 1e-30  ;;  %v3406_v3 = vpop.eup %3405  ;;  %v1590_v41 = vsel %vm1542_vm3, %v3404_v56, 0.0  ;;  %vm1551_vm12 = vcmp.gt.f32.partialorder %v4752_v46, 0.0 }
 0x46a   :  { %v1566_v42 = vmax.f32 %v4754_v40, 1e-30  ;;  %3105 = vmatprep.mubr.bf16.mxu0 %v1619_v18  ;;  %v1606_v36 = vmul.f32 %v1590_v41, %v4589_v4  ;;  %v1591_v31 = vsel %vm1543_vm4, %v3406_v3, 0.0  ;;  %vm1550_vm11 = vcmp.gt.f32.partialorder %v4754_v40, 0.0 }
 0x46b   :  { %v1607_v4 = vmul.f32 %v1591_v31, %v4593_v34 }
 0x46c   :  { %3419 = vrcp.f32 %v1566_v42  ;;  %v4760_v21 = vpop.xlane.xlu1 %1535  ;;  %v3408_v45 = vpop.eup %3407  ;;  %v1620_v23 = vpack.c.bf16 %v1606_v36, %v1605_v19 }
 0x46d   :  { %v4762_v51 = vpop.xlane.xlu0 %1533  ;;  %3421 = vrcp.f32 %v1567_v50  ;;  %v1569_v15 = vmax.f32 %v4760_v21, 1e-30  ;;  %v3410_v62 = vpop.eup %3409  ;;  %v1592_v37 = vsel %vm1544_vm5, %v3408_v45, 0.0  ;;  %vm1553_vm14 = vcmp.gt.f32.partialorder %v4760_v21, 0.0 }
 0x46e   :  { %v1568_v6 = vmax.f32 %v4762_v51, 1e-30  ;;  %v1608_v9 = vmul.f32 %v1592_v37, %v4603_v43  ;;  %3106 = vmatmul.mubr.bf16.vlgmr.msra.gmra.mxu0 %v1620_v23  ;;  %v1593_v25 = vsel %vm1545_vm6, %v3410_v62, 0.0  ;;  %vm1552_vm13 = vcmp.gt.f32.partialorder %v4762_v51, 0.0 }
 0x46f   :  { %3154 = vmatpush3.bf16.msra.mxu0 %v4300_v44  ;;  %v1609_v10 = vmul.f32 %v1593_v25, %v4600_v27  ;;  %v5245_v25 = vld [vmem:[#allocation33_spill] sm:$0xff] }
 0x470   :  { %3423 = vrcp.f32 %v1568_v6  ;;  %v4770_v12 = vpop.xlane.xlu1 %1949  ;;  %v3412_v60 = vpop.eup %3411  ;;  %3155 = vmatprep.subr.bf16.mxu0 %v4237_v30  ;;  %v1621_v24 = vpack.c.bf16 %v1608_v9, %v1607_v4 }
 0x471   :  { %v4772_v32 = vpop.xlane.xlu0 %1537  ;;  %3425 = vrcp.f32 %v1569_v15  ;;  %v1997_v43 = vmax.f32 %v4770_v12, 1e-30  ;;  %v3414_v7 = vpop.eup %3413  ;;  %v1594_v34 = vsel %vm1546_vm7, %v3412_v60, 0.0  ;;  %v5244_v15 = vld [vmem:[#allocation34_spill] sm:$0xff]  ;;  %vm1981_vm0 = vcmp.gt.f32.partialorder %v4770_v12, 0.0 }
 0x472   :  { %v1570_v29 = vmax.f32 %v4772_v32, 1e-30  ;;  %v1610_v44 = vmul.f32 %v1594_v34, %v4610_v8  ;;  %3109 = vmatprep.mubr.bf16.mxu0 %v1621_v24  ;;  %v1595_v50 = vsel %vm1547_vm8, %v3414_v7, 0.0  ;;  %vm1554_vm15 = vcmp.gt.f32.partialorder %v4772_v32, 0.0 }
 0x473   :  { %3156 = vmatpush3.bf16.msra.mxu0 %v4237_v30  ;;  %v1611_v42 = vmul.f32 %v1595_v50, %v4616_v5 }
 0x474   :  { %3427 = vrcp.f32 %v1570_v29  ;;  %v4782_v52 = vpop.xlane.xlu1 %1953  ;;  %3157 = vmatprep.subr.bf16.mxu0 %v4224_v54  ;;  %v1622_v41 = vpack.c.bf16 %v1610_v44, %v1609_v10 }
 0x475   :  { %v4784_v18 = vpop.xlane.xlu0 %1951  ;;  %v3416_v56 = vpop.eup %3415  ;;  %3429 = vrcp.f32 %v1997_v43  ;;  %v1999_v8 = vmax.f32 %v4782_v52, 1e-30  ;;  %vm1983_vm2 = vcmp.gt.f32.partialorder %v4782_v52, 0.0 }
 0x476   :  { %v3418_v27 = vpop.eup %3417  ;;  %v1596_v3 = vsel %vm1548_vm9, %v3416_v56, 0.0  ;;  %v1998_v53 = vmax.f32 %v4784_v18, 1e-30  ;;  %3110 = vmatmul.mubr.bf16.gmra.mxu0 %v1622_v41  ;;  %v5246_v56 = vld [vmem:[#allocation32_spill] sm:$0xff]  ;;  %vm1982_vm1 = vcmp.gt.f32.partialorder %v4784_v18, 0.0 }
 0x477   :  { %v1612_v30 = vmul.f32 %v1596_v3, %v4627_v0  ;;  %3431 = vrcp.f32 %v1999_v8  ;;  %v1597_v45 = vsel %vm1549_vm10, %v3418_v27, 0.0  ;;  %3158 = vmatpush3.bf16.msra.mxu0 %v4224_v54 }
 0x478   :  { %3433 = vrcp.f32 %v1998_v53  ;;  %v4793_v39 = vpop.xlane.xlu1 %1957  ;;  %3159 = vmatprep.subr.bf16.mxu0 %v5244_v15  ;;  %v1613_v37 = vmul.f32 %v1597_v45, %v4624_v47 }
 0x479   :  { %v4795_v19 = vpop.xlane.xlu0 %1955  ;;  %v3420_v36 = vpop.eup %3419  ;;  %v2001_v31 = vmax.f32 %v4793_v39, 1e-30  ;;  %v1623_v28 = vpack.c.bf16 %v1612_v30, %v1611_v42  ;;  %v5247_v42 = vld [vmem:[#allocation31_spill] sm:$0xff]  ;;  %vm1985_vm4 = vcmp.gt.f32.partialorder %v4793_v39, 0.0 }
 0x47a   :  { %v3422_v0 = vpop.eup %3421  ;;  %v1598_v23 = vsel %vm1550_vm11, %v3420_v36, 0.0  ;;  %v2000_v5 = vmax.f32 %v4795_v19, 1e-30  ;;  %vm1984_vm3 = vcmp.gt.f32.partialorder %v4795_v19, 0.0 }
 0x47b   :  { %v1614_v62 = vmul.f32 %v1598_v23, %v4634_v26  ;;  %3435 = vrcp.f32 %v2001_v31  ;;  %3113 = vmatprep.mubr.bf16.mxu0 %v1623_v28  ;;  %v1599_v9 = vsel %vm1551_vm12, %v3422_v0, 0.0  ;;  %3160 = vmatpush3.bf16.msra.mxu0 %v5244_v15  ;;  %v5248_v28 = vld [vmem:[#allocation28_spill] sm:$0xff] }
 0x47c   :  { %3437 = vrcp.f32 %v2000_v5  ;;  %v4805_v40 = vpop.xlane.xlu1 %1961  ;;  %3161 = vmatprep.subr.bf16.mxu0 %v5245_v25  ;;  %v1615_v7 = vmul.f32 %v1599_v9, %v4640_v2 }
 0x47d   :  { %v4807_v54 = vpop.xlane.xlu0 %1959  ;;  %v3424_v6 = vpop.eup %3423  ;;  %v2003_v4 = vmax.f32 %v4805_v40, 1e-30  ;;  %v1624_v46 = vpack.c.bf16 %v1614_v62, %v1613_v37  ;;  %vm1987_vm6 = vcmp.gt.f32.partialorder %v4805_v40, 0.0 }
 0x47e   :  { %v3426_v26 = vpop.eup %3425  ;;  %v1600_v60 = vsel %vm1552_vm13, %v3424_v6, 0.0  ;;  %v2002_v47 = vmax.f32 %v4807_v54, 1e-30  ;;  %vm1986_vm5 = vcmp.gt.f32.partialorder %v4807_v54, 0.0 }
 0x47f   :  { %v1616_v43 = vmul.f32 %v1600_v60, %v4651_v11  ;;  %3439 = vrcp.f32 %v2003_v4  ;;  %3114 = vmatmul.mubr.bf16.gmra.mxu0 %v1624_v46  ;;  %v1601_v24 = vsel %vm1553_vm14, %v3426_v26, 0.0 }
 0x480   :  { %3441 = vrcp.f32 %v2002_v47  ;;  %v4817_v51 = vpop.xlane.xlu1 %1965  ;;  %3162 = vmatpush3.bf16.msra.mxu0 %v5245_v25  ;;  %v1617_v27 = vmul.f32 %v1601_v24, %v4648_v49 }
 0x481   :  { %v4819_v34 = vpop.xlane.xlu0 %1963  ;;  %v3428_v29 = vpop.eup %3427  ;;  %v2005_v44 = vmax.f32 %v4817_v51, 1e-30  ;;  %3163 = vmatprep.subr.bf16.mxu0 %v5246_v56  ;;  %v1625_v21 = vpack.c.bf16 %v1616_v43, %v1615_v7  ;;  %vm1989_vm8 = vcmp.gt.f32.partialorder %v4817_v51, 0.0 }
 0x482   :  { %v3430_v11 = vpop.eup %3429  ;;  %v1602_v10 = vsel %vm1554_vm15, %v3428_v29, 0.0  ;;  %v2004_v2 = vmax.f32 %v4819_v34, 1e-30  ;;  %vm1988_vm7 = vcmp.gt.f32.partialorder %v4819_v34, 0.0 }
 0x483   :  { %v1618_v50 = vmul.f32 %v1602_v10, %v4664_v58  ;;  %3443 = vrcp.f32 %v2005_v44  ;;  %3117 = vmatprep.mubr.bf16.mxu0 %v1625_v21  ;;  %v2029_v41 = vsel %vm1981_vm0, %v3430_v11, 0.0 }
 0x484   :  { %v3432_v8 = vpop.eup %3431  ;;  %3445 = vrcp.f32 %v2004_v2  ;;  %v4829_v32 = vpop.xlane.xlu1 %1969  ;;  %3164 = vmatpush3.bf16.msra.mxu0 %v5246_v56  ;;  %v2045_v31 = vmul.f32 %v2029_v41, %v4658_v48 }
 0x485   :  { %v4831_v3 = vpop.xlane.xlu0 %1967  ;;  %v3434_v53 = vpop.eup %3433  ;;  %v2007_v58 = vmax.f32 %v4829_v32, 1e-30  ;;  %3165 = vmatprep.subr.bf16.mxu0 %v5247_v42  ;;  %v1626_v12 = vpack.c.bf16 %v1618_v50, %v1617_v27  ;;  %v2031_v0 = vsel %vm1983_vm2, %v3432_v8, 0.0  ;;  %vm1991_vm10 = vcmp.gt.f32.partialorder %v4829_v32, 0.0 }
 0x486   :  { %v2030_v30 = vsel %vm1982_vm1, %v3434_v53, 0.0  ;;  %v2006_v49 = vmax.f32 %v4831_v3, 1e-30  ;;  %v2047_v48 = vmul.f32 %v2031_v0, %v4671_v61  ;;  %vm1990_vm9 = vcmp.gt.f32.partialorder %v4831_v3, 0.0  ;;  %v3322_v0 = vld [vmem:[%s5132_s12 + $0x28] sm:$0xff]  }
 0x487   :  { %v2046_v36 = vmul.f32 %v2030_v30, %v4674_v1  ;;  %3447 = vrcp.f32 %v2007_v58  ;;  %3118 = vmatmul.mubr.bf16.gmra.mxu0 %v1626_v12 }
 0x488   :  { %v3436_v45 = vpop.eup %3435  ;;  %3449 = vrcp.f32 %v2006_v49  ;;  %v4841_v18 = vpop.xlane.xlu1 %1973  ;;  %3166 = vmatpush3.bf16.msra.mxu0 %v5247_v42 }
 0x489   :  { %v1972_v23 = vpop.xlane.xlu0 %1971  ;;  %v3438_v15 = vpop.eup %3437  ;;  %v2009_v5 = vmax.f32 %v4841_v18, 1e-30  ;;  %3167 = vmatprep.subr.bf16.mxu0 %v5248_v28  ;;  %v2061_v62 = vpack.c.bf16 %v2046_v36, %v2045_v31  ;;  %v2033_v9 = vsel %vm1985_vm4, %v3436_v45, 0.0  ;;  %vm1993_vm12 = vcmp.gt.f32.partialorder %v4841_v18, 0.0  ;;  %v3317_v31 = vld [vmem:[%s5132_s12 + $0x78] sm:$0xff]   ;;  %v3323_v18 = vld [vmem:[%s5132_s12 + $0x60] sm:$0xff]  }
 0x48a   :  { %v2032_v52 = vsel %vm1984_vm3, %v3438_v15, 0.0  ;;  %v2008_v1 = vmax.f32 %v1972_v23, 1e-30  ;;  %v2049_v39 = vmul.f32 %v2033_v9, %v4681_v35  ;;  %vm1992_vm11 = vcmp.gt.f32.partialorder %v1972_v23, 0.0  ;;  %3185 = vmatprep.subr.bf16.mxu1 %v3317_v31  ;;  %v3324_v23 = vld [vmem:[%s5132_s12 + $0x20] sm:$0xff]   ;;  %v3325_v15 = vld [vmem:[%s5132_s12 + $0x58] sm:$0xff]  }
 0x48b   :  { %v2048_v37 = vmul.f32 %v2032_v52, %v4684_v55  ;;  %3451 = vrcp.f32 %v2009_v5  ;;  %3169 = vmatprep.mubr.bf16.mxu0 %v2061_v62  ;;  %v3326_v5 = vld [vmem:[%s5132_s12 + $0x18] sm:$0xff]   ;;  %v3327_v52 = vld [vmem:[%s5132_s12 + $0x50] sm:$0xff]   ;;  %v3330_v62 = vld [vmem:[%s5132_s12 + $0x8] sm:$0xff]  }
 0x48c   :  { %v3440_v6 = vpop.eup %3439  ;;  %3453 = vrcp.f32 %v2008_v1  ;;  %v1978_v19 = vpop.xlane.xlu1 %1977  ;;  %3168 = vmatpush3.bf16.msra.mxu0 %v5248_v28  ;;  %v3328_v28 = vld [vmem:[%s5132_s12 + $0x10] sm:$0xff]   ;;  %v3329_v1 = vld [vmem:[%s5132_s12 + $0x48] sm:$0xff]  }
 0x48d   :  { %v1976_v4 = vpop.xlane.xlu0 %1975  ;;  %v3442_v26 = vpop.eup %3441  ;;  %v2062_v60 = vpack.c.bf16 %v2048_v37, %v2047_v48  ;;  %v2011_v25 = vmax.f32 %v1978_v19, 1e-30  ;;  %v2035_v43 = vsel %vm1987_vm6, %v3440_v6, 0.0  ;;  %vm1995_vm14 = vcmp.gt.f32.partialorder %v1978_v19, 0.0  ;;  %2961 = vmatprep.subr.bf16.mxu0 %v3317_v31  ;;  %v3331_v48 = vld [vmem:[%s5132_s12 + $0x40] sm:$0xff]  }
 0x48e   :  { %v2034_v47 = vsel %vm1986_vm5, %v3442_v26, 0.0  ;;  %v2010_v61 = vmax.f32 %v1976_v4, 1e-30  ;;  %v2051_v11 = vmul.f32 %v2035_v43, %v4691_v57  ;;  %vm1994_vm13 = vcmp.gt.f32.partialorder %v1976_v4, 0.0  ;;  %v3332_v37 = vld [vmem:[%s5132_s12] sm:$0xff]   ;;  %v2296_v6 = vpop.f32.mrf.mxu1 }
 0x48f   :  { %v2050_v55 = vmul.f32 %v2034_v47, %v4694_v38  ;;  %3455 = vrcp.f32 %v2011_v25  ;;  %3170 = vmatmul.mubr.bf16.vlgmr.msra.gmra.mxu0 %v2062_v60 }
 0x490   :  { %v3444_v46 = vpop.eup %3443  ;;  %3457 = vrcp.f32 %v2010_v61  ;;  %v2298_v9 = vpop.f32.mrf.mxu1 }
 0x491   :  { %v1980_v7 = vpop.xlane.xlu0 %1979  ;;  %v3446_v29 = vpop.eup %3445  ;;  %v2063_v24 = vpack.c.bf16 %v2050_v55, %v2049_v39  ;;  %v2037_v40 = vsel %vm1989_vm8, %v3444_v46, 0.0 }
 0x492   :  { %v2012_v54 = vmax.f32 %v1980_v7, 1e-30  ;;  %v2036_v44 = vsel %vm1988_vm7, %v3446_v29, 0.0  ;;  %v2053_v34 = vmul.f32 %v2037_v40, %v4700_v13  ;;  %vm1996_vm15 = vcmp.gt.f32.partialorder %v1980_v7, 0.0  ;;  %v2300_v19 = vpop.f32.mrf.mxu1 }
 0x493   :  { %v2052_v35 = vmul.f32 %v2036_v44, %v4703_v33  ;;  %3173 = vmatprep.mubr.bf16.mxu0 %v2063_v24 }
 0x494   :  { %3459 = vrcp.f32 %v2012_v54  ;;  %v3448_v38 = vpop.eup %3447  ;;  %v2302_v4 = vpop.f32.mrf.mxu1 }
 0x495   :  { %v3450_v10 = vpop.eup %3449  ;;  %v2064_v56 = vpack.c.bf16 %v2052_v35, %v2051_v11  ;;  %v2039_v50 = vsel %vm1991_vm10, %v3448_v38, 0.0 }
 0x496   :  { %v2038_v2 = vsel %vm1990_vm9, %v3450_v10, 0.0  ;;  %v2055_v27 = vmul.f32 %v2039_v50, %v4708_v16  ;;  %v4918_v26 = vpop.f32.mrf.mxu1 }
 0x497   :  { %v2054_v21 = vmul.f32 %v2038_v2, %v4711_v22  ;;  %3174 = vmatmul.mubr.bf16.gmra.mxu0 %v2064_v56 }
 0x498   :  { %v3452_v57 = vpop.eup %3451  ;;  %v2308_v60 = vpop.f32.mrf.mxu1 }
 0x499   :  { %v3454_v51 = vpop.eup %3453  ;;  %v2065_v33 = vpack.c.bf16 %v2054_v21, %v2053_v34  ;;  %v2041_v13 = vsel %vm1993_vm12, %v3452_v57, 0.0 }
 0x49a   :  { %v2040_v8 = vsel %vm1992_vm11, %v3454_v51, 0.0  ;;  %v2057_v58 = vmul.f32 %v2041_v13, %v4716_v63  ;;  %v3318_v63 = vld [vmem:[%s5132_s12 + $0x38] sm:$0xff]   ;;  %v2310_v25 = vpop.f32.mrf.mxu1 }
 0x49b   :  { %v2056_v3 = vmul.f32 %v2040_v8, %v4719_v17  ;;  %3177 = vmatprep.mubr.bf16.mxu0 %v2065_v33  ;;  %2962 = vmatpush3.bf16.msra.mxu0 %v3318_v63 }
 0x49c   :  { %v3456_v53 = vpop.eup %3455  ;;  %3193 = vmatpush3.bf16.msra.mxu1 %v3318_v63  ;;  %v2312_v47 = vpop.f32.mrf.mxu1  ;;  %v5249_v63 = vld [vmem:[#allocation15_spill] sm:$0xff] }
 0x49d   :  { %v3458_v41 = vpop.eup %3457  ;;  %v2066_v32 = vpack.c.bf16 %v2056_v3, %v2055_v27  ;;  %v2043_v30 = vsel %vm1995_vm14, %v3456_v53, 0.0 }
 0x49e   :  { %v2042_v22 = vsel %vm1994_vm13, %v3458_v41, 0.0  ;;  %v2059_v17 = vmul.f32 %v2043_v30, %v4724_v14  ;;  %v3319_v14 = vld [vmem:[%s5132_s12 + $0x70] sm:$0xff]   ;;  %v4920_v61 = vpop.f32.mrf.mxu1 }
 0x49f   :  { %v2058_v42 = vmul.f32 %v2042_v22, %v4727_v59  ;;  %3178 = vmatmul.mubr.bf16.gmra.mxu0 %v2066_v32  ;;  %v3320_v59 = vld [vmem:[%s5132_s12 + $0x30] sm:$0xff]   ;;  %2963 = vmatprep.subr.bf16.mxu0 %v3319_v14 }
 0x4a0   :  { %3186 = vmatprep.subr.bf16.mxu1 %v3319_v14  ;;  %2964 = vmatpush3.bf16.msra.mxu0 %v3320_v59  ;;  %v4922_v39 = vpop.f32.mrf.mxu1 }
 0x4a1   :  { %v3460_v49 = vpop.eup %3459  ;;  %v2067_v12 = vpack.c.bf16 %v2058_v42, %v2057_v58  ;;  %3194 = vmatpush3.bf16.msra.mxu1 %v3320_v59 }
 0x4a2   :  { %v2044_v16 = vsel %vm1996_vm15, %v3460_v49, 0.0  ;;  %v4924_v55 = vpop.f32.mrf.mxu1 }
 0x4a3   :  { %v2060_v36 = vmul.f32 %v2044_v16, %v4732_v20  ;;  %3181 = vmatprep.mubr.bf16.mxu0 %v2067_v12  ;;  %v3321_v20 = vld [vmem:[%s5132_s12 + $0x68] sm:$0xff]   ;;  %v2407_v16 = vld [vmem:[%s5133_s11] sm:$0x3] }
 0x4a4   :  { %2965 = vmatprep.subr.bf16.mxu0 %v3321_v20  ;;  %3187 = vmatprep.subr.bf16.mxu1 %v3321_v20  ;;  %v4926_v46 = vpop.f32.mrf.mxu1  ;;  %v4982_v14 = vrot.slane %v2407_v16, %v5249_v63 }
 0x4a5   :  { %v2068_v45 = vpack.c.bf16 %v2060_v36, %v2059_v17  ;;  %2966 = vmatpush3.bf16.msra.mxu0 %v3322_v0  ;;  %3195 = vmatpush3.bf16.msra.mxu1 %v3322_v0 }
 0x4a6   :  { %2967 = vmatprep.subr.bf16.mxu0 %v3323_v18  ;;  %3188 = vmatprep.subr.bf16.mxu1 %v3323_v18  ;;  %v4928_v43 = vpop.f32.mrf.mxu1  ;;  %v5250_v18 = vld [vmem:[#allocation17_spill] sm:$0xff] }
 0x4a7   :  { %3182 = vmatmul.mubr.bf16.gmra.mxu0 %v2068_v45 }
 0x4a8   :  { %v4930_v7 = vpop.f32.mrf.mxu1 }
 0x4a9   :  { %2968 = vmatpush3.bf16.msra.mxu0 %v3324_v23  ;;  %3196 = vmatpush3.bf16.msra.mxu1 %v3324_v23  ;;  %v4985_v23 = vrot.slane %v2407_v16, %v5250_v18 }
 0x4aa   :  { %2969 = vmatprep.subr.bf16.mxu0 %v3325_v15  ;;  %3189 = vmatprep.subr.bf16.mxu1 %v3325_v15  ;;  %v4932_v29 = vpop.f32.mrf.mxu1 }
 0x4ac   :  { %v4934_v54 = vpop.f32.mrf.mxu1 }
 0x4ad   :  { %2970 = vmatpush3.bf16.msra.mxu0 %v3326_v5  ;;  %3197 = vmatpush3.bf16.msra.mxu1 %v3326_v5 }
 0x4ae   :  { %2971 = vmatprep.subr.bf16.mxu0 %v3327_v52  ;;  %3190 = vmatprep.subr.bf16.mxu1 %v3327_v52  ;;  %v4936_v44 = vpop.f32.mrf.mxu1 }
 0x4b0   :  { %v4938_v38 = vpop.f32.mrf.mxu1 }
 0x4b1   :  { %2972 = vmatpush3.bf16.msra.mxu0 %v3328_v28  ;;  %3198 = vmatpush3.bf16.msra.mxu1 %v3328_v28 }
 0x4b2   :  { %2973 = vmatprep.subr.bf16.mxu0 %v3329_v1  ;;  %3191 = vmatprep.subr.bf16.mxu1 %v3329_v1  ;;  %v4940_v10 = vpop.f32.mrf.mxu1 }
 0x4b4   :  { %v4946_v34 = vpop.f32.mrf.mxu1 }
 0x4b5   :  { %2974 = vmatpush3.bf16.msra.mxu0 %v3330_v62  ;;  %3199 = vmatpush3.bf16.msra.mxu1 %v3330_v62 }
 0x4b6   :  { %2975 = vmatprep.subr.bf16.mxu0 %v3331_v48  ;;  %3192 = vmatprep.subr.bf16.mxu1 %v3331_v48  ;;  %v4950_v50 = vpop.f32.mrf.mxu1 }
 0x4b8   :  { %v4956_v8 = vpop.f32.mrf.mxu1 }
 0x4b9   :  { %2976 = vmatpush3.bf16.msra.mxu0 %v3332_v37  ;;  %3200 = vmatpush3.bf16.msra.mxu1 %v3332_v37 }
 0x4ba   :  { %v4962_v53 = vpop.f32.mrf.mxu1 }
 0x4bc   :  { %v4968_v32 = vpop.f32.mrf.mxu1 }
 0x4be   :  { %v4974_v30 = vpop.f32.mrf.mxu1 }
 0x4c0   :  { %v4979_v17 = vpop.f32.mrf.mxu1 }
 0x4c2   :  { %v2360_v52 = vpop.f32.mrf.mxu1 }
 0x52e   :  { %v3107_v24 = vpop.f32.mrf.mxu0 }
 0x530   :  { %v1661_v11 = vpop.f32.mrf.mxu0 }
 0x531   :  { %v2375_v59 = vadd.f32 %v2296_v6, %v1661_v11  ;;  %v2362_v11 = vpop.f32.mrf.mxu1 }
 0x532   :  { %v3108_v35 = vpop.f32.mrf.mxu0 }
 0x533   :  { %v2419_v37 = vadd.f32 %v4982_v14, %v2375_v59 }
 0x534   :  { %v1664_v40 = vpop.f32.mrf.mxu0 }
 0x535   :  { %v2377_v12 = vadd.f32 %v2300_v19, %v1664_v40 }
 0x536   :  { %v4942_v56 = vpop.f32.mrf.mxu0 }
 0x537   :  { %v2421_v5 = vadd.f32 %v4982_v14, %v2377_v12 }
 0x538   :  { %v4944_v2 = vpop.f32.mrf.mxu0 }
 0x539   :  { %v2383_v18 = vadd.f32 %v4920_v61, %v4944_v2 }
 0x53a   :  { %v4948_v21 = vpop.f32.mrf.mxu0 }
 0x53b   :  { %v2389_v61 = vadd.f32 %v4948_v21, %v4932_v29 }
 0x53c   :  { %v1680_v57 = vpop.f32.mrf.mxu0 }
 0x53f   :  { %v4952_v51 = vpop.f32.mrf.mxu0 }
 0x541   :  { %v4954_v33 = vpop.f32.mrf.mxu0 }
 0x543   :  { %v4958_v27 = vpop.f32.mrf.mxu0 }
 0x545   :  { %v4960_v3 = vpop.f32.mrf.mxu0 }
 0x547   :  { %v4964_v13 = vpop.f32.mrf.mxu0 }
 0x549   :  { %v4966_v41 = vpop.f32.mrf.mxu0 }
 0x54b   :  { %v4970_v22 = vpop.f32.mrf.mxu0 }
 0x54d   :  { %v4972_v58 = vpop.f32.mrf.mxu0 }
 0x54e   :  { %v2401_v2 = vadd.f32 %v2360_v52, %v4972_v58  ;;  %v2433_v52 = vadd.f32 %v4982_v14, %v2389_v61 }
 0x54f   :  { %v3171_v42 = vpop.f32.mrf.mxu0 }
 0x550   :  { %v2380_v0 = vadd.f32 %v3171_v42, %v2308_v60  ;;  %v2381_v60 = vadd.f32 %v3108_v35, %v2310_v25  ;;  %v2379_v42 = vadd.f32 %v3107_v24, %v4918_v26  ;;  %v2385_v26 = vadd.f32 %v4924_v55, %v1680_v57 }
 0x551   :  { %v2103_v49 = vpop.f32.mrf.mxu0  ;;  %v2427_v57 = vadd.f32 %v4982_v14, %v2383_v18 }
 0x552   :  { %v2376_v45 = vadd.f32 %v2298_v9, %v2103_v49  ;;  %v2424_v6 = vadd.f32 %v4985_v23, %v2380_v0  ;;  %v2423_v35 = vadd.f32 %v4982_v14, %v2379_v42 }
 0x553   :  { %v3172_v36 = vpop.f32.mrf.mxu0 }
 0x554   :  { %v2382_v31 = vadd.f32 %v3172_v36, %v2312_v47  ;;  %v2420_v1 = vadd.f32 %v4985_v23, %v2376_v45  ;;  %v2451_v47 = vpack.c.bf16 %v2421_v5, %v2419_v37  ;;  %v2425_v36 = vadd.f32 %v4982_v14, %v2381_v60  ;;  %v2366_v45 = vpop.f32.mrf.mxu1 }
 0x555   :  { %v2106_v20 = vpop.f32.mrf.mxu0 }
 0x556   :  { %v2378_v15 = vadd.f32 %v2302_v4, %v2106_v20  ;;  %v2426_v62 = vadd.f32 %v4985_v23, %v2382_v31  ;;  %v2368_v24 = vpop.f32.mrf.mxu1 }
 0x557   :  { %v3175_v28 = vpop.f32.mrf.mxu0 }
 0x558   :  { %v2422_v48 = vadd.f32 %v4985_v23, %v2378_v15  ;;  %v2454_v40 = vpack.c.bf16 %v2426_v62, %v2424_v6  ;;  %v2388_v5 = vadd.f32 %v3175_v28, %v4930_v7  ;;  %v2370_v62 = vpop.f32.mrf.mxu1 }
 0x559   :  { %v2119_v9 = vpop.f32.mrf.mxu0 }
 0x55a   :  { %v2452_v19 = vpack.c.bf16 %v2422_v48, %v2420_v1  ;;  %v2384_v16 = vadd.f32 %v4922_v39, %v2119_v9  ;;  %v2453_v39 = vpack.c.bf16 %v2425_v36, %v2423_v35  ;;  %v2429_v1 = vadd.f32 %v4982_v14, %v2385_v26  ;;  %v2372_v9 = vpop.f32.mrf.mxu1 }
 0x55b   :  { %v3176_v4 = vpop.f32.mrf.mxu0  ;;  %v2405_v36 = vadd.f32 %v4970_v22, %v2370_v62 }
 0x55c   :  { %2634 = vmatprep.mubr.bf16.mxu0 %v2452_v19  ;;  %v2428_v59 = vadd.f32 %v4985_v23, %v2384_v16  ;;  %v2455_v7 = vpack.c.bf16 %v2429_v1, %v2427_v57 }
 0x55d   :  { %v2122_v49 = vpop.f32.mrf.mxu0  ;;  %2635 = vmatmul.mubr.bf16.vlgmr.msra.gmra.mxu0 %v2451_v47 }
 0x55e   :  { %v2386_v12 = vadd.f32 %v4926_v46, %v2122_v49  ;;  %2642 = vmatprep.mubr.bf16.mxu0 %v2454_v40  ;;  %v2390_v46 = vadd.f32 %v3176_v4, %v4934_v54  ;;  %v2432_v54 = vadd.f32 %v4985_v23, %v2388_v5  ;;  %v2387_v4 = vadd.f32 %v4942_v56, %v4928_v43 }
 0x55f   :  { %v4997_v31 = vpop.f32.mrf.mxu0  ;;  %v2399_v40 = vadd.f32 %v4974_v30, %v4966_v41 }
 0x560   :  { %v2430_v25 = vadd.f32 %v4985_v23, %v2386_v12  ;;  %v2434_v55 = vadd.f32 %v4985_v23, %v2390_v46  ;;  %v2431_v41 = vadd.f32 %v4982_v14, %v2387_v4  ;;  %v2393_v12 = vadd.f32 %v4940_v10, %v4960_v3 }
 0x561   :  { %v2135_v63 = vpop.f32.mrf.mxu0  ;;  %v2443_v30 = vadd.f32 %v4982_v14, %v2399_v40  ;;  %v2396_v46 = vadd.f32 %v4997_v31, %v4956_v8  ;;  %v2449_v3 = vadd.f32 %v4982_v14, %v2405_v36  ;;  %v2395_v31 = vadd.f32 %v4952_v51, %v4950_v50 }
 0x562   :  { %v2456_v0 = vpack.c.bf16 %v2430_v25, %v2428_v59  ;;  %v2458_v47 = vpack.c.bf16 %v2434_v55, %v2432_v54  ;;  %v2392_v29 = vadd.f32 %v4938_v38, %v2135_v63  ;;  %v2457_v35 = vpack.c.bf16 %v2433_v52, %v2431_v41 }
 0x563   :  { %v3180_v20 = vpop.f32.mrf.mxu0  ;;  %v2437_v10 = vadd.f32 %v4982_v14, %v2393_v12  ;;  %v2439_v18 = vadd.f32 %v4982_v14, %v2395_v31 }
 0x564   :  { %v2436_v38 = vadd.f32 %v4985_v23, %v2392_v29  ;;  %v2398_v63 = vadd.f32 %v3180_v20, %v4968_v32 }
 0x565   :  { %v2138_v15 = vpop.f32.mrf.mxu0  ;;  %2643 = vmatmul.mubr.bf16.gmra.mxu0 %v2453_v39  ;;  %v2403_v39 = vadd.f32 %v4964_v13, %v2366_v45 }
 0x566   :  { %2650 = vmatprep.mubr.bf16.mxu0 %v2456_v0  ;;  %v2394_v28 = vadd.f32 %v4946_v34, %v2138_v15  ;;  %v2445_v34 = vadd.f32 %v4982_v14, %v2401_v2  ;;  %v2442_v32 = vadd.f32 %v4985_v23, %v2398_v63 }
 0x567   :  { %v3183_v48 = vpop.f32.mrf.mxu0  ;;  %v2447_v20 = vadd.f32 %v4982_v14, %v2403_v39 }
 0x568   :  { %v2404_v21 = vadd.f32 %v3183_v48, %v2368_v24  ;;  %v2463_v25 = vpack.c.bf16 %v2445_v34, %v2443_v30  ;;  %v2391_v24 = vadd.f32 %v4936_v44, %v4954_v33  ;;  %v2440_v44 = vadd.f32 %v4985_v23, %v2396_v46 }
 0x569   :  { %v2151_v37 = vpop.f32.mrf.mxu0  ;;  %v2397_v33 = vadd.f32 %v4958_v27, %v4962_v53  ;;  %v2465_v45 = vpack.c.bf16 %v2449_v3, %v2447_v20  ;;  %v5055_v27 = vld [vmem:[%s5134_s13] ss:$0 sm:$0xff] }
 0x56a   :  { %v2400_v19 = vadd.f32 %v4979_v17, %v2151_v37  ;;  %v2438_v17 = vadd.f32 %v4985_v23, %v2394_v28  ;;  %v2435_v22 = vadd.f32 %v4982_v14, %v2391_v24  ;;  %v2462_v8 = vpack.c.bf16 %v2442_v32, %v2440_v44 }
 0x56b   :  { %v3184_v6 = vpop.f32.mrf.mxu0  ;;  %v2441_v0 = vadd.f32 %v4982_v14, %v2397_v33 }
 0x56c   :  { %v2406_v60 = vadd.f32 %v3184_v6, %v2372_v9  ;;  %v2444_v49 = vadd.f32 %v4985_v23, %v2400_v19  ;;  %v2460_v59 = vpack.c.bf16 %v2438_v17, %v2436_v38  ;;  %v2459_v13 = vpack.c.bf16 %v2437_v10, %v2435_v22 }
 0x56d   :  { %v2154_v42 = vpop.f32.mrf.mxu0  ;;  %2651 = vmatmul.mubr.bf16.gmra.mxu0 %v2455_v7  ;;  %v2461_v15 = vpack.c.bf16 %v2441_v0, %v2439_v18 }
 0x56e   :  { %v2402_v58 = vadd.f32 %v2362_v11, %v2154_v42  ;;  %2658 = vmatprep.mubr.bf16.mxu0 %v2458_v47  ;;  %v2450_v43 = vadd.f32 %v4985_v23, %v2406_v60  ;;  %v2448_v11 = vadd.f32 %v4985_v23, %v2404_v21 }
 0x570   :  { %v2446_v56 = vadd.f32 %v4985_v23, %v2402_v58  ;;  %v2466_v26 = vpack.c.bf16 %v2450_v43, %v2448_v11 }
 0x572   :  { %v2464_v16 = vpack.c.bf16 %v2446_v56, %v2444_v49 }
 0x574   :  { %2682 = vmatprep.mubr.bf16.mxu1 %v2464_v16 }
 0x575   :  { %2659 = vmatmul.mubr.bf16.gmra.mxu0 %v2457_v35  ;;  %2683 = vmatmul.mubr.bf16.vlgmr.msra.gmra.mxu1 %v2463_v25 }
 0x576   :  { %2666 = vmatprep.mubr.bf16.mxu0 %v2460_v59  ;;  %2690 = vmatprep.mubr.bf16.mxu1 %v2466_v26 }
 0x57d   :  { %2667 = vmatmul.mubr.bf16.gmra.mxu0 %v2459_v13  ;;  %2691 = vmatmul.mubr.bf16.gmra.mxu1 %v2465_v45 }
 0x57e   :  { %2674 = vmatprep.mubr.bf16.mxu0 %v2462_v8 }
 0x585   :  { %2675 = vmatmul.mubr.bf16.gmra.mxu0 %v2461_v15 }
 0x61d   :  { %v2977_v5 = vpop.f32.mrf.mxu0 }
 0x61f   :  { %v2978_v53 = vpop.f32.mrf.mxu0 }
 0x620   :  { %v2979_v23 = vadd.f32 %v2978_v53, %v2977_v5 }
 0x621   :  { %v2980_v1 = vpop.f32.mrf.mxu0 }
 0x622   :  { %v2637_v50 = vadd.f32 %v2979_v23, %v5055_v27 }
 0x623   :  { %v2981_v51 = vpop.f32.mrf.mxu0 }
 0x624   :  { %2699 = vst [vmem:[%s5135_s14] sm:$0xff] %v2637_v50  ;;  %v2982_v62 = vadd.f32 %v2981_v51, %v2980_v1 }
 0x625   :  { %v2983_v14 = vpop.f32.mrf.mxu0 }
 0x626   :  { %v2640_v48 = vadd.f32 %v2982_v62, %v5055_v27 }
 0x627   :  { %v2984_v55 = vpop.f32.mrf.mxu0 }
 0x628   :  { %2700 = vst [vmem:[%s5135_s14 + $0x8] sm:$0xff] %v2640_v48  ;;  %v2985_v57 = vadd.f32 %v2984_v55, %v2983_v14 }
 0x629   :  { %v2986_v37 = vpop.f32.mrf.mxu0 }
 0x62a   :  { %v2645_v9 = vadd.f32 %v2985_v57, %v5055_v27 }
 0x62b   :  { %v2987_v54 = vpop.f32.mrf.mxu0 }
 0x62c   :  { %2701 = vst [vmem:[%s5135_s14 + $0x10] sm:$0xff] %v2645_v9  ;;  %v2988_v61 = vadd.f32 %v2987_v54, %v2986_v37 }
 0x62d   :  { %v2989_v2 = vpop.f32.mrf.mxu0 }
 0x62e   :  { %v2648_v6 = vadd.f32 %v2988_v61, %v5055_v27 }
 0x62f   :  { %v2990_v7 = vpop.f32.mrf.mxu0 }
 0x630   :  { %2702 = vst [vmem:[%s5135_s14 + $0x18] sm:$0xff] %v2648_v6  ;;  %v2991_v28 = vadd.f32 %v2990_v7, %v2989_v2 }
 0x631   :  { %v2992_v19 = vpop.f32.mrf.mxu0 }
 0x632   :  { %v2653_v60 = vadd.f32 %v2991_v28, %v5055_v27 }
 0x633   :  { %v2993_v47 = vpop.f32.mrf.mxu0 }
 0x634   :  { %2703 = vst [vmem:[%s5135_s14 + $0x20] sm:$0xff] %v2653_v60  ;;  %v2994_v4 = vadd.f32 %v2993_v47, %v2992_v19 }
 0x635   :  { %v2995_v40 = vpop.f32.mrf.mxu0  ;;  %v3013_v42 = vpop.f32.mrf.mxu1 }
 0x636   :  { %v2656_v29 = vadd.f32 %v2994_v4, %v5055_v27 }
 0x637   :  { %v2996_v21 = vpop.f32.mrf.mxu0  ;;  %v3014_v58 = vpop.f32.mrf.mxu1 }
 0x638   :  { %2704 = vst [vmem:[%s5135_s14 + $0x28] sm:$0xff] %v2656_v29  ;;  %v2997_v52 = vadd.f32 %v2996_v21, %v2995_v40  ;;  %v3015_v34 = vadd.f32 %v3014_v58, %v3013_v42 }
 0x639   :  { %v2998_v17 = vpop.f32.mrf.mxu0  ;;  %v3016_v49 = vpop.f32.mrf.mxu1 }
 0x63a   :  { %v2661_v43 = vadd.f32 %v2997_v52, %v5055_v27  ;;  %v2685_v56 = vadd.f32 %v3015_v34, %v5055_v27 }
 0x63b   :  { %v2999_v41 = vpop.f32.mrf.mxu0  ;;  %v3017_v30 = vpop.f32.mrf.mxu1 }
 0x63c   :  { %2705 = vst [vmem:[%s5135_s14 + $0x30] sm:$0xff] %v2661_v43  ;;  %2711 = vst [vmem:[%s5135_s14 + $0x60] sm:$0xff] %v2685_v56  ;;  %v3000_v38 = vadd.f32 %v2999_v41, %v2998_v17  ;;  %v3018_v11 = vadd.f32 %v3017_v30, %v3016_v49 }
 0x63d   :  { %v3001_v16 = vpop.f32.mrf.mxu0  ;;  %v3019_v12 = vpop.f32.mrf.mxu1 }
 0x63e   :  { %v2664_v36 = vadd.f32 %v3000_v38, %v5055_v27  ;;  %v2688_v25 = vadd.f32 %v3018_v11, %v5055_v27 }
 0x63f   :  { %v3002_v35 = vpop.f32.mrf.mxu0  ;;  %v3020_v63 = vpop.f32.mrf.mxu1 }
 0x640   :  { %2706 = vst [vmem:[%s5135_s14 + $0x38] sm:$0xff] %v2664_v36  ;;  %2712 = vst [vmem:[%s5135_s14 + $0x68] sm:$0xff] %v2688_v25  ;;  %v3003_v59 = vadd.f32 %v3002_v35, %v3001_v16  ;;  %v3021_v26 = vadd.f32 %v3020_v63, %v3019_v12 }
 0x641   :  { %v3004_v24 = vpop.f32.mrf.mxu0  ;;  %v3022_v39 = vpop.f32.mrf.mxu1 }
 0x642   :  { %v2669_v46 = vadd.f32 %v3003_v59, %v5055_v27  ;;  %v2693_v10 = vadd.f32 %v3021_v26, %v5055_v27 }
 0x643   :  { %v3005_v3 = vpop.f32.mrf.mxu0  ;;  %v3023_v32 = vpop.f32.mrf.mxu1 }
 0x644   :  { %2707 = vst [vmem:[%s5135_s14 + $0x40] sm:$0xff] %v2669_v46  ;;  %2713 = vst [vmem:[%s5135_s14 + $0x70] sm:$0xff] %v2693_v10  ;;  %v3006_v22 = vadd.f32 %v3005_v3, %v3004_v24  ;;  %v3024_v20 = vadd.f32 %v3023_v32, %v3022_v39 }
 0x645   :  { %v3007_v44 = vpop.f32.mrf.mxu0 }
 0x646   :  { %v2672_v33 = vadd.f32 %v3006_v22, %v5055_v27  ;;  %v2696_v13 = vadd.f32 %v3024_v20, %v5055_v27 }
 0x647   :  { %v3008_v45 = vpop.f32.mrf.mxu0 }
 0x648   :  { %2708 = vst [vmem:[%s5135_s14 + $0x48] sm:$0xff] %v2672_v33  ;;  %2714 = vst [vmem:[%s5135_s14 + $0x78] sm:$0xff] %v2696_v13  ;;  %v3009_v8 = vadd.f32 %v3008_v45, %v3007_v44 }
 0x649   :  { %v3010_v31 = vpop.f32.mrf.mxu0 }
 0x64a   :  { %v2677_v0 = vadd.f32 %v3009_v8, %v5055_v27 }
 0x64b   :  { %v3011_v18 = vpop.f32.mrf.mxu0 }
 0x64c   :  { %2709 = vst [vmem:[%s5135_s14 + $0x50] sm:$0xff] %v2677_v0  ;;  %v3012_v15 = vadd.f32 %v3011_v18, %v3010_v31 }
 0x64e   :  { %v2680_v5 = vadd.f32 %v3012_v15, %v5055_v27 }
 0x650   :  { %2710 = vst [vmem:[%s5135_s14 + $0x58] sm:$0xff] %v2680_v5 }

</bundles_post_ra>
